<compile_context>
chip_gen: v5e
topology: v5e:2x2
jax: 0.10.0
libtpu: 0.0.40
codegen_flags: <defaults>
</compile_context>

<pallas_src>
import math

import jax
import jax.numpy as jnp
from jax.experimental import pallas as pl
from jax.experimental.pallas import tpu as pltpu

PAD = 3               # max dilation -> one halo serves all three convs
NEG_SLOPE = 0.01      # nn.LeakyReLU default
KSIZE = 3
IC_PER_GROUP = 3      # channel_num / groups
DILATIONS = (1, 2, 3)
INV_SQRT2 = 0.7071067811865476
_HAS_APPROX_RECIP = hasattr(pl, "reciprocal")


def _leaky(x):
    return jnp.where(x >= 0, x, NEG_SLOPE * x)


def _erf(x):
    # Abramowitz & Stegun 7.1.26 (|abs err| < 1.5e-7): matches torch.nn.GELU()
    # (exact-erf) to f32 tolerance.  The divide is an EUP approx reciprocal
    # refined with one Newton step.
    a1, a2, a3, a4, a5 = (0.254829592, -0.284496736, 1.421413741,
                          -1.453152027, 1.061405429)
    p = 0.3275911
    s = jnp.where(x >= 0, 1.0, -1.0)
    z = jnp.abs(x)
    d = 1.0 + p * z
    if _HAS_APPROX_RECIP:
        t = pl.reciprocal(d, approx=True)
        t = t * (2.0 - d * t)          # one Newton step -> ~f32-accurate
    else:
        t = 1.0 / d
    poly = ((((a5 * t + a4) * t + a3) * t + a2) * t + a1) * t
    return s * (1.0 - poly * jnp.exp(-z * z))


def _gelu_exact(x):
    return 0.5 * x * (1.0 + _erf(x * INV_SQRT2))


def _df_kernel(x_ref, w_ref, b_ref, l_ref, m_ref, h_ref, xpad_ref):
    # x_ref   : (1, 3*GT, H, W)           VMEM input block (unpadded)
    # w_ref   : (Cout*81,)                SMEM, [oc][conv][ic][ky][kx] flat
    # b_ref   : (Cout*3,)                 SMEM, [oc][conv] flat
    # l/m/h   : (1, GT, H, W)             VMEM output blocks
    # xpad_ref: (3*GT, H+2*PAD, W+2*PAD)  VMEM scratch with zero halo
    GT = l_ref.shape[1]
    H, W = l_ref.shape[2], l_ref.shape[3]
    Wp = W + 2 * PAD
    g = pl.program_id(1)

    # ---- in-kernel zero padding (no jnp.pad HBM round-trip) ---------------
    # rows [PAD, PAD+H) hold the image (zero y-halo above/below); columns
    # [0, W) hold the image and columns [W, W+2*PAD) are zero, so a lane
    # *rotation* (pltpu.roll) wraps shifted-out pixels into zeros, which is
    # exactly the conv's zero padding.
    xpad_ref[...] = jnp.zeros_like(xpad_ref)
    xpad_ref[:, pl.ds(PAD, H), pl.ds(0, W)] = x_ref[0]

    def xshift(row, dx):
        # (H, W) view of the padded row shifted by dx pixels horizontally.
        if dx == 0:
            return row[:, :W]
        return pltpu.roll(row, (-dx) % Wp, axis=1)[:, :W]

    for o in range(GT):
        oc = g * GT + o                                   # global out channel
        w_base = oc * (IC_PER_GROUP * 3 * KSIZE * KSIZE)  # 81 weights / chan
        b_base = oc * 3
        # bias broadcast hoisted out of all tap loops
        acc = [jnp.full((H, W), b_ref[b_base + ci], dtype=jnp.float32)
               for ci in range(3)]

        for ic in range(IC_PER_GROUP):
            c = IC_PER_GROUP * o + ic
            for dy in range(-PAD, PAD + 1):
                # (conv, ky) pairs whose vertical tap lands on this dy
                users = [(ci, ky) for ci, d in enumerate(DILATIONS)
                         for ky in range(KSIZE) if d * (ky - 1) == dy]
                if not users:
                    continue
                # one VMEM load per dy, reused by every tap of every conv
                row = xpad_ref[c, pl.ds(PAD + dy, H), :]
                # distinct horizontal shifts (centre tap deduped across convs)
                dxs = sorted({DILATIONS[ci] * (kx - 1)
                              for ci, _ in users for kx in range(KSIZE)})
                for dx in dxs:
                    patch = xshift(row, dx)
                    for ci, ky in users:
                        d = DILATIONS[ci]
                        if dx % d != 0 or abs(dx) > d:
                            continue
                        kx = dx // d + 1
                        wv = w_ref[w_base + ci * 27 + ic * 9 + ky * 3 + kx]
                        acc[ci] = acc[ci] + wv * patch

        c0 = _leaky(acc[0])   # self.C0 : dilation 1
        c1 = _leaky(acc[1])   # self.C1 : dilation 2
        c2 = _leaky(acc[2])   # self.C2 : dilation 3
        l = _gelu_exact(c2)
        m = _gelu_exact(c1 - l)
        h = _gelu_exact(c0 - c1)
        l_ref[0, o] = l
        m_ref[0, o] = m
        h_ref[0, o] = h


def _pick_group_tile(n, cout, h, w, *, vmem_budget=24 << 20, cap=4,
                     min_steps=4):
    """Largest divisor of cout (<= cap) whose per-step working set fits the
    budget, preferring one that still yields >= min_steps grid steps so the
    DMA pipeline (and both v7x TensorCores) stay busy even at N=1."""
    hp, wp = h + 2 * PAD, w + 2 * PAD
    divisors = [gt for gt in range(1, min(cout, cap) + 1) if cout % gt == 0]

    def fits(gt):
        per_step = 4 * gt * (2 * 3 * h * w        # input block, double-buffered
                             + 2 * 3 * h * w      # 3 output blocks, dbuf
                             + 3 * hp * wp)       # padded VMEM scratch
        return per_step <= vmem_budget

    ok = [gt for gt in divisors if fits(gt)] or [1]
    preferred = [gt for gt in ok if n * (cout // gt) >= min_steps]
    return max(preferred) if preferred else max(ok)


def df_forward(x, w0, b0, w1, b1, w2, b2):
    N, C, H, W = x.shape
    Cout = C // 3
    assert C == 3 * Cout, "channel_num must be divisible by 3"
    # TODO(synk): spatial (H, W) tiling with halo'd manual DMA for very large
    #             images (current kernel keeps full H, W per block).
    # TODO(synk): lane-dense output repacking when W < 128 (masked vst today).
    # TODO(synk): optional bf16 tap math on v6e/v7x (re-validate tolerance).

    GT = _pick_group_tile(N, Cout, H, W)
    n_gblk = Cout // GT
    Hp, Wp = H + 2 * PAD, W + 2 * PAD

    # weights packed [oc][conv][ic][ky][kx]; biases packed [oc][conv]
    w_all = jnp.stack([w0, w1, w2], axis=1).reshape(-1).astype(jnp.float32)
    b_all = jnp.stack([b0, b1, b2], axis=1).reshape(-1).astype(jnp.float32)

    out_shape = tuple(
        jax.ShapeDtypeStruct((N, Cout, H, W), jnp.float32) for _ in range(3))

    grid_spec = pltpu.PrefetchScalarGridSpec(
        num_scalar_prefetch=0,
        grid=(N, n_gblk),
        in_specs=[
            pl.BlockSpec((1, 3 * GT, H, W), lambda n, g: (n, g, 0, 0)),
            pl.BlockSpec(memory_space=pltpu.MemorySpace.SMEM),
            pl.BlockSpec(memory_space=pltpu.MemorySpace.SMEM),
        ],
        out_specs=tuple(
            pl.BlockSpec((1, GT, H, W), lambda n, g: (n, g, 0, 0))
            for _ in range(3)),
        scratch_shapes=[pltpu.VMEM((3 * GT, Hp, Wp), jnp.float32)],
    )

    return pl.pallas_call(
        _df_kernel,
        out_shape=out_shape,
        grid_spec=grid_spec,
        compiler_params=pltpu.CompilerParams(
            dimension_semantics=("parallel", "parallel"),
            vmem_limit_bytes=48 * 1024 * 1024),
    )(x.astype(jnp.float32), w_all, b_all)


def df_reference(x, w0, b0, w1, b1, w2, b2):
    """Pure-JAX reference (lax grouped conv + exact erf GELU)."""
    def gconv(x, w, b, d):
        out = jax.lax.conv_general_dilated(
            x, w, window_strides=(1, 1), padding=((d, d), (d, d)),
            rhs_dilation=(d, d),
            dimension_numbers=("NCHW", "OIHW", "NCHW"),
            feature_group_count=w.shape[0])
        return out + b[None, :, None, None]

    leaky = lambda v: jnp.where(v >= 0, v, NEG_SLOPE * v)
    gelu = lambda v: 0.5 * v * (1.0 + jax.lax.erf(v * INV_SQRT2))
    c0 = leaky(gconv(x, w0, b0, 1))
    c1 = leaky(gconv(x, w1, b1, 2))
    c2 = leaky(gconv(x, w2, b2, 3))
    l = gelu(c2)
    m = gelu(c1 - l)
    h = gelu(c0 - c1)
    return l, m, h


if __name__ == "__main__":
    key = jax.random.PRNGKey(0)
    N, C, H, W = 2, 6, 16, 16     # channel_num=6 -> Cout=2, groups=2
    Cout = C // 3

    k = jax.random.split(key, 8)
    x = jax.random.normal(k[0], (N, C, H, W), jnp.float32)

    # deterministic init, mimicking PyTorch Conv2d default (kaiming-uniform bound)
    fan_in = IC_PER_GROUP * KSIZE * KSIZE
    bound = 1.0 / math.sqrt(fan_in)
    w0 = jax.random.uniform(k[1], (Cout, 3, 3, 3), jnp.float32, -bound, bound)
    w1 = jax.random.uniform(k[2], (Cout, 3, 3, 3), jnp.float32, -bound, bound)
    w2 = jax.random.uniform(k[3], (Cout, 3, 3, 3), jnp.float32, -bound, bound)
    b0 = jax.random.uniform(k[4], (Cout,), jnp.float32, -bound, bound)
    b1 = jax.random.uniform(k[5], (Cout,), jnp.float32, -bound, bound)
    b2 = jax.random.uniform(k[6], (Cout,), jnp.float32, -bound, bound)

    l, m, h = jax.block_until_ready(df_forward(x, w0, b0, w1, b1, w2, b2))
    lr, mr, hr = df_reference(x, w0, b0, w1, b1, w2, b2)

    for got, ref in ((l, lr), (m, mr), (h, hr)):
        assert got.shape == (N, Cout, H, W) and got.dtype == jnp.float32
        assert jnp.allclose(got, ref, atol=1e-4, rtol=1e-4), (
            float(jnp.max(jnp.abs(got - ref))))

    print("KERNEL_OK")
</pallas_src>

<mosaic_0001>
module attributes {stable_mosaic.version = 11 : i64} {
  func.func @_df_kernel(%arg0: i32, %arg1: i32, %arg2: memref<1x3x16x16xf32, #tpu.memory_space<vmem>>, %arg3: memref<162xf32, #tpu.memory_space<smem>>, %arg4: memref<6xf32, #tpu.memory_space<smem>>, %arg5: memref<1x1x16x16xf32, #tpu.memory_space<vmem>>, %arg6: memref<1x1x16x16xf32, #tpu.memory_space<vmem>>, %arg7: memref<1x1x16x16xf32, #tpu.memory_space<vmem>>, %arg8: memref<3x22x22xf32, #tpu.memory_space<vmem>>) attributes {dimension_semantics = [#tpu.dimension_semantics<parallel>, #tpu.dimension_semantics<parallel>], iteration_bounds = array<i64: 2, 2>, scalar_prefetch = 0 : i64, scratch_operands = 1 : i64, tpu.core_type = #tpu.core_type<tc>, window_params = [{transform_indices = @transform_0, window_bounds = array<i64: 1, 3, 16, 16>}, {transform_indices = @transform_1, window_bounds = array<i64: 162>}, {transform_indices = @transform_2, window_bounds = array<i64: 6>}, {transform_indices = @transform_3, window_bounds = array<i64: 1, 1, 16, 16>}, {transform_indices = @transform_4, window_bounds = array<i64: 1, 1, 16, 16>}, {transform_indices = @transform_5, window_bounds = array<i64: 1, 1, 16, 16>}]} {
    %cst = arith.constant 0.000000e+00 : f32
    %0 = vector.broadcast %cst : f32 to vector<3x22x22xf32>
    %c0 = arith.constant 0 : index
    %c0_0 = arith.constant 0 : index
    %c0_1 = arith.constant 0 : index
    %1 = vector.load %arg8[%c0, %c0_0, %c0_1] : memref<3x22x22xf32, #tpu.memory_space<vmem>>, vector<3x22x22xf32>
    tpu.vector_store %arg8[%c0, %c0_0, %c0_1], %0 {strides = array<i32>} : memref<3x22x22xf32, #tpu.memory_space<vmem>>, vector<3x22x22xf32>,
    %c0_2 = arith.constant 0 : index
    %c0_3 = arith.constant 0 : index
    %c0_4 = arith.constant 0 : index
    %c0_5 = arith.constant 0 : index
    %2 = vector.load %arg2[%c0_2, %c0_3, %c0_4, %c0_5] : memref<1x3x16x16xf32, #tpu.memory_space<vmem>>, vector<1x3x16x16xf32>
    %3 = vector.shape_cast %2 : vector<1x3x16x16xf32> to vector<3x16x16xf32>
    %c0_6 = arith.constant 0 : index
    %c3 = arith.constant 3 : index
    %c0_7 = arith.constant 0 : index
    %4 = vector.load %arg8[%c0_6, %c3, %c0_7] : memref<3x22x22xf32, #tpu.memory_space<vmem>>, vector<3x16x16xf32>
    tpu.vector_store %arg8[%c0_6, %c3, %c0_7], %3 {strides = array<i32>} : memref<3x22x22xf32, #tpu.memory_space<vmem>>, vector<3x16x16xf32>,
    %c1_i32 = arith.constant 1 : i32
    %5 = arith.muli %arg1, %c1_i32 : i32
    %c0_i32 = arith.constant 0 : i32
    %6 = arith.addi %5, %c0_i32 : i32
    %c81_i32 = arith.constant 81 : i32
    %7 = arith.muli %6, %c81_i32 : i32
    %c3_i32 = arith.constant 3 : i32
    %8 = arith.muli %6, %c3_i32 : i32
    %c0_i32_8 = arith.constant 0 : i32
    %9 = arith.addi %8, %c0_i32_8 : i32
    %10 = arith.index_cast %9 : i32 to index
    %11 = memref.load %arg4[%10] : memref<6xf32, #tpu.memory_space<smem>>
    %12 = vector.broadcast %11 : f32 to vector<16x16xf32>
    %c1_i32_9 = arith.constant 1 : i32
    %13 = arith.addi %8, %c1_i32_9 : i32
    %14 = arith.index_cast %13 : i32 to index
    %15 = memref.load %arg4[%14] : memref<6xf32, #tpu.memory_space<smem>>
    %16 = vector.broadcast %15 : f32 to vector<16x16xf32>
    %c2_i32 = arith.constant 2 : i32
    %17 = arith.addi %8, %c2_i32 : i32
    %18 = arith.index_cast %17 : i32 to index
    %19 = memref.load %arg4[%18] : memref<6xf32, #tpu.memory_space<smem>>
    %20 = vector.broadcast %19 : f32 to vector<16x16xf32>
    %c0_10 = arith.constant 0 : index
    %c0_11 = arith.constant 0 : index
    %c0_12 = arith.constant 0 : index
    %21 = vector.load %arg8[%c0_10, %c0_11, %c0_12] : memref<3x22x22xf32, #tpu.memory_space<vmem>>, vector<1x16x22xf32>
    %22 = vector.shape_cast %21 : vector<1x16x22xf32> to vector<16x22xf32>
    %c3_i32_13 = arith.constant 3 : i32
    %23 = tpu.dynamic_rotate %22 by %c3_i32_13 dim 1 : vector<16x22xf32>, i32 -> vector<16x22xf32>
    %24 = vector.extract_strided_slice %23 {offsets = [0, 0], sizes = [16, 16], strides = [1, 1]} : vector<16x22xf32> to vector<16x16xf32>
    %c54_i32 = arith.constant 54 : i32
    %25 = arith.addi %7, %c54_i32 : i32
    %c0_i32_14 = arith.constant 0 : i32
    %26 = arith.addi %25, %c0_i32_14 : i32
    %c0_i32_15 = arith.constant 0 : i32
    %27 = arith.addi %26, %c0_i32_15 : i32
    %c0_i32_16 = arith.constant 0 : i32
    %28 = arith.addi %27, %c0_i32_16 : i32
    %29 = arith.index_cast %28 : i32 to index
    %30 = memref.load %arg3[%29] : memref<162xf32, #tpu.memory_space<smem>>
    %31 = vector.broadcast %30 : f32 to vector<16x16xf32>
    %32 = arith.mulf %31, %24 : vector<16x16xf32>
    %33 = arith.addf %20, %32 : vector<16x16xf32>
    %34 = vector.extract_strided_slice %22 {offsets = [0, 0], sizes = [16, 16], strides = [1, 1]} : vector<16x22xf32> to vector<16x16xf32>
    %c54_i32_17 = arith.constant 54 : i32
    %35 = arith.addi %7, %c54_i32_17 : i32
    %c0_i32_18 = arith.constant 0 : i32
    %36 = arith.addi %35, %c0_i32_18 : i32
    %c0_i32_19 = arith.constant 0 : i32
    %37 = arith.addi %36, %c0_i32_19 : i32
    %c1_i32_20 = arith.constant 1 : i32
    %38 = arith.addi %37, %c1_i32_20 : i32
    %39 = arith.index_cast %38 : i32 to index
    %40 = memref.load %arg3[%39] : memref<162xf32, #tpu.memory_space<smem>>
    %41 = vector.broadcast %40 : f32 to vector<16x16xf32>
    %42 = arith.mulf %41, %34 : vector<16x16xf32>
    %43 = arith.addf %33, %42 : vector<16x16xf32>
    %c19_i32 = arith.constant 19 : i32
    %44 = tpu.dynamic_rotate %22 by %c19_i32 dim 1 : vector<16x22xf32>, i32 -> vector<16x22xf32>
    %45 = vector.extract_strided_slice %44 {offsets = [0, 0], sizes = [16, 16], strides = [1, 1]} : vector<16x22xf32> to vector<16x16xf32>
    %c54_i32_21 = arith.constant 54 : i32
    %46 = arith.addi %7, %c54_i32_21 : i32
    %c0_i32_22 = arith.constant 0 : i32
    %47 = arith.addi %46, %c0_i32_22 : i32
    %c0_i32_23 = arith.constant 0 : i32
    %48 = arith.addi %47, %c0_i32_23 : i32
    %c2_i32_24 = arith.constant 2 : i32
    %49 = arith.addi %48, %c2_i32_24 : i32
    %50 = arith.index_cast %49 : i32 to index
    %51 = memref.load %arg3[%50] : memref<162xf32, #tpu.memory_space<smem>>
    %52 = vector.broadcast %51 : f32 to vector<16x16xf32>
    %53 = arith.mulf %52, %45 : vector<16x16xf32>
    %54 = arith.addf %43, %53 : vector<16x16xf32>
    %c0_25 = arith.constant 0 : index
    %c1 = arith.constant 1 : index
    %c0_26 = arith.constant 0 : index
    %55 = vector.load %arg8[%c0_25, %c1, %c0_26] : memref<3x22x22xf32, #tpu.memory_space<vmem>>, vector<1x16x22xf32>
    %56 = vector.shape_cast %55 : vector<1x16x22xf32> to vector<16x22xf32>
    %c2_i32_27 = arith.constant 2 : i32
    %57 = tpu.dynamic_rotate %56 by %c2_i32_27 dim 1 : vector<16x22xf32>, i32 -> vector<16x22xf32>
    %58 = vector.extract_strided_slice %57 {offsets = [0, 0], sizes = [16, 16], strides = [1, 1]} : vector<16x22xf32> to vector<16x16xf32>
    %c27_i32 = arith.constant 27 : i32
    %59 = arith.addi %7, %c27_i32 : i32
    %c0_i32_28 = arith.constant 0 : i32
    %60 = arith.addi %59, %c0_i32_28 : i32
    %c0_i32_29 = arith.constant 0 : i32
    %61 = arith.addi %60, %c0_i32_29 : i32
    %c0_i32_30 = arith.constant 0 : i32
    %62 = arith.addi %61, %c0_i32_30 : i32
    %63 = arith.index_cast %62 : i32 to index
    %64 = memref.load %arg3[%63] : memref<162xf32, #tpu.memory_space<smem>>
    %65 = vector.broadcast %64 : f32 to vector<16x16xf32>
    %66 = arith.mulf %65, %58 : vector<16x16xf32>
    %67 = arith.addf %16, %66 : vector<16x16xf32>
    %68 = vector.extract_strided_slice %56 {offsets = [0, 0], sizes = [16, 16], strides = [1, 1]} : vector<16x22xf32> to vector<16x16xf32>
    %c27_i32_31 = arith.constant 27 : i32
    %69 = arith.addi %7, %c27_i32_31 : i32
    %c0_i32_32 = arith.constant 0 : i32
    %70 = arith.addi %69, %c0_i32_32 : i32
    %c0_i32_33 = arith.constant 0 : i32
    %71 = arith.addi %70, %c0_i32_33 : i32
    %c1_i32_34 = arith.constant 1 : i32
    %72 = arith.addi %71, %c1_i32_34 : i32
    %73 = arith.index_cast %72 : i32 to index
    %74 = memref.load %arg3[%73] : memref<162xf32, #tpu.memory_space<smem>>
    %75 = vector.broadcast %74 : f32 to vector<16x16xf32>
    %76 = arith.mulf %75, %68 : vector<16x16xf32>
    %77 = arith.addf %67, %76 : vector<16x16xf32>
    %c20_i32 = arith.constant 20 : i32
    %78 = tpu.dynamic_rotate %56 by %c20_i32 dim 1 : vector<16x22xf32>, i32 -> vector<16x22xf32>
    %79 = vector.extract_strided_slice %78 {offsets = [0, 0], sizes = [16, 16], strides = [1, 1]} : vector<16x22xf32> to vector<16x16xf32>
    %c27_i32_35 = arith.constant 27 : i32
    %80 = arith.addi %7, %c27_i32_35 : i32
    %c0_i32_36 = arith.constant 0 : i32
    %81 = arith.addi %80, %c0_i32_36 : i32
    %c0_i32_37 = arith.constant 0 : i32
    %82 = arith.addi %81, %c0_i32_37 : i32
    %c2_i32_38 = arith.constant 2 : i32
    %83 = arith.addi %82, %c2_i32_38 : i32
    %84 = arith.index_cast %83 : i32 to index
    %85 = memref.load %arg3[%84] : memref<162xf32, #tpu.memory_space<smem>>
    %86 = vector.broadcast %85 : f32 to vector<16x16xf32>
    %87 = arith.mulf %86, %79 : vector<16x16xf32>
    %88 = arith.addf %77, %87 : vector<16x16xf32>
    %c0_39 = arith.constant 0 : index
    %c2 = arith.constant 2 : index
    %c0_40 = arith.constant 0 : index
    %89 = vector.load %arg8[%c0_39, %c2, %c0_40] : memref<3x22x22xf32, #tpu.memory_space<vmem>>, vector<1x16x22xf32>
    %90 = vector.shape_cast %89 : vector<1x16x22xf32> to vector<16x22xf32>
    %c1_i32_41 = arith.constant 1 : i32
    %91 = tpu.dynamic_rotate %90 by %c1_i32_41 dim 1 : vector<16x22xf32>, i32 -> vector<16x22xf32>
    %92 = vector.extract_strided_slice %91 {offsets = [0, 0], sizes = [16, 16], strides = [1, 1]} : vector<16x22xf32> to vector<16x16xf32>
    %c0_i32_42 = arith.constant 0 : i32
    %93 = arith.addi %7, %c0_i32_42 : i32
    %c0_i32_43 = arith.constant 0 : i32
    %94 = arith.addi %93, %c0_i32_43 : i32
    %c0_i32_44 = arith.constant 0 : i32
    %95 = arith.addi %94, %c0_i32_44 : i32
    %c0_i32_45 = arith.constant 0 : i32
    %96 = arith.addi %95, %c0_i32_45 : i32
    %97 = arith.index_cast %96 : i32 to index
    %98 = memref.load %arg3[%97] : memref<162xf32, #tpu.memory_space<smem>>
    %99 = vector.broadcast %98 : f32 to vector<16x16xf32>
    %100 = arith.mulf %99, %92 : vector<16x16xf32>
    %101 = arith.addf %12, %100 : vector<16x16xf32>
    %102 = vector.extract_strided_slice %90 {offsets = [0, 0], sizes = [16, 16], strides = [1, 1]} : vector<16x22xf32> to vector<16x16xf32>
    %c0_i32_46 = arith.constant 0 : i32
    %103 = arith.addi %7, %c0_i32_46 : i32
    %c0_i32_47 = arith.constant 0 : i32
    %104 = arith.addi %103, %c0_i32_47 : i32
    %c0_i32_48 = arith.constant 0 : i32
    %105 = arith.addi %104, %c0_i32_48 : i32
    %c1_i32_49 = arith.constant 1 : i32
    %106 = arith.addi %105, %c1_i32_49 : i32
    %107 = arith.index_cast %106 : i32 to index
    %108 = memref.load %arg3[%107] : memref<162xf32, #tpu.memory_space<smem>>
    %109 = vector.broadcast %108 : f32 to vector<16x16xf32>
    %110 = arith.mulf %109, %102 : vector<16x16xf32>
    %111 = arith.addf %101, %110 : vector<16x16xf32>
    %c21_i32 = arith.constant 21 : i32
    %112 = tpu.dynamic_rotate %90 by %c21_i32 dim 1 : vector<16x22xf32>, i32 -> vector<16x22xf32>
    %113 = vector.extract_strided_slice %112 {offsets = [0, 0], sizes = [16, 16], strides = [1, 1]} : vector<16x22xf32> to vector<16x16xf32>
    %c0_i32_50 = arith.constant 0 : i32
    %114 = arith.addi %7, %c0_i32_50 : i32
    %c0_i32_51 = arith.constant 0 : i32
    %115 = arith.addi %114, %c0_i32_51 : i32
    %c0_i32_52 = arith.constant 0 : i32
    %116 = arith.addi %115, %c0_i32_52 : i32
    %c2_i32_53 = arith.constant 2 : i32
    %117 = arith.addi %116, %c2_i32_53 : i32
    %118 = arith.index_cast %117 : i32 to index
    %119 = memref.load %arg3[%118] : memref<162xf32, #tpu.memory_space<smem>>
    %120 = vector.broadcast %119 : f32 to vector<16x16xf32>
    %121 = arith.mulf %120, %113 : vector<16x16xf32>
    %122 = arith.addf %111, %121 : vector<16x16xf32>
    %c0_54 = arith.constant 0 : index
    %c3_55 = arith.constant 3 : index
    %c0_56 = arith.constant 0 : index
    %123 = vector.load %arg8[%c0_54, %c3_55, %c0_56] : memref<3x22x22xf32, #tpu.memory_space<vmem>>, vector<1x16x22xf32>
    %124 = vector.shape_cast %123 : vector<1x16x22xf32> to vector<16x22xf32>
    %c3_i32_57 = arith.constant 3 : i32
    %125 = tpu.dynamic_rotate %124 by %c3_i32_57 dim 1 : vector<16x22xf32>, i32 -> vector<16x22xf32>
    %126 = vector.extract_strided_slice %125 {offsets = [0, 0], sizes = [16, 16], strides = [1, 1]} : vector<16x22xf32> to vector<16x16xf32>
    %c54_i32_58 = arith.constant 54 : i32
    %127 = arith.addi %7, %c54_i32_58 : i32
    %c0_i32_59 = arith.constant 0 : i32
    %128 = arith.addi %127, %c0_i32_59 : i32
    %c3_i32_60 = arith.constant 3 : i32
    %129 = arith.addi %128, %c3_i32_60 : i32
    %c0_i32_61 = arith.constant 0 : i32
    %130 = arith.addi %129, %c0_i32_61 : i32
    %131 = arith.index_cast %130 : i32 to index
    %132 = memref.load %arg3[%131] : memref<162xf32, #tpu.memory_space<smem>>
    %133 = vector.broadcast %132 : f32 to vector<16x16xf32>
    %134 = arith.mulf %133, %126 : vector<16x16xf32>
    %135 = arith.addf %54, %134 : vector<16x16xf32>
    %c2_i32_62 = arith.constant 2 : i32
    %136 = tpu.dynamic_rotate %124 by %c2_i32_62 dim 1 : vector<16x22xf32>, i32 -> vector<16x22xf32>
    %137 = vector.extract_strided_slice %136 {offsets = [0, 0], sizes = [16, 16], strides = [1, 1]} : vector<16x22xf32> to vector<16x16xf32>
    %c27_i32_63 = arith.constant 27 : i32
    %138 = arith.addi %7, %c27_i32_63 : i32
    %c0_i32_64 = arith.constant 0 : i32
    %139 = arith.addi %138, %c0_i32_64 : i32
    %c3_i32_65 = arith.constant 3 : i32
    %140 = arith.addi %139, %c3_i32_65 : i32
    %c0_i32_66 = arith.constant 0 : i32
    %141 = arith.addi %140, %c0_i32_66 : i32
    %142 = arith.index_cast %141 : i32 to index
    %143 = memref.load %arg3[%142] : memref<162xf32, #tpu.memory_space<smem>>
    %144 = vector.broadcast %143 : f32 to vector<16x16xf32>
    %145 = arith.mulf %144, %137 : vector<16x16xf32>
    %146 = arith.addf %88, %145 : vector<16x16xf32>
    %c1_i32_67 = arith.constant 1 : i32
    %147 = tpu.dynamic_rotate %124 by %c1_i32_67 dim 1 : vector<16x22xf32>, i32 -> vector<16x22xf32>
    %148 = vector.extract_strided_slice %147 {offsets = [0, 0], sizes = [16, 16], strides = [1, 1]} : vector<16x22xf32> to vector<16x16xf32>
    %c0_i32_68 = arith.constant 0 : i32
    %149 = arith.addi %7, %c0_i32_68 : i32
    %c0_i32_69 = arith.constant 0 : i32
    %150 = arith.addi %149, %c0_i32_69 : i32
    %c3_i32_70 = arith.constant 3 : i32
    %151 = arith.addi %150, %c3_i32_70 : i32
    %c0_i32_71 = arith.constant 0 : i32
    %152 = arith.addi %151, %c0_i32_71 : i32
    %153 = arith.index_cast %152 : i32 to index
    %154 = memref.load %arg3[%153] : memref<162xf32, #tpu.memory_space<smem>>
    %155 = vector.broadcast %154 : f32 to vector<16x16xf32>
    %156 = arith.mulf %155, %148 : vector<16x16xf32>
    %157 = arith.addf %122, %156 : vector<16x16xf32>
    %158 = vector.extract_strided_slice %124 {offsets = [0, 0], sizes = [16, 16], strides = [1, 1]} : vector<16x22xf32> to vector<16x16xf32>
    %c0_i32_72 = arith.constant 0 : i32
    %159 = arith.addi %7, %c0_i32_72 : i32
    %c0_i32_73 = arith.constant 0 : i32
    %160 = arith.addi %159, %c0_i32_73 : i32
    %c3_i32_74 = arith.constant 3 : i32
    %161 = arith.addi %160, %c3_i32_74 : i32
    %c1_i32_75 = arith.constant 1 : i32
    %162 = arith.addi %161, %c1_i32_75 : i32
    %163 = arith.index_cast %162 : i32 to index
    %164 = memref.load %arg3[%163] : memref<162xf32, #tpu.memory_space<smem>>
    %165 = vector.broadcast %164 : f32 to vector<16x16xf32>
    %166 = arith.mulf %165, %158 : vector<16x16xf32>
    %167 = arith.addf %157, %166 : vector<16x16xf32>
    %c27_i32_76 = arith.constant 27 : i32
    %168 = arith.addi %7, %c27_i32_76 : i32
    %c0_i32_77 = arith.constant 0 : i32
    %169 = arith.addi %168, %c0_i32_77 : i32
    %c3_i32_78 = arith.constant 3 : i32
    %170 = arith.addi %169, %c3_i32_78 : i32
    %c1_i32_79 = arith.constant 1 : i32
    %171 = arith.addi %170, %c1_i32_79 : i32
    %172 = arith.index_cast %171 : i32 to index
    %173 = memref.load %arg3[%172] : memref<162xf32, #tpu.memory_space<smem>>
    %174 = vector.broadcast %173 : f32 to vector<16x16xf32>
    %175 = arith.mulf %174, %158 : vector<16x16xf32>
    %176 = arith.addf %146, %175 : vector<16x16xf32>
    %c54_i32_80 = arith.constant 54 : i32
    %177 = arith.addi %7, %c54_i32_80 : i32
    %c0_i32_81 = arith.constant 0 : i32
    %178 = arith.addi %177, %c0_i32_81 : i32
    %c3_i32_82 = arith.constant 3 : i32
    %179 = arith.addi %178, %c3_i32_82 : i32
    %c1_i32_83 = arith.constant 1 : i32
    %180 = arith.addi %179, %c1_i32_83 : i32
    %181 = arith.index_cast %180 : i32 to index
    %182 = memref.load %arg3[%181] : memref<162xf32, #tpu.memory_space<smem>>
    %183 = vector.broadcast %182 : f32 to vector<16x16xf32>
    %184 = arith.mulf %183, %158 : vector<16x16xf32>
    %185 = arith.addf %135, %184 : vector<16x16xf32>
    %c21_i32_84 = arith.constant 21 : i32
    %186 = tpu.dynamic_rotate %124 by %c21_i32_84 dim 1 : vector<16x22xf32>, i32 -> vector<16x22xf32>
    %187 = vector.extract_strided_slice %186 {offsets = [0, 0], sizes = [16, 16], strides = [1, 1]} : vector<16x22xf32> to vector<16x16xf32>
    %c0_i32_85 = arith.constant 0 : i32
    %188 = arith.addi %7, %c0_i32_85 : i32
    %c0_i32_86 = arith.constant 0 : i32
    %189 = arith.addi %188, %c0_i32_86 : i32
    %c3_i32_87 = arith.constant 3 : i32
    %190 = arith.addi %189, %c3_i32_87 : i32
    %c2_i32_88 = arith.constant 2 : i32
    %191 = arith.addi %190, %c2_i32_88 : i32
    %192 = arith.index_cast %191 : i32 to index
    %193 = memref.load %arg3[%192] : memref<162xf32, #tpu.memory_space<smem>>
    %194 = vector.broadcast %193 : f32 to vector<16x16xf32>
    %195 = arith.mulf %194, %187 : vector<16x16xf32>
    %196 = arith.addf %167, %195 : vector<16x16xf32>
    %c20_i32_89 = arith.constant 20 : i32
    %197 = tpu.dynamic_rotate %124 by %c20_i32_89 dim 1 : vector<16x22xf32>, i32 -> vector<16x22xf32>
    %198 = vector.extract_strided_slice %197 {offsets = [0, 0], sizes = [16, 16], strides = [1, 1]} : vector<16x22xf32> to vector<16x16xf32>
    %c27_i32_90 = arith.constant 27 : i32
    %199 = arith.addi %7, %c27_i32_90 : i32
    %c0_i32_91 = arith.constant 0 : i32
    %200 = arith.addi %199, %c0_i32_91 : i32
    %c3_i32_92 = arith.constant 3 : i32
    %201 = arith.addi %200, %c3_i32_92 : i32
    %c2_i32_93 = arith.constant 2 : i32
    %202 = arith.addi %201, %c2_i32_93 : i32
    %203 = arith.index_cast %202 : i32 to index
    %204 = memref.load %arg3[%203] : memref<162xf32, #tpu.memory_space<smem>>
    %205 = vector.broadcast %204 : f32 to vector<16x16xf32>
    %206 = arith.mulf %205, %198 : vector<16x16xf32>
    %207 = arith.addf %176, %206 : vector<16x16xf32>
    %c19_i32_94 = arith.constant 19 : i32
    %208 = tpu.dynamic_rotate %124 by %c19_i32_94 dim 1 : vector<16x22xf32>, i32 -> vector<16x22xf32>
    %209 = vector.extract_strided_slice %208 {offsets = [0, 0], sizes = [16, 16], strides = [1, 1]} : vector<16x22xf32> to vector<16x16xf32>
    %c54_i32_95 = arith.constant 54 : i32
    %210 = arith.addi %7, %c54_i32_95 : i32
    %c0_i32_96 = arith.constant 0 : i32
    %211 = arith.addi %210, %c0_i32_96 : i32
    %c3_i32_97 = arith.constant 3 : i32
    %212 = arith.addi %211, %c3_i32_97 : i32
    %c2_i32_98 = arith.constant 2 : i32
    %213 = arith.addi %212, %c2_i32_98 : i32
    %214 = arith.index_cast %213 : i32 to index
    %215 = memref.load %arg3[%214] : memref<162xf32, #tpu.memory_space<smem>>
    %216 = vector.broadcast %215 : f32 to vector<16x16xf32>
    %217 = arith.mulf %216, %209 : vector<16x16xf32>
    %218 = arith.addf %185, %217 : vector<16x16xf32>
    %c0_99 = arith.constant 0 : index
    %c4 = arith.constant 4 : index
    %c0_100 = arith.constant 0 : index
    %219 = vector.load %arg8[%c0_99, %c4, %c0_100] : memref<3x22x22xf32, #tpu.memory_space<vmem>>, vector<1x16x22xf32>
    %220 = vector.shape_cast %219 : vector<1x16x22xf32> to vector<16x22xf32>
    %c1_i32_101 = arith.constant 1 : i32
    %221 = tpu.dynamic_rotate %220 by %c1_i32_101 dim 1 : vector<16x22xf32>, i32 -> vector<16x22xf32>
    %222 = vector.extract_strided_slice %221 {offsets = [0, 0], sizes = [16, 16], strides = [1, 1]} : vector<16x22xf32> to vector<16x16xf32>
    %c0_i32_102 = arith.constant 0 : i32
    %223 = arith.addi %7, %c0_i32_102 : i32
    %c0_i32_103 = arith.constant 0 : i32
    %224 = arith.addi %223, %c0_i32_103 : i32
    %c6_i32 = arith.constant 6 : i32
    %225 = arith.addi %224, %c6_i32 : i32
    %c0_i32_104 = arith.constant 0 : i32
    %226 = arith.addi %225, %c0_i32_104 : i32
    %227 = arith.index_cast %226 : i32 to index
    %228 = memref.load %arg3[%227] : memref<162xf32, #tpu.memory_space<smem>>
    %229 = vector.broadcast %228 : f32 to vector<16x16xf32>
    %230 = arith.mulf %229, %222 : vector<16x16xf32>
    %231 = arith.addf %196, %230 : vector<16x16xf32>
    %232 = vector.extract_strided_slice %220 {offsets = [0, 0], sizes = [16, 16], strides = [1, 1]} : vector<16x22xf32> to vector<16x16xf32>
    %c0_i32_105 = arith.constant 0 : i32
    %233 = arith.addi %7, %c0_i32_105 : i32
    %c0_i32_106 = arith.constant 0 : i32
    %234 = arith.addi %233, %c0_i32_106 : i32
    %c6_i32_107 = arith.constant 6 : i32
    %235 = arith.addi %234, %c6_i32_107 : i32
    %c1_i32_108 = arith.constant 1 : i32
    %236 = arith.addi %235, %c1_i32_108 : i32
    %237 = arith.index_cast %236 : i32 to index
    %238 = memref.load %arg3[%237] : memref<162xf32, #tpu.memory_space<smem>>
    %239 = vector.broadcast %238 : f32 to vector<16x16xf32>
    %240 = arith.mulf %239, %232 : vector<16x16xf32>
    %241 = arith.addf %231, %240 : vector<16x16xf32>
    %c21_i32_109 = arith.constant 21 : i32
    %242 = tpu.dynamic_rotate %220 by %c21_i32_109 dim 1 : vector<16x22xf32>, i32 -> vector<16x22xf32>
    %243 = vector.extract_strided_slice %242 {offsets = [0, 0], sizes = [16, 16], strides = [1, 1]} : vector<16x22xf32> to vector<16x16xf32>
    %c0_i32_110 = arith.constant 0 : i32
    %244 = arith.addi %7, %c0_i32_110 : i32
    %c0_i32_111 = arith.constant 0 : i32
    %245 = arith.addi %244, %c0_i32_111 : i32
    %c6_i32_112 = arith.constant 6 : i32
    %246 = arith.addi %245, %c6_i32_112 : i32
    %c2_i32_113 = arith.constant 2 : i32
    %247 = arith.addi %246, %c2_i32_113 : i32
    %248 = arith.index_cast %247 : i32 to index
    %249 = memref.load %arg3[%248] : memref<162xf32, #tpu.memory_space<smem>>
    %250 = vector.broadcast %249 : f32 to vector<16x16xf32>
    %251 = arith.mulf %250, %243 : vector<16x16xf32>
    %252 = arith.addf %241, %251 : vector<16x16xf32>
    %c0_114 = arith.constant 0 : index
    %c5 = arith.constant 5 : index
    %c0_115 = arith.constant 0 : index
    %253 = vector.load %arg8[%c0_114, %c5, %c0_115] : memref<3x22x22xf32, #tpu.memory_space<vmem>>, vector<1x16x22xf32>
    %254 = vector.shape_cast %253 : vector<1x16x22xf32> to vector<16x22xf32>
    %c2_i32_116 = arith.constant 2 : i32
    %255 = tpu.dynamic_rotate %254 by %c2_i32_116 dim 1 : vector<16x22xf32>, i32 -> vector<16x22xf32>
    %256 = vector.extract_strided_slice %255 {offsets = [0, 0], sizes = [16, 16], strides = [1, 1]} : vector<16x22xf32> to vector<16x16xf32>
    %c27_i32_117 = arith.constant 27 : i32
    %257 = arith.addi %7, %c27_i32_117 : i32
    %c0_i32_118 = arith.constant 0 : i32
    %258 = arith.addi %257, %c0_i32_118 : i32
    %c6_i32_119 = arith.constant 6 : i32
    %259 = arith.addi %258, %c6_i32_119 : i32
    %c0_i32_120 = arith.constant 0 : i32
    %260 = arith.addi %259, %c0_i32_120 : i32
    %261 = arith.index_cast %260 : i32 to index
    %262 = memref.load %arg3[%261] : memref<162xf32, #tpu.memory_space<smem>>
    %263 = vector.broadcast %262 : f32 to vector<16x16xf32>
    %264 = arith.mulf %263, %256 : vector<16x16xf32>
    %265 = arith.addf %207, %264 : vector<16x16xf32>
    %266 = vector.extract_strided_slice %254 {offsets = [0, 0], sizes = [16, 16], strides = [1, 1]} : vector<16x22xf32> to vector<16x16xf32>
    %c27_i32_121 = arith.constant 27 : i32
    %267 = arith.addi %7, %c27_i32_121 : i32
    %c0_i32_122 = arith.constant 0 : i32
    %268 = arith.addi %267, %c0_i32_122 : i32
    %c6_i32_123 = arith.constant 6 : i32
    %269 = arith.addi %268, %c6_i32_123 : i32
    %c1_i32_124 = arith.constant 1 : i32
    %270 = arith.addi %269, %c1_i32_124 : i32
    %271 = arith.index_cast %270 : i32 to index
    %272 = memref.load %arg3[%271] : memref<162xf32, #tpu.memory_space<smem>>
    %273 = vector.broadcast %272 : f32 to vector<16x16xf32>
    %274 = arith.mulf %273, %266 : vector<16x16xf32>
    %275 = arith.addf %265, %274 : vector<16x16xf32>
    %c20_i32_125 = arith.constant 20 : i32
    %276 = tpu.dynamic_rotate %254 by %c20_i32_125 dim 1 : vector<16x22xf32>, i32 -> vector<16x22xf32>
    %277 = vector.extract_strided_slice %276 {offsets = [0, 0], sizes = [16, 16], strides = [1, 1]} : vector<16x22xf32> to vector<16x16xf32>
    %c27_i32_126 = arith.constant 27 : i32
    %278 = arith.addi %7, %c27_i32_126 : i32
    %c0_i32_127 = arith.constant 0 : i32
    %279 = arith.addi %278, %c0_i32_127 : i32
    %c6_i32_128 = arith.constant 6 : i32
    %280 = arith.addi %279, %c6_i32_128 : i32
    %c2_i32_129 = arith.constant 2 : i32
    %281 = arith.addi %280, %c2_i32_129 : i32
    %282 = arith.index_cast %281 : i32 to index
    %283 = memref.load %arg3[%282] : memref<162xf32, #tpu.memory_space<smem>>
    %284 = vector.broadcast %283 : f32 to vector<16x16xf32>
    %285 = arith.mulf %284, %277 : vector<16x16xf32>
    %286 = arith.addf %275, %285 : vector<16x16xf32>
    %c0_130 = arith.constant 0 : index
    %c6 = arith.constant 6 : index
    %c0_131 = arith.constant 0 : index
    %287 = vector.load %arg8[%c0_130, %c6, %c0_131] : memref<3x22x22xf32, #tpu.memory_space<vmem>>, vector<1x16x22xf32>
    %288 = vector.shape_cast %287 : vector<1x16x22xf32> to vector<16x22xf32>
    %c3_i32_132 = arith.constant 3 : i32
    %289 = tpu.dynamic_rotate %288 by %c3_i32_132 dim 1 : vector<16x22xf32>, i32 -> vector<16x22xf32>
    %290 = vector.extract_strided_slice %289 {offsets = [0, 0], sizes = [16, 16], strides = [1, 1]} : vector<16x22xf32> to vector<16x16xf32>
    %c54_i32_133 = arith.constant 54 : i32
    %291 = arith.addi %7, %c54_i32_133 : i32
    %c0_i32_134 = arith.constant 0 : i32
    %292 = arith.addi %291, %c0_i32_134 : i32
    %c6_i32_135 = arith.constant 6 : i32
    %293 = arith.addi %292, %c6_i32_135 : i32
    %c0_i32_136 = arith.constant 0 : i32
    %294 = arith.addi %293, %c0_i32_136 : i32
    %295 = arith.index_cast %294 : i32 to index
    %296 = memref.load %arg3[%295] : memref<162xf32, #tpu.memory_space<smem>>
    %297 = vector.broadcast %296 : f32 to vector<16x16xf32>
    %298 = arith.mulf %297, %290 : vector<16x16xf32>
    %299 = arith.addf %218, %298 : vector<16x16xf32>
    %300 = vector.extract_strided_slice %288 {offsets = [0, 0], sizes = [16, 16], strides = [1, 1]} : vector<16x22xf32> to vector<16x16xf32>
    %c54_i32_137 = arith.constant 54 : i32
    %301 = arith.addi %7, %c54_i32_137 : i32
    %c0_i32_138 = arith.constant 0 : i32
    %302 = arith.addi %301, %c0_i32_138 : i32
    %c6_i32_139 = arith.constant 6 : i32
    %303 = arith.addi %302, %c6_i32_139 : i32
    %c1_i32_140 = arith.constant 1 : i32
    %304 = arith.addi %303, %c1_i32_140 : i32
    %305 = arith.index_cast %304 : i32 to index
    %306 = memref.load %arg3[%305] : memref<162xf32, #tpu.memory_space<smem>>
    %307 = vector.broadcast %306 : f32 to vector<16x16xf32>
    %308 = arith.mulf %307, %300 : vector<16x16xf32>
    %309 = arith.addf %299, %308 : vector<16x16xf32>
    %c19_i32_141 = arith.constant 19 : i32
    %310 = tpu.dynamic_rotate %288 by %c19_i32_141 dim 1 : vector<16x22xf32>, i32 -> vector<16x22xf32>
    %311 = vector.extract_strided_slice %310 {offsets = [0, 0], sizes = [16, 16], strides = [1, 1]} : vector<16x22xf32> to vector<16x16xf32>
    %c54_i32_142 = arith.constant 54 : i32
    %312 = arith.addi %7, %c54_i32_142 : i32
    %c0_i32_143 = arith.constant 0 : i32
    %313 = arith.addi %312, %c0_i32_143 : i32
    %c6_i32_144 = arith.constant 6 : i32
    %314 = arith.addi %313, %c6_i32_144 : i32
    %c2_i32_145 = arith.constant 2 : i32
    %315 = arith.addi %314, %c2_i32_145 : i32
    %316 = arith.index_cast %315 : i32 to index
    %317 = memref.load %arg3[%316] : memref<162xf32, #tpu.memory_space<smem>>
    %318 = vector.broadcast %317 : f32 to vector<16x16xf32>
    %319 = arith.mulf %318, %311 : vector<16x16xf32>
    %320 = arith.addf %309, %319 : vector<16x16xf32>
    %c1_146 = arith.constant 1 : index
    %c0_147 = arith.constant 0 : index
    %c0_148 = arith.constant 0 : index
    %321 = vector.load %arg8[%c1_146, %c0_147, %c0_148] : memref<3x22x22xf32, #tpu.memory_space<vmem>>, vector<1x16x22xf32>
    %322 = vector.shape_cast %321 : vector<1x16x22xf32> to vector<16x22xf32>
    %c3_i32_149 = arith.constant 3 : i32
    %323 = tpu.dynamic_rotate %322 by %c3_i32_149 dim 1 : vector<16x22xf32>, i32 -> vector<16x22xf32>
    %324 = vector.extract_strided_slice %323 {offsets = [0, 0], sizes = [16, 16], strides = [1, 1]} : vector<16x22xf32> to vector<16x16xf32>
    %c54_i32_150 = arith.constant 54 : i32
    %325 = arith.addi %7, %c54_i32_150 : i32
    %c9_i32 = arith.constant 9 : i32
    %326 = arith.addi %325, %c9_i32 : i32
    %c0_i32_151 = arith.constant 0 : i32
    %327 = arith.addi %326, %c0_i32_151 : i32
    %c0_i32_152 = arith.constant 0 : i32
    %328 = arith.addi %327, %c0_i32_152 : i32
    %329 = arith.index_cast %328 : i32 to index
    %330 = memref.load %arg3[%329] : memref<162xf32, #tpu.memory_space<smem>>
    %331 = vector.broadcast %330 : f32 to vector<16x16xf32>
    %332 = arith.mulf %331, %324 : vector<16x16xf32>
    %333 = arith.addf %320, %332 : vector<16x16xf32>
    %334 = vector.extract_strided_slice %322 {offsets = [0, 0], sizes = [16, 16], strides = [1, 1]} : vector<16x22xf32> to vector<16x16xf32>
    %c54_i32_153 = arith.constant 54 : i32
    %335 = arith.addi %7, %c54_i32_153 : i32
    %c9_i32_154 = arith.constant 9 : i32
    %336 = arith.addi %335, %c9_i32_154 : i32
    %c0_i32_155 = arith.constant 0 : i32
    %337 = arith.addi %336, %c0_i32_155 : i32
    %c1_i32_156 = arith.constant 1 : i32
    %338 = arith.addi %337, %c1_i32_156 : i32
    %339 = arith.index_cast %338 : i32 to index
    %340 = memref.load %arg3[%339] : memref<162xf32, #tpu.memory_space<smem>>
    %341 = vector.broadcast %340 : f32 to vector<16x16xf32>
    %342 = arith.mulf %341, %334 : vector<16x16xf32>
    %343 = arith.addf %333, %342 : vector<16x16xf32>
    %c19_i32_157 = arith.constant 19 : i32
    %344 = tpu.dynamic_rotate %322 by %c19_i32_157 dim 1 : vector<16x22xf32>, i32 -> vector<16x22xf32>
    %345 = vector.extract_strided_slice %344 {offsets = [0, 0], sizes = [16, 16], strides = [1, 1]} : vector<16x22xf32> to vector<16x16xf32>
    %c54_i32_158 = arith.constant 54 : i32
    %346 = arith.addi %7, %c54_i32_158 : i32
    %c9_i32_159 = arith.constant 9 : i32
    %347 = arith.addi %346, %c9_i32_159 : i32
    %c0_i32_160 = arith.constant 0 : i32
    %348 = arith.addi %347, %c0_i32_160 : i32
    %c2_i32_161 = arith.constant 2 : i32
    %349 = arith.addi %348, %c2_i32_161 : i32
    %350 = arith.index_cast %349 : i32 to index
    %351 = memref.load %arg3[%350] : memref<162xf32, #tpu.memory_space<smem>>
    %352 = vector.broadcast %351 : f32 to vector<16x16xf32>
    %353 = arith.mulf %352, %345 : vector<16x16xf32>
    %354 = arith.addf %343, %353 : vector<16x16xf32>
    %c1_162 = arith.constant 1 : index
    %c1_163 = arith.constant 1 : index
    %c0_164 = arith.constant 0 : index
    %355 = vector.load %arg8[%c1_162, %c1_163, %c0_164] : memref<3x22x22xf32, #tpu.memory_space<vmem>>, vector<1x16x22xf32>
    %356 = vector.shape_cast %355 : vector<1x16x22xf32> to vector<16x22xf32>
    %c2_i32_165 = arith.constant 2 : i32
    %357 = tpu.dynamic_rotate %356 by %c2_i32_165 dim 1 : vector<16x22xf32>, i32 -> vector<16x22xf32>
    %358 = vector.extract_strided_slice %357 {offsets = [0, 0], sizes = [16, 16], strides = [1, 1]} : vector<16x22xf32> to vector<16x16xf32>
    %c27_i32_166 = arith.constant 27 : i32
    %359 = arith.addi %7, %c27_i32_166 : i32
    %c9_i32_167 = arith.constant 9 : i32
    %360 = arith.addi %359, %c9_i32_167 : i32
    %c0_i32_168 = arith.constant 0 : i32
    %361 = arith.addi %360, %c0_i32_168 : i32
    %c0_i32_169 = arith.constant 0 : i32
    %362 = arith.addi %361, %c0_i32_169 : i32
    %363 = arith.index_cast %362 : i32 to index
    %364 = memref.load %arg3[%363] : memref<162xf32, #tpu.memory_space<smem>>
    %365 = vector.broadcast %364 : f32 to vector<16x16xf32>
    %366 = arith.mulf %365, %358 : vector<16x16xf32>
    %367 = arith.addf %286, %366 : vector<16x16xf32>
    %368 = vector.extract_strided_slice %356 {offsets = [0, 0], sizes = [16, 16], strides = [1, 1]} : vector<16x22xf32> to vector<16x16xf32>
    %c27_i32_170 = arith.constant 27 : i32
    %369 = arith.addi %7, %c27_i32_170 : i32
    %c9_i32_171 = arith.constant 9 : i32
    %370 = arith.addi %369, %c9_i32_171 : i32
    %c0_i32_172 = arith.constant 0 : i32
    %371 = arith.addi %370, %c0_i32_172 : i32
    %c1_i32_173 = arith.constant 1 : i32
    %372 = arith.addi %371, %c1_i32_173 : i32
    %373 = arith.index_cast %372 : i32 to index
    %374 = memref.load %arg3[%373] : memref<162xf32, #tpu.memory_space<smem>>
    %375 = vector.broadcast %374 : f32 to vector<16x16xf32>
    %376 = arith.mulf %375, %368 : vector<16x16xf32>
    %377 = arith.addf %367, %376 : vector<16x16xf32>
    %c20_i32_174 = arith.constant 20 : i32
    %378 = tpu.dynamic_rotate %356 by %c20_i32_174 dim 1 : vector<16x22xf32>, i32 -> vector<16x22xf32>
    %379 = vector.extract_strided_slice %378 {offsets = [0, 0], sizes = [16, 16], strides = [1, 1]} : vector<16x22xf32> to vector<16x16xf32>
    %c27_i32_175 = arith.constant 27 : i32
    %380 = arith.addi %7, %c27_i32_175 : i32
    %c9_i32_176 = arith.constant 9 : i32
    %381 = arith.addi %380, %c9_i32_176 : i32
    %c0_i32_177 = arith.constant 0 : i32
    %382 = arith.addi %381, %c0_i32_177 : i32
    %c2_i32_178 = arith.constant 2 : i32
    %383 = arith.addi %382, %c2_i32_178 : i32
    %384 = arith.index_cast %383 : i32 to index
    %385 = memref.load %arg3[%384] : memref<162xf32, #tpu.memory_space<smem>>
    %386 = vector.broadcast %385 : f32 to vector<16x16xf32>
    %387 = arith.mulf %386, %379 : vector<16x16xf32>
    %388 = arith.addf %377, %387 : vector<16x16xf32>
    %c1_179 = arith.constant 1 : index
    %c2_180 = arith.constant 2 : index
    %c0_181 = arith.constant 0 : index
    %389 = vector.load %arg8[%c1_179, %c2_180, %c0_181] : memref<3x22x22xf32, #tpu.memory_space<vmem>>, vector<1x16x22xf32>
    %390 = vector.shape_cast %389 : vector<1x16x22xf32> to vector<16x22xf32>
    %c1_i32_182 = arith.constant 1 : i32
    %391 = tpu.dynamic_rotate %390 by %c1_i32_182 dim 1 : vector<16x22xf32>, i32 -> vector<16x22xf32>
    %392 = vector.extract_strided_slice %391 {offsets = [0, 0], sizes = [16, 16], strides = [1, 1]} : vector<16x22xf32> to vector<16x16xf32>
    %c0_i32_183 = arith.constant 0 : i32
    %393 = arith.addi %7, %c0_i32_183 : i32
    %c9_i32_184 = arith.constant 9 : i32
    %394 = arith.addi %393, %c9_i32_184 : i32
    %c0_i32_185 = arith.constant 0 : i32
    %395 = arith.addi %394, %c0_i32_185 : i32
    %c0_i32_186 = arith.constant 0 : i32
    %396 = arith.addi %395, %c0_i32_186 : i32
    %397 = arith.index_cast %396 : i32 to index
    %398 = memref.load %arg3[%397] : memref<162xf32, #tpu.memory_space<smem>>
    %399 = vector.broadcast %398 : f32 to vector<16x16xf32>
    %400 = arith.mulf %399, %392 : vector<16x16xf32>
    %401 = arith.addf %252, %400 : vector<16x16xf32>
    %402 = vector.extract_strided_slice %390 {offsets = [0, 0], sizes = [16, 16], strides = [1, 1]} : vector<16x22xf32> to vector<16x16xf32>
    %c0_i32_187 = arith.constant 0 : i32
    %403 = arith.addi %7, %c0_i32_187 : i32
    %c9_i32_188 = arith.constant 9 : i32
    %404 = arith.addi %403, %c9_i32_188 : i32
    %c0_i32_189 = arith.constant 0 : i32
    %405 = arith.addi %404, %c0_i32_189 : i32
    %c1_i32_190 = arith.constant 1 : i32
    %406 = arith.addi %405, %c1_i32_190 : i32
    %407 = arith.index_cast %406 : i32 to index
    %408 = memref.load %arg3[%407] : memref<162xf32, #tpu.memory_space<smem>>
    %409 = vector.broadcast %408 : f32 to vector<16x16xf32>
    %410 = arith.mulf %409, %402 : vector<16x16xf32>
    %411 = arith.addf %401, %410 : vector<16x16xf32>
    %c21_i32_191 = arith.constant 21 : i32
    %412 = tpu.dynamic_rotate %390 by %c21_i32_191 dim 1 : vector<16x22xf32>, i32 -> vector<16x22xf32>
    %413 = vector.extract_strided_slice %412 {offsets = [0, 0], sizes = [16, 16], strides = [1, 1]} : vector<16x22xf32> to vector<16x16xf32>
    %c0_i32_192 = arith.constant 0 : i32
    %414 = arith.addi %7, %c0_i32_192 : i32
    %c9_i32_193 = arith.constant 9 : i32
    %415 = arith.addi %414, %c9_i32_193 : i32
    %c0_i32_194 = arith.constant 0 : i32
    %416 = arith.addi %415, %c0_i32_194 : i32
    %c2_i32_195 = arith.constant 2 : i32
    %417 = arith.addi %416, %c2_i32_195 : i32
    %418 = arith.index_cast %417 : i32 to index
    %419 = memref.load %arg3[%418] : memref<162xf32, #tpu.memory_space<smem>>
    %420 = vector.broadcast %419 : f32 to vector<16x16xf32>
    %421 = arith.mulf %420, %413 : vector<16x16xf32>
    %422 = arith.addf %411, %421 : vector<16x16xf32>
    %c1_196 = arith.constant 1 : index
    %c3_197 = arith.constant 3 : index
    %c0_198 = arith.constant 0 : index
    %423 = vector.load %arg8[%c1_196, %c3_197, %c0_198] : memref<3x22x22xf32, #tpu.memory_space<vmem>>, vector<1x16x22xf32>
    %424 = vector.shape_cast %423 : vector<1x16x22xf32> to vector<16x22xf32>
    %c3_i32_199 = arith.constant 3 : i32
    %425 = tpu.dynamic_rotate %424 by %c3_i32_199 dim 1 : vector<16x22xf32>, i32 -> vector<16x22xf32>
    %426 = vector.extract_strided_slice %425 {offsets = [0, 0], sizes = [16, 16], strides = [1, 1]} : vector<16x22xf32> to vector<16x16xf32>
    %c54_i32_200 = arith.constant 54 : i32
    %427 = arith.addi %7, %c54_i32_200 : i32
    %c9_i32_201 = arith.constant 9 : i32
    %428 = arith.addi %427, %c9_i32_201 : i32
    %c3_i32_202 = arith.constant 3 : i32
    %429 = arith.addi %428, %c3_i32_202 : i32
    %c0_i32_203 = arith.constant 0 : i32
    %430 = arith.addi %429, %c0_i32_203 : i32
    %431 = arith.index_cast %430 : i32 to index
    %432 = memref.load %arg3[%431] : memref<162xf32, #tpu.memory_space<smem>>
    %433 = vector.broadcast %432 : f32 to vector<16x16xf32>
    %434 = arith.mulf %433, %426 : vector<16x16xf32>
    %435 = arith.addf %354, %434 : vector<16x16xf32>
    %c2_i32_204 = arith.constant 2 : i32
    %436 = tpu.dynamic_rotate %424 by %c2_i32_204 dim 1 : vector<16x22xf32>, i32 -> vector<16x22xf32>
    %437 = vector.extract_strided_slice %436 {offsets = [0, 0], sizes = [16, 16], strides = [1, 1]} : vector<16x22xf32> to vector<16x16xf32>
    %c27_i32_205 = arith.constant 27 : i32
    %438 = arith.addi %7, %c27_i32_205 : i32
    %c9_i32_206 = arith.constant 9 : i32
    %439 = arith.addi %438, %c9_i32_206 : i32
    %c3_i32_207 = arith.constant 3 : i32
    %440 = arith.addi %439, %c3_i32_207 : i32
    %c0_i32_208 = arith.constant 0 : i32
    %441 = arith.addi %440, %c0_i32_208 : i32
    %442 = arith.index_cast %441 : i32 to index
    %443 = memref.load %arg3[%442] : memref<162xf32, #tpu.memory_space<smem>>
    %444 = vector.broadcast %443 : f32 to vector<16x16xf32>
    %445 = arith.mulf %444, %437 : vector<16x16xf32>
    %446 = arith.addf %388, %445 : vector<16x16xf32>
    %c1_i32_209 = arith.constant 1 : i32
    %447 = tpu.dynamic_rotate %424 by %c1_i32_209 dim 1 : vector<16x22xf32>, i32 -> vector<16x22xf32>
    %448 = vector.extract_strided_slice %447 {offsets = [0, 0], sizes = [16, 16], strides = [1, 1]} : vector<16x22xf32> to vector<16x16xf32>
    %c0_i32_210 = arith.constant 0 : i32
    %449 = arith.addi %7, %c0_i32_210 : i32
    %c9_i32_211 = arith.constant 9 : i32
    %450 = arith.addi %449, %c9_i32_211 : i32
    %c3_i32_212 = arith.constant 3 : i32
    %451 = arith.addi %450, %c3_i32_212 : i32
    %c0_i32_213 = arith.constant 0 : i32
    %452 = arith.addi %451, %c0_i32_213 : i32
    %453 = arith.index_cast %452 : i32 to index
    %454 = memref.load %arg3[%453] : memref<162xf32, #tpu.memory_space<smem>>
    %455 = vector.broadcast %454 : f32 to vector<16x16xf32>
    %456 = arith.mulf %455, %448 : vector<16x16xf32>
    %457 = arith.addf %422, %456 : vector<16x16xf32>
    %458 = vector.extract_strided_slice %424 {offsets = [0, 0], sizes = [16, 16], strides = [1, 1]} : vector<16x22xf32> to vector<16x16xf32>
    %c0_i32_214 = arith.constant 0 : i32
    %459 = arith.addi %7, %c0_i32_214 : i32
    %c9_i32_215 = arith.constant 9 : i32
    %460 = arith.addi %459, %c9_i32_215 : i32
    %c3_i32_216 = arith.constant 3 : i32
    %461 = arith.addi %460, %c3_i32_216 : i32
    %c1_i32_217 = arith.constant 1 : i32
    %462 = arith.addi %461, %c1_i32_217 : i32
    %463 = arith.index_cast %462 : i32 to index
    %464 = memref.load %arg3[%463] : memref<162xf32, #tpu.memory_space<smem>>
    %465 = vector.broadcast %464 : f32 to vector<16x16xf32>
    %466 = arith.mulf %465, %458 : vector<16x16xf32>
    %467 = arith.addf %457, %466 : vector<16x16xf32>
    %c27_i32_218 = arith.constant 27 : i32
    %468 = arith.addi %7, %c27_i32_218 : i32
    %c9_i32_219 = arith.constant 9 : i32
    %469 = arith.addi %468, %c9_i32_219 : i32
    %c3_i32_220 = arith.constant 3 : i32
    %470 = arith.addi %469, %c3_i32_220 : i32
    %c1_i32_221 = arith.constant 1 : i32
    %471 = arith.addi %470, %c1_i32_221 : i32
    %472 = arith.index_cast %471 : i32 to index
    %473 = memref.load %arg3[%472] : memref<162xf32, #tpu.memory_space<smem>>
    %474 = vector.broadcast %473 : f32 to vector<16x16xf32>
    %475 = arith.mulf %474, %458 : vector<16x16xf32>
    %476 = arith.addf %446, %475 : vector<16x16xf32>
    %c54_i32_222 = arith.constant 54 : i32
    %477 = arith.addi %7, %c54_i32_222 : i32
    %c9_i32_223 = arith.constant 9 : i32
    %478 = arith.addi %477, %c9_i32_223 : i32
    %c3_i32_224 = arith.constant 3 : i32
    %479 = arith.addi %478, %c3_i32_224 : i32
    %c1_i32_225 = arith.constant 1 : i32
    %480 = arith.addi %479, %c1_i32_225 : i32
    %481 = arith.index_cast %480 : i32 to index
    %482 = memref.load %arg3[%481] : memref<162xf32, #tpu.memory_space<smem>>
    %483 = vector.broadcast %482 : f32 to vector<16x16xf32>
    %484 = arith.mulf %483, %458 : vector<16x16xf32>
    %485 = arith.addf %435, %484 : vector<16x16xf32>
    %c21_i32_226 = arith.constant 21 : i32
    %486 = tpu.dynamic_rotate %424 by %c21_i32_226 dim 1 : vector<16x22xf32>, i32 -> vector<16x22xf32>
    %487 = vector.extract_strided_slice %486 {offsets = [0, 0], sizes = [16, 16], strides = [1, 1]} : vector<16x22xf32> to vector<16x16xf32>
    %c0_i32_227 = arith.constant 0 : i32
    %488 = arith.addi %7, %c0_i32_227 : i32
    %c9_i32_228 = arith.constant 9 : i32
    %489 = arith.addi %488, %c9_i32_228 : i32
    %c3_i32_229 = arith.constant 3 : i32
    %490 = arith.addi %489, %c3_i32_229 : i32
    %c2_i32_230 = arith.constant 2 : i32
    %491 = arith.addi %490, %c2_i32_230 : i32
    %492 = arith.index_cast %491 : i32 to index
    %493 = memref.load %arg3[%492] : memref<162xf32, #tpu.memory_space<smem>>
    %494 = vector.broadcast %493 : f32 to vector<16x16xf32>
    %495 = arith.mulf %494, %487 : vector<16x16xf32>
    %496 = arith.addf %467, %495 : vector<16x16xf32>
    %c20_i32_231 = arith.constant 20 : i32
    %497 = tpu.dynamic_rotate %424 by %c20_i32_231 dim 1 : vector<16x22xf32>, i32 -> vector<16x22xf32>
    %498 = vector.extract_strided_slice %497 {offsets = [0, 0], sizes = [16, 16], strides = [1, 1]} : vector<16x22xf32> to vector<16x16xf32>
    %c27_i32_232 = arith.constant 27 : i32
    %499 = arith.addi %7, %c27_i32_232 : i32
    %c9_i32_233 = arith.constant 9 : i32
    %500 = arith.addi %499, %c9_i32_233 : i32
    %c3_i32_234 = arith.constant 3 : i32
    %501 = arith.addi %500, %c3_i32_234 : i32
    %c2_i32_235 = arith.constant 2 : i32
    %502 = arith.addi %501, %c2_i32_235 : i32
    %503 = arith.index_cast %502 : i32 to index
    %504 = memref.load %arg3[%503] : memref<162xf32, #tpu.memory_space<smem>>
    %505 = vector.broadcast %504 : f32 to vector<16x16xf32>
    %506 = arith.mulf %505, %498 : vector<16x16xf32>
    %507 = arith.addf %476, %506 : vector<16x16xf32>
    %c19_i32_236 = arith.constant 19 : i32
    %508 = tpu.dynamic_rotate %424 by %c19_i32_236 dim 1 : vector<16x22xf32>, i32 -> vector<16x22xf32>
    %509 = vector.extract_strided_slice %508 {offsets = [0, 0], sizes = [16, 16], strides = [1, 1]} : vector<16x22xf32> to vector<16x16xf32>
    %c54_i32_237 = arith.constant 54 : i32
    %510 = arith.addi %7, %c54_i32_237 : i32
    %c9_i32_238 = arith.constant 9 : i32
    %511 = arith.addi %510, %c9_i32_238 : i32
    %c3_i32_239 = arith.constant 3 : i32
    %512 = arith.addi %511, %c3_i32_239 : i32
    %c2_i32_240 = arith.constant 2 : i32
    %513 = arith.addi %512, %c2_i32_240 : i32
    %514 = arith.index_cast %513 : i32 to index
    %515 = memref.load %arg3[%514] : memref<162xf32, #tpu.memory_space<smem>>
    %516 = vector.broadcast %515 : f32 to vector<16x16xf32>
    %517 = arith.mulf %516, %509 : vector<16x16xf32>
    %518 = arith.addf %485, %517 : vector<16x16xf32>
    %c1_241 = arith.constant 1 : index
    %c4_242 = arith.constant 4 : index
    %c0_243 = arith.constant 0 : index
    %519 = vector.load %arg8[%c1_241, %c4_242, %c0_243] : memref<3x22x22xf32, #tpu.memory_space<vmem>>, vector<1x16x22xf32>
    %520 = vector.shape_cast %519 : vector<1x16x22xf32> to vector<16x22xf32>
    %c1_i32_244 = arith.constant 1 : i32
    %521 = tpu.dynamic_rotate %520 by %c1_i32_244 dim 1 : vector<16x22xf32>, i32 -> vector<16x22xf32>
    %522 = vector.extract_strided_slice %521 {offsets = [0, 0], sizes = [16, 16], strides = [1, 1]} : vector<16x22xf32> to vector<16x16xf32>
    %c0_i32_245 = arith.constant 0 : i32
    %523 = arith.addi %7, %c0_i32_245 : i32
    %c9_i32_246 = arith.constant 9 : i32
    %524 = arith.addi %523, %c9_i32_246 : i32
    %c6_i32_247 = arith.constant 6 : i32
    %525 = arith.addi %524, %c6_i32_247 : i32
    %c0_i32_248 = arith.constant 0 : i32
    %526 = arith.addi %525, %c0_i32_248 : i32
    %527 = arith.index_cast %526 : i32 to index
    %528 = memref.load %arg3[%527] : memref<162xf32, #tpu.memory_space<smem>>
    %529 = vector.broadcast %528 : f32 to vector<16x16xf32>
    %530 = arith.mulf %529, %522 : vector<16x16xf32>
    %531 = arith.addf %496, %530 : vector<16x16xf32>
    %532 = vector.extract_strided_slice %520 {offsets = [0, 0], sizes = [16, 16], strides = [1, 1]} : vector<16x22xf32> to vector<16x16xf32>
    %c0_i32_249 = arith.constant 0 : i32
    %533 = arith.addi %7, %c0_i32_249 : i32
    %c9_i32_250 = arith.constant 9 : i32
    %534 = arith.addi %533, %c9_i32_250 : i32
    %c6_i32_251 = arith.constant 6 : i32
    %535 = arith.addi %534, %c6_i32_251 : i32
    %c1_i32_252 = arith.constant 1 : i32
    %536 = arith.addi %535, %c1_i32_252 : i32
    %537 = arith.index_cast %536 : i32 to index
    %538 = memref.load %arg3[%537] : memref<162xf32, #tpu.memory_space<smem>>
    %539 = vector.broadcast %538 : f32 to vector<16x16xf32>
    %540 = arith.mulf %539, %532 : vector<16x16xf32>
    %541 = arith.addf %531, %540 : vector<16x16xf32>
    %c21_i32_253 = arith.constant 21 : i32
    %542 = tpu.dynamic_rotate %520 by %c21_i32_253 dim 1 : vector<16x22xf32>, i32 -> vector<16x22xf32>
    %543 = vector.extract_strided_slice %542 {offsets = [0, 0], sizes = [16, 16], strides = [1, 1]} : vector<16x22xf32> to vector<16x16xf32>
    %c0_i32_254 = arith.constant 0 : i32
    %544 = arith.addi %7, %c0_i32_254 : i32
    %c9_i32_255 = arith.constant 9 : i32
    %545 = arith.addi %544, %c9_i32_255 : i32
    %c6_i32_256 = arith.constant 6 : i32
    %546 = arith.addi %545, %c6_i32_256 : i32
    %c2_i32_257 = arith.constant 2 : i32
    %547 = arith.addi %546, %c2_i32_257 : i32
    %548 = arith.index_cast %547 : i32 to index
    %549 = memref.load %arg3[%548] : memref<162xf32, #tpu.memory_space<smem>>
    %550 = vector.broadcast %549 : f32 to vector<16x16xf32>
    %551 = arith.mulf %550, %543 : vector<16x16xf32>
    %552 = arith.addf %541, %551 : vector<16x16xf32>
    %c1_258 = arith.constant 1 : index
    %c5_259 = arith.constant 5 : index
    %c0_260 = arith.constant 0 : index
    %553 = vector.load %arg8[%c1_258, %c5_259, %c0_260] : memref<3x22x22xf32, #tpu.memory_space<vmem>>, vector<1x16x22xf32>
    %554 = vector.shape_cast %553 : vector<1x16x22xf32> to vector<16x22xf32>
    %c2_i32_261 = arith.constant 2 : i32
    %555 = tpu.dynamic_rotate %554 by %c2_i32_261 dim 1 : vector<16x22xf32>, i32 -> vector<16x22xf32>
    %556 = vector.extract_strided_slice %555 {offsets = [0, 0], sizes = [16, 16], strides = [1, 1]} : vector<16x22xf32> to vector<16x16xf32>
    %c27_i32_262 = arith.constant 27 : i32
    %557 = arith.addi %7, %c27_i32_262 : i32
    %c9_i32_263 = arith.constant 9 : i32
    %558 = arith.addi %557, %c9_i32_263 : i32
    %c6_i32_264 = arith.constant 6 : i32
    %559 = arith.addi %558, %c6_i32_264 : i32
    %c0_i32_265 = arith.constant 0 : i32
    %560 = arith.addi %559, %c0_i32_265 : i32
    %561 = arith.index_cast %560 : i32 to index
    %562 = memref.load %arg3[%561] : memref<162xf32, #tpu.memory_space<smem>>
    %563 = vector.broadcast %562 : f32 to vector<16x16xf32>
    %564 = arith.mulf %563, %556 : vector<16x16xf32>
    %565 = arith.addf %507, %564 : vector<16x16xf32>
    %566 = vector.extract_strided_slice %554 {offsets = [0, 0], sizes = [16, 16], strides = [1, 1]} : vector<16x22xf32> to vector<16x16xf32>
    %c27_i32_266 = arith.constant 27 : i32
    %567 = arith.addi %7, %c27_i32_266 : i32
    %c9_i32_267 = arith.constant 9 : i32
    %568 = arith.addi %567, %c9_i32_267 : i32
    %c6_i32_268 = arith.constant 6 : i32
    %569 = arith.addi %568, %c6_i32_268 : i32
    %c1_i32_269 = arith.constant 1 : i32
    %570 = arith.addi %569, %c1_i32_269 : i32
    %571 = arith.index_cast %570 : i32 to index
    %572 = memref.load %arg3[%571] : memref<162xf32, #tpu.memory_space<smem>>
    %573 = vector.broadcast %572 : f32 to vector<16x16xf32>
    %574 = arith.mulf %573, %566 : vector<16x16xf32>
    %575 = arith.addf %565, %574 : vector<16x16xf32>
    %c20_i32_270 = arith.constant 20 : i32
    %576 = tpu.dynamic_rotate %554 by %c20_i32_270 dim 1 : vector<16x22xf32>, i32 -> vector<16x22xf32>
    %577 = vector.extract_strided_slice %576 {offsets = [0, 0], sizes = [16, 16], strides = [1, 1]} : vector<16x22xf32> to vector<16x16xf32>
    %c27_i32_271 = arith.constant 27 : i32
    %578 = arith.addi %7, %c27_i32_271 : i32
    %c9_i32_272 = arith.constant 9 : i32
    %579 = arith.addi %578, %c9_i32_272 : i32
    %c6_i32_273 = arith.constant 6 : i32
    %580 = arith.addi %579, %c6_i32_273 : i32
    %c2_i32_274 = arith.constant 2 : i32
    %581 = arith.addi %580, %c2_i32_274 : i32
    %582 = arith.index_cast %581 : i32 to index
    %583 = memref.load %arg3[%582] : memref<162xf32, #tpu.memory_space<smem>>
    %584 = vector.broadcast %583 : f32 to vector<16x16xf32>
    %585 = arith.mulf %584, %577 : vector<16x16xf32>
    %586 = arith.addf %575, %585 : vector<16x16xf32>
    %c1_275 = arith.constant 1 : index
    %c6_276 = arith.constant 6 : index
    %c0_277 = arith.constant 0 : index
    %587 = vector.load %arg8[%c1_275, %c6_276, %c0_277] : memref<3x22x22xf32, #tpu.memory_space<vmem>>, vector<1x16x22xf32>
    %588 = vector.shape_cast %587 : vector<1x16x22xf32> to vector<16x22xf32>
    %c3_i32_278 = arith.constant 3 : i32
    %589 = tpu.dynamic_rotate %588 by %c3_i32_278 dim 1 : vector<16x22xf32>, i32 -> vector<16x22xf32>
    %590 = vector.extract_strided_slice %589 {offsets = [0, 0], sizes = [16, 16], strides = [1, 1]} : vector<16x22xf32> to vector<16x16xf32>
    %c54_i32_279 = arith.constant 54 : i32
    %591 = arith.addi %7, %c54_i32_279 : i32
    %c9_i32_280 = arith.constant 9 : i32
    %592 = arith.addi %591, %c9_i32_280 : i32
    %c6_i32_281 = arith.constant 6 : i32
    %593 = arith.addi %592, %c6_i32_281 : i32
    %c0_i32_282 = arith.constant 0 : i32
    %594 = arith.addi %593, %c0_i32_282 : i32
    %595 = arith.index_cast %594 : i32 to index
    %596 = memref.load %arg3[%595] : memref<162xf32, #tpu.memory_space<smem>>
    %597 = vector.broadcast %596 : f32 to vector<16x16xf32>
    %598 = arith.mulf %597, %590 : vector<16x16xf32>
    %599 = arith.addf %518, %598 : vector<16x16xf32>
    %600 = vector.extract_strided_slice %588 {offsets = [0, 0], sizes = [16, 16], strides = [1, 1]} : vector<16x22xf32> to vector<16x16xf32>
    %c54_i32_283 = arith.constant 54 : i32
    %601 = arith.addi %7, %c54_i32_283 : i32
    %c9_i32_284 = arith.constant 9 : i32
    %602 = arith.addi %601, %c9_i32_284 : i32
    %c6_i32_285 = arith.constant 6 : i32
    %603 = arith.addi %602, %c6_i32_285 : i32
    %c1_i32_286 = arith.constant 1 : i32
    %604 = arith.addi %603, %c1_i32_286 : i32
    %605 = arith.index_cast %604 : i32 to index
    %606 = memref.load %arg3[%605] : memref<162xf32, #tpu.memory_space<smem>>
    %607 = vector.broadcast %606 : f32 to vector<16x16xf32>
    %608 = arith.mulf %607, %600 : vector<16x16xf32>
    %609 = arith.addf %599, %608 : vector<16x16xf32>
    %c19_i32_287 = arith.constant 19 : i32
    %610 = tpu.dynamic_rotate %588 by %c19_i32_287 dim 1 : vector<16x22xf32>, i32 -> vector<16x22xf32>
    %611 = vector.extract_strided_slice %610 {offsets = [0, 0], sizes = [16, 16], strides = [1, 1]} : vector<16x22xf32> to vector<16x16xf32>
    %c54_i32_288 = arith.constant 54 : i32
    %612 = arith.addi %7, %c54_i32_288 : i32
    %c9_i32_289 = arith.constant 9 : i32
    %613 = arith.addi %612, %c9_i32_289 : i32
    %c6_i32_290 = arith.constant 6 : i32
    %614 = arith.addi %613, %c6_i32_290 : i32
    %c2_i32_291 = arith.constant 2 : i32
    %615 = arith.addi %614, %c2_i32_291 : i32
    %616 = arith.index_cast %615 : i32 to index
    %617 = memref.load %arg3[%616] : memref<162xf32, #tpu.memory_space<smem>>
    %618 = vector.broadcast %617 : f32 to vector<16x16xf32>
    %619 = arith.mulf %618, %611 : vector<16x16xf32>
    %620 = arith.addf %609, %619 : vector<16x16xf32>
    %c2_292 = arith.constant 2 : index
    %c0_293 = arith.constant 0 : index
    %c0_294 = arith.constant 0 : index
    %621 = vector.load %arg8[%c2_292, %c0_293, %c0_294] : memref<3x22x22xf32, #tpu.memory_space<vmem>>, vector<1x16x22xf32>
    %622 = vector.shape_cast %621 : vector<1x16x22xf32> to vector<16x22xf32>
    %c3_i32_295 = arith.constant 3 : i32
    %623 = tpu.dynamic_rotate %622 by %c3_i32_295 dim 1 : vector<16x22xf32>, i32 -> vector<16x22xf32>
    %624 = vector.extract_strided_slice %623 {offsets = [0, 0], sizes = [16, 16], strides = [1, 1]} : vector<16x22xf32> to vector<16x16xf32>
    %c54_i32_296 = arith.constant 54 : i32
    %625 = arith.addi %7, %c54_i32_296 : i32
    %c18_i32 = arith.constant 18 : i32
    %626 = arith.addi %625, %c18_i32 : i32
    %c0_i32_297 = arith.constant 0 : i32
    %627 = arith.addi %626, %c0_i32_297 : i32
    %c0_i32_298 = arith.constant 0 : i32
    %628 = arith.addi %627, %c0_i32_298 : i32
    %629 = arith.index_cast %628 : i32 to index
    %630 = memref.load %arg3[%629] : memref<162xf32, #tpu.memory_space<smem>>
    %631 = vector.broadcast %630 : f32 to vector<16x16xf32>
    %632 = arith.mulf %631, %624 : vector<16x16xf32>
    %633 = arith.addf %620, %632 : vector<16x16xf32>
    %634 = vector.extract_strided_slice %622 {offsets = [0, 0], sizes = [16, 16], strides = [1, 1]} : vector<16x22xf32> to vector<16x16xf32>
    %c54_i32_299 = arith.constant 54 : i32
    %635 = arith.addi %7, %c54_i32_299 : i32
    %c18_i32_300 = arith.constant 18 : i32
    %636 = arith.addi %635, %c18_i32_300 : i32
    %c0_i32_301 = arith.constant 0 : i32
    %637 = arith.addi %636, %c0_i32_301 : i32
    %c1_i32_302 = arith.constant 1 : i32
    %638 = arith.addi %637, %c1_i32_302 : i32
    %639 = arith.index_cast %638 : i32 to index
    %640 = memref.load %arg3[%639] : memref<162xf32, #tpu.memory_space<smem>>
    %641 = vector.broadcast %640 : f32 to vector<16x16xf32>
    %642 = arith.mulf %641, %634 : vector<16x16xf32>
    %643 = arith.addf %633, %642 : vector<16x16xf32>
    %c19_i32_303 = arith.constant 19 : i32
    %644 = tpu.dynamic_rotate %622 by %c19_i32_303 dim 1 : vector<16x22xf32>, i32 -> vector<16x22xf32>
    %645 = vector.extract_strided_slice %644 {offsets = [0, 0], sizes = [16, 16], strides = [1, 1]} : vector<16x22xf32> to vector<16x16xf32>
    %c54_i32_304 = arith.constant 54 : i32
    %646 = arith.addi %7, %c54_i32_304 : i32
    %c18_i32_305 = arith.constant 18 : i32
    %647 = arith.addi %646, %c18_i32_305 : i32
    %c0_i32_306 = arith.constant 0 : i32
    %648 = arith.addi %647, %c0_i32_306 : i32
    %c2_i32_307 = arith.constant 2 : i32
    %649 = arith.addi %648, %c2_i32_307 : i32
    %650 = arith.index_cast %649 : i32 to index
    %651 = memref.load %arg3[%650] : memref<162xf32, #tpu.memory_space<smem>>
    %652 = vector.broadcast %651 : f32 to vector<16x16xf32>
    %653 = arith.mulf %652, %645 : vector<16x16xf32>
    %654 = arith.addf %643, %653 : vector<16x16xf32>
    %c2_308 = arith.constant 2 : index
    %c1_309 = arith.constant 1 : index
    %c0_310 = arith.constant 0 : index
    %655 = vector.load %arg8[%c2_308, %c1_309, %c0_310] : memref<3x22x22xf32, #tpu.memory_space<vmem>>, vector<1x16x22xf32>
    %656 = vector.shape_cast %655 : vector<1x16x22xf32> to vector<16x22xf32>
    %c2_i32_311 = arith.constant 2 : i32
    %657 = tpu.dynamic_rotate %656 by %c2_i32_311 dim 1 : vector<16x22xf32>, i32 -> vector<16x22xf32>
    %658 = vector.extract_strided_slice %657 {offsets = [0, 0], sizes = [16, 16], strides = [1, 1]} : vector<16x22xf32> to vector<16x16xf32>
    %c27_i32_312 = arith.constant 27 : i32
    %659 = arith.addi %7, %c27_i32_312 : i32
    %c18_i32_313 = arith.constant 18 : i32
    %660 = arith.addi %659, %c18_i32_313 : i32
    %c0_i32_314 = arith.constant 0 : i32
    %661 = arith.addi %660, %c0_i32_314 : i32
    %c0_i32_315 = arith.constant 0 : i32
    %662 = arith.addi %661, %c0_i32_315 : i32
    %663 = arith.index_cast %662 : i32 to index
    %664 = memref.load %arg3[%663] : memref<162xf32, #tpu.memory_space<smem>>
    %665 = vector.broadcast %664 : f32 to vector<16x16xf32>
    %666 = arith.mulf %665, %658 : vector<16x16xf32>
    %667 = arith.addf %586, %666 : vector<16x16xf32>
    %668 = vector.extract_strided_slice %656 {offsets = [0, 0], sizes = [16, 16], strides = [1, 1]} : vector<16x22xf32> to vector<16x16xf32>
    %c27_i32_316 = arith.constant 27 : i32
    %669 = arith.addi %7, %c27_i32_316 : i32
    %c18_i32_317 = arith.constant 18 : i32
    %670 = arith.addi %669, %c18_i32_317 : i32
    %c0_i32_318 = arith.constant 0 : i32
    %671 = arith.addi %670, %c0_i32_318 : i32
    %c1_i32_319 = arith.constant 1 : i32
    %672 = arith.addi %671, %c1_i32_319 : i32
    %673 = arith.index_cast %672 : i32 to index
    %674 = memref.load %arg3[%673] : memref<162xf32, #tpu.memory_space<smem>>
    %675 = vector.broadcast %674 : f32 to vector<16x16xf32>
    %676 = arith.mulf %675, %668 : vector<16x16xf32>
    %677 = arith.addf %667, %676 : vector<16x16xf32>
    %c20_i32_320 = arith.constant 20 : i32
    %678 = tpu.dynamic_rotate %656 by %c20_i32_320 dim 1 : vector<16x22xf32>, i32 -> vector<16x22xf32>
    %679 = vector.extract_strided_slice %678 {offsets = [0, 0], sizes = [16, 16], strides = [1, 1]} : vector<16x22xf32> to vector<16x16xf32>
    %c27_i32_321 = arith.constant 27 : i32
    %680 = arith.addi %7, %c27_i32_321 : i32
    %c18_i32_322 = arith.constant 18 : i32
    %681 = arith.addi %680, %c18_i32_322 : i32
    %c0_i32_323 = arith.constant 0 : i32
    %682 = arith.addi %681, %c0_i32_323 : i32
    %c2_i32_324 = arith.constant 2 : i32
    %683 = arith.addi %682, %c2_i32_324 : i32
    %684 = arith.index_cast %683 : i32 to index
    %685 = memref.load %arg3[%684] : memref<162xf32, #tpu.memory_space<smem>>
    %686 = vector.broadcast %685 : f32 to vector<16x16xf32>
    %687 = arith.mulf %686, %679 : vector<16x16xf32>
    %688 = arith.addf %677, %687 : vector<16x16xf32>
    %c2_325 = arith.constant 2 : index
    %c2_326 = arith.constant 2 : index
    %c0_327 = arith.constant 0 : index
    %689 = vector.load %arg8[%c2_325, %c2_326, %c0_327] : memref<3x22x22xf32, #tpu.memory_space<vmem>>, vector<1x16x22xf32>
    %690 = vector.shape_cast %689 : vector<1x16x22xf32> to vector<16x22xf32>
    %c1_i32_328 = arith.constant 1 : i32
    %691 = tpu.dynamic_rotate %690 by %c1_i32_328 dim 1 : vector<16x22xf32>, i32 -> vector<16x22xf32>
    %692 = vector.extract_strided_slice %691 {offsets = [0, 0], sizes = [16, 16], strides = [1, 1]} : vector<16x22xf32> to vector<16x16xf32>
    %c0_i32_329 = arith.constant 0 : i32
    %693 = arith.addi %7, %c0_i32_329 : i32
    %c18_i32_330 = arith.constant 18 : i32
    %694 = arith.addi %693, %c18_i32_330 : i32
    %c0_i32_331 = arith.constant 0 : i32
    %695 = arith.addi %694, %c0_i32_331 : i32
    %c0_i32_332 = arith.constant 0 : i32
    %696 = arith.addi %695, %c0_i32_332 : i32
    %697 = arith.index_cast %696 : i32 to index
    %698 = memref.load %arg3[%697] : memref<162xf32, #tpu.memory_space<smem>>
    %699 = vector.broadcast %698 : f32 to vector<16x16xf32>
    %700 = arith.mulf %699, %692 : vector<16x16xf32>
    %701 = arith.addf %552, %700 : vector<16x16xf32>
    %702 = vector.extract_strided_slice %690 {offsets = [0, 0], sizes = [16, 16], strides = [1, 1]} : vector<16x22xf32> to vector<16x16xf32>
    %c0_i32_333 = arith.constant 0 : i32
    %703 = arith.addi %7, %c0_i32_333 : i32
    %c18_i32_334 = arith.constant 18 : i32
    %704 = arith.addi %703, %c18_i32_334 : i32
    %c0_i32_335 = arith.constant 0 : i32
    %705 = arith.addi %704, %c0_i32_335 : i32
    %c1_i32_336 = arith.constant 1 : i32
    %706 = arith.addi %705, %c1_i32_336 : i32
    %707 = arith.index_cast %706 : i32 to index
    %708 = memref.load %arg3[%707] : memref<162xf32, #tpu.memory_space<smem>>
    %709 = vector.broadcast %708 : f32 to vector<16x16xf32>
    %710 = arith.mulf %709, %702 : vector<16x16xf32>
    %711 = arith.addf %701, %710 : vector<16x16xf32>
    %c21_i32_337 = arith.constant 21 : i32
    %712 = tpu.dynamic_rotate %690 by %c21_i32_337 dim 1 : vector<16x22xf32>, i32 -> vector<16x22xf32>
    %713 = vector.extract_strided_slice %712 {offsets = [0, 0], sizes = [16, 16], strides = [1, 1]} : vector<16x22xf32> to vector<16x16xf32>
    %c0_i32_338 = arith.constant 0 : i32
    %714 = arith.addi %7, %c0_i32_338 : i32
    %c18_i32_339 = arith.constant 18 : i32
    %715 = arith.addi %714, %c18_i32_339 : i32
    %c0_i32_340 = arith.constant 0 : i32
    %716 = arith.addi %715, %c0_i32_340 : i32
    %c2_i32_341 = arith.constant 2 : i32
    %717 = arith.addi %716, %c2_i32_341 : i32
    %718 = arith.index_cast %717 : i32 to index
    %719 = memref.load %arg3[%718] : memref<162xf32, #tpu.memory_space<smem>>
    %720 = vector.broadcast %719 : f32 to vector<16x16xf32>
    %721 = arith.mulf %720, %713 : vector<16x16xf32>
    %722 = arith.addf %711, %721 : vector<16x16xf32>
    %c2_342 = arith.constant 2 : index
    %c3_343 = arith.constant 3 : index
    %c0_344 = arith.constant 0 : index
    %723 = vector.load %arg8[%c2_342, %c3_343, %c0_344] : memref<3x22x22xf32, #tpu.memory_space<vmem>>, vector<1x16x22xf32>
    %724 = vector.shape_cast %723 : vector<1x16x22xf32> to vector<16x22xf32>
    %c3_i32_345 = arith.constant 3 : i32
    %725 = tpu.dynamic_rotate %724 by %c3_i32_345 dim 1 : vector<16x22xf32>, i32 -> vector<16x22xf32>
    %726 = vector.extract_strided_slice %725 {offsets = [0, 0], sizes = [16, 16], strides = [1, 1]} : vector<16x22xf32> to vector<16x16xf32>
    %c54_i32_346 = arith.constant 54 : i32
    %727 = arith.addi %7, %c54_i32_346 : i32
    %c18_i32_347 = arith.constant 18 : i32
    %728 = arith.addi %727, %c18_i32_347 : i32
    %c3_i32_348 = arith.constant 3 : i32
    %729 = arith.addi %728, %c3_i32_348 : i32
    %c0_i32_349 = arith.constant 0 : i32
    %730 = arith.addi %729, %c0_i32_349 : i32
    %731 = arith.index_cast %730 : i32 to index
    %732 = memref.load %arg3[%731] : memref<162xf32, #tpu.memory_space<smem>>
    %733 = vector.broadcast %732 : f32 to vector<16x16xf32>
    %734 = arith.mulf %733, %726 : vector<16x16xf32>
    %735 = arith.addf %654, %734 : vector<16x16xf32>
    %c2_i32_350 = arith.constant 2 : i32
    %736 = tpu.dynamic_rotate %724 by %c2_i32_350 dim 1 : vector<16x22xf32>, i32 -> vector<16x22xf32>
    %737 = vector.extract_strided_slice %736 {offsets = [0, 0], sizes = [16, 16], strides = [1, 1]} : vector<16x22xf32> to vector<16x16xf32>
    %c27_i32_351 = arith.constant 27 : i32
    %738 = arith.addi %7, %c27_i32_351 : i32
    %c18_i32_352 = arith.constant 18 : i32
    %739 = arith.addi %738, %c18_i32_352 : i32
    %c3_i32_353 = arith.constant 3 : i32
    %740 = arith.addi %739, %c3_i32_353 : i32
    %c0_i32_354 = arith.constant 0 : i32
    %741 = arith.addi %740, %c0_i32_354 : i32
    %742 = arith.index_cast %741 : i32 to index
    %743 = memref.load %arg3[%742] : memref<162xf32, #tpu.memory_space<smem>>
    %744 = vector.broadcast %743 : f32 to vector<16x16xf32>
    %745 = arith.mulf %744, %737 : vector<16x16xf32>
    %746 = arith.addf %688, %745 : vector<16x16xf32>
    %c1_i32_355 = arith.constant 1 : i32
    %747 = tpu.dynamic_rotate %724 by %c1_i32_355 dim 1 : vector<16x22xf32>, i32 -> vector<16x22xf32>
    %748 = vector.extract_strided_slice %747 {offsets = [0, 0], sizes = [16, 16], strides = [1, 1]} : vector<16x22xf32> to vector<16x16xf32>
    %c0_i32_356 = arith.constant 0 : i32
    %749 = arith.addi %7, %c0_i32_356 : i32
    %c18_i32_357 = arith.constant 18 : i32
    %750 = arith.addi %749, %c18_i32_357 : i32
    %c3_i32_358 = arith.constant 3 : i32
    %751 = arith.addi %750, %c3_i32_358 : i32
    %c0_i32_359 = arith.constant 0 : i32
    %752 = arith.addi %751, %c0_i32_359 : i32
    %753 = arith.index_cast %752 : i32 to index
    %754 = memref.load %arg3[%753] : memref<162xf32, #tpu.memory_space<smem>>
    %755 = vector.broadcast %754 : f32 to vector<16x16xf32>
    %756 = arith.mulf %755, %748 : vector<16x16xf32>
    %757 = arith.addf %722, %756 : vector<16x16xf32>
    %758 = vector.extract_strided_slice %724 {offsets = [0, 0], sizes = [16, 16], strides = [1, 1]} : vector<16x22xf32> to vector<16x16xf32>
    %c0_i32_360 = arith.constant 0 : i32
    %759 = arith.addi %7, %c0_i32_360 : i32
    %c18_i32_361 = arith.constant 18 : i32
    %760 = arith.addi %759, %c18_i32_361 : i32
    %c3_i32_362 = arith.constant 3 : i32
    %761 = arith.addi %760, %c3_i32_362 : i32
    %c1_i32_363 = arith.constant 1 : i32
    %762 = arith.addi %761, %c1_i32_363 : i32
    %763 = arith.index_cast %762 : i32 to index
    %764 = memref.load %arg3[%763] : memref<162xf32, #tpu.memory_space<smem>>
    %765 = vector.broadcast %764 : f32 to vector<16x16xf32>
    %766 = arith.mulf %765, %758 : vector<16x16xf32>
    %767 = arith.addf %757, %766 : vector<16x16xf32>
    %c27_i32_364 = arith.constant 27 : i32
    %768 = arith.addi %7, %c27_i32_364 : i32
    %c18_i32_365 = arith.constant 18 : i32
    %769 = arith.addi %768, %c18_i32_365 : i32
    %c3_i32_366 = arith.constant 3 : i32
    %770 = arith.addi %769, %c3_i32_366 : i32
    %c1_i32_367 = arith.constant 1 : i32
    %771 = arith.addi %770, %c1_i32_367 : i32
    %772 = arith.index_cast %771 : i32 to index
    %773 = memref.load %arg3[%772] : memref<162xf32, #tpu.memory_space<smem>>
    %774 = vector.broadcast %773 : f32 to vector<16x16xf32>
    %775 = arith.mulf %774, %758 : vector<16x16xf32>
    %776 = arith.addf %746, %775 : vector<16x16xf32>
    %c54_i32_368 = arith.constant 54 : i32
    %777 = arith.addi %7, %c54_i32_368 : i32
    %c18_i32_369 = arith.constant 18 : i32
    %778 = arith.addi %777, %c18_i32_369 : i32
    %c3_i32_370 = arith.constant 3 : i32
    %779 = arith.addi %778, %c3_i32_370 : i32
    %c1_i32_371 = arith.constant 1 : i32
    %780 = arith.addi %779, %c1_i32_371 : i32
    %781 = arith.index_cast %780 : i32 to index
    %782 = memref.load %arg3[%781] : memref<162xf32, #tpu.memory_space<smem>>
    %783 = vector.broadcast %782 : f32 to vector<16x16xf32>
    %784 = arith.mulf %783, %758 : vector<16x16xf32>
    %785 = arith.addf %735, %784 : vector<16x16xf32>
    %c21_i32_372 = arith.constant 21 : i32
    %786 = tpu.dynamic_rotate %724 by %c21_i32_372 dim 1 : vector<16x22xf32>, i32 -> vector<16x22xf32>
    %787 = vector.extract_strided_slice %786 {offsets = [0, 0], sizes = [16, 16], strides = [1, 1]} : vector<16x22xf32> to vector<16x16xf32>
    %c0_i32_373 = arith.constant 0 : i32
    %788 = arith.addi %7, %c0_i32_373 : i32
    %c18_i32_374 = arith.constant 18 : i32
    %789 = arith.addi %788, %c18_i32_374 : i32
    %c3_i32_375 = arith.constant 3 : i32
    %790 = arith.addi %789, %c3_i32_375 : i32
    %c2_i32_376 = arith.constant 2 : i32
    %791 = arith.addi %790, %c2_i32_376 : i32
    %792 = arith.index_cast %791 : i32 to index
    %793 = memref.load %arg3[%792] : memref<162xf32, #tpu.memory_space<smem>>
    %794 = vector.broadcast %793 : f32 to vector<16x16xf32>
    %795 = arith.mulf %794, %787 : vector<16x16xf32>
    %796 = arith.addf %767, %795 : vector<16x16xf32>
    %c20_i32_377 = arith.constant 20 : i32
    %797 = tpu.dynamic_rotate %724 by %c20_i32_377 dim 1 : vector<16x22xf32>, i32 -> vector<16x22xf32>
    %798 = vector.extract_strided_slice %797 {offsets = [0, 0], sizes = [16, 16], strides = [1, 1]} : vector<16x22xf32> to vector<16x16xf32>
    %c27_i32_378 = arith.constant 27 : i32
    %799 = arith.addi %7, %c27_i32_378 : i32
    %c18_i32_379 = arith.constant 18 : i32
    %800 = arith.addi %799, %c18_i32_379 : i32
    %c3_i32_380 = arith.constant 3 : i32
    %801 = arith.addi %800, %c3_i32_380 : i32
    %c2_i32_381 = arith.constant 2 : i32
    %802 = arith.addi %801, %c2_i32_381 : i32
    %803 = arith.index_cast %802 : i32 to index
    %804 = memref.load %arg3[%803] : memref<162xf32, #tpu.memory_space<smem>>
    %805 = vector.broadcast %804 : f32 to vector<16x16xf32>
    %806 = arith.mulf %805, %798 : vector<16x16xf32>
    %807 = arith.addf %776, %806 : vector<16x16xf32>
    %c19_i32_382 = arith.constant 19 : i32
    %808 = tpu.dynamic_rotate %724 by %c19_i32_382 dim 1 : vector<16x22xf32>, i32 -> vector<16x22xf32>
    %809 = vector.extract_strided_slice %808 {offsets = [0, 0], sizes = [16, 16], strides = [1, 1]} : vector<16x22xf32> to vector<16x16xf32>
    %c54_i32_383 = arith.constant 54 : i32
    %810 = arith.addi %7, %c54_i32_383 : i32
    %c18_i32_384 = arith.constant 18 : i32
    %811 = arith.addi %810, %c18_i32_384 : i32
    %c3_i32_385 = arith.constant 3 : i32
    %812 = arith.addi %811, %c3_i32_385 : i32
    %c2_i32_386 = arith.constant 2 : i32
    %813 = arith.addi %812, %c2_i32_386 : i32
    %814 = arith.index_cast %813 : i32 to index
    %815 = memref.load %arg3[%814] : memref<162xf32, #tpu.memory_space<smem>>
    %816 = vector.broadcast %815 : f32 to vector<16x16xf32>
    %817 = arith.mulf %816, %809 : vector<16x16xf32>
    %818 = arith.addf %785, %817 : vector<16x16xf32>
    %c2_387 = arith.constant 2 : index
    %c4_388 = arith.constant 4 : index
    %c0_389 = arith.constant 0 : index
    %819 = vector.load %arg8[%c2_387, %c4_388, %c0_389] : memref<3x22x22xf32, #tpu.memory_space<vmem>>, vector<1x16x22xf32>
    %820 = vector.shape_cast %819 : vector<1x16x22xf32> to vector<16x22xf32>
    %c1_i32_390 = arith.constant 1 : i32
    %821 = tpu.dynamic_rotate %820 by %c1_i32_390 dim 1 : vector<16x22xf32>, i32 -> vector<16x22xf32>
    %822 = vector.extract_strided_slice %821 {offsets = [0, 0], sizes = [16, 16], strides = [1, 1]} : vector<16x22xf32> to vector<16x16xf32>
    %c0_i32_391 = arith.constant 0 : i32
    %823 = arith.addi %7, %c0_i32_391 : i32
    %c18_i32_392 = arith.constant 18 : i32
    %824 = arith.addi %823, %c18_i32_392 : i32
    %c6_i32_393 = arith.constant 6 : i32
    %825 = arith.addi %824, %c6_i32_393 : i32
    %c0_i32_394 = arith.constant 0 : i32
    %826 = arith.addi %825, %c0_i32_394 : i32
    %827 = arith.index_cast %826 : i32 to index
    %828 = memref.load %arg3[%827] : memref<162xf32, #tpu.memory_space<smem>>
    %829 = vector.broadcast %828 : f32 to vector<16x16xf32>
    %830 = arith.mulf %829, %822 : vector<16x16xf32>
    %831 = arith.addf %796, %830 : vector<16x16xf32>
    %832 = vector.extract_strided_slice %820 {offsets = [0, 0], sizes = [16, 16], strides = [1, 1]} : vector<16x22xf32> to vector<16x16xf32>
    %c0_i32_395 = arith.constant 0 : i32
    %833 = arith.addi %7, %c0_i32_395 : i32
    %c18_i32_396 = arith.constant 18 : i32
    %834 = arith.addi %833, %c18_i32_396 : i32
    %c6_i32_397 = arith.constant 6 : i32
    %835 = arith.addi %834, %c6_i32_397 : i32
    %c1_i32_398 = arith.constant 1 : i32
    %836 = arith.addi %835, %c1_i32_398 : i32
    %837 = arith.index_cast %836 : i32 to index
    %838 = memref.load %arg3[%837] : memref<162xf32, #tpu.memory_space<smem>>
    %839 = vector.broadcast %838 : f32 to vector<16x16xf32>
    %840 = arith.mulf %839, %832 : vector<16x16xf32>
    %841 = arith.addf %831, %840 : vector<16x16xf32>
    %c21_i32_399 = arith.constant 21 : i32
    %842 = tpu.dynamic_rotate %820 by %c21_i32_399 dim 1 : vector<16x22xf32>, i32 -> vector<16x22xf32>
    %843 = vector.extract_strided_slice %842 {offsets = [0, 0], sizes = [16, 16], strides = [1, 1]} : vector<16x22xf32> to vector<16x16xf32>
    %c0_i32_400 = arith.constant 0 : i32
    %844 = arith.addi %7, %c0_i32_400 : i32
    %c18_i32_401 = arith.constant 18 : i32
    %845 = arith.addi %844, %c18_i32_401 : i32
    %c6_i32_402 = arith.constant 6 : i32
    %846 = arith.addi %845, %c6_i32_402 : i32
    %c2_i32_403 = arith.constant 2 : i32
    %847 = arith.addi %846, %c2_i32_403 : i32
    %848 = arith.index_cast %847 : i32 to index
    %849 = memref.load %arg3[%848] : memref<162xf32, #tpu.memory_space<smem>>
    %850 = vector.broadcast %849 : f32 to vector<16x16xf32>
    %851 = arith.mulf %850, %843 : vector<16x16xf32>
    %852 = arith.addf %841, %851 : vector<16x16xf32>
    %c2_404 = arith.constant 2 : index
    %c5_405 = arith.constant 5 : index
    %c0_406 = arith.constant 0 : index
    %853 = vector.load %arg8[%c2_404, %c5_405, %c0_406] : memref<3x22x22xf32, #tpu.memory_space<vmem>>, vector<1x16x22xf32>
    %854 = vector.shape_cast %853 : vector<1x16x22xf32> to vector<16x22xf32>
    %c2_i32_407 = arith.constant 2 : i32
    %855 = tpu.dynamic_rotate %854 by %c2_i32_407 dim 1 : vector<16x22xf32>, i32 -> vector<16x22xf32>
    %856 = vector.extract_strided_slice %855 {offsets = [0, 0], sizes = [16, 16], strides = [1, 1]} : vector<16x22xf32> to vector<16x16xf32>
    %c27_i32_408 = arith.constant 27 : i32
    %857 = arith.addi %7, %c27_i32_408 : i32
    %c18_i32_409 = arith.constant 18 : i32
    %858 = arith.addi %857, %c18_i32_409 : i32
    %c6_i32_410 = arith.constant 6 : i32
    %859 = arith.addi %858, %c6_i32_410 : i32
    %c0_i32_411 = arith.constant 0 : i32
    %860 = arith.addi %859, %c0_i32_411 : i32
    %861 = arith.index_cast %860 : i32 to index
    %862 = memref.load %arg3[%861] : memref<162xf32, #tpu.memory_space<smem>>
    %863 = vector.broadcast %862 : f32 to vector<16x16xf32>
    %864 = arith.mulf %863, %856 : vector<16x16xf32>
    %865 = arith.addf %807, %864 : vector<16x16xf32>
    %866 = vector.extract_strided_slice %854 {offsets = [0, 0], sizes = [16, 16], strides = [1, 1]} : vector<16x22xf32> to vector<16x16xf32>
    %c27_i32_412 = arith.constant 27 : i32
    %867 = arith.addi %7, %c27_i32_412 : i32
    %c18_i32_413 = arith.constant 18 : i32
    %868 = arith.addi %867, %c18_i32_413 : i32
    %c6_i32_414 = arith.constant 6 : i32
    %869 = arith.addi %868, %c6_i32_414 : i32
    %c1_i32_415 = arith.constant 1 : i32
    %870 = arith.addi %869, %c1_i32_415 : i32
    %871 = arith.index_cast %870 : i32 to index
    %872 = memref.load %arg3[%871] : memref<162xf32, #tpu.memory_space<smem>>
    %873 = vector.broadcast %872 : f32 to vector<16x16xf32>
    %874 = arith.mulf %873, %866 : vector<16x16xf32>
    %875 = arith.addf %865, %874 : vector<16x16xf32>
    %c20_i32_416 = arith.constant 20 : i32
    %876 = tpu.dynamic_rotate %854 by %c20_i32_416 dim 1 : vector<16x22xf32>, i32 -> vector<16x22xf32>
    %877 = vector.extract_strided_slice %876 {offsets = [0, 0], sizes = [16, 16], strides = [1, 1]} : vector<16x22xf32> to vector<16x16xf32>
    %c27_i32_417 = arith.constant 27 : i32
    %878 = arith.addi %7, %c27_i32_417 : i32
    %c18_i32_418 = arith.constant 18 : i32
    %879 = arith.addi %878, %c18_i32_418 : i32
    %c6_i32_419 = arith.constant 6 : i32
    %880 = arith.addi %879, %c6_i32_419 : i32
    %c2_i32_420 = arith.constant 2 : i32
    %881 = arith.addi %880, %c2_i32_420 : i32
    %882 = arith.index_cast %881 : i32 to index
    %883 = memref.load %arg3[%882] : memref<162xf32, #tpu.memory_space<smem>>
    %884 = vector.broadcast %883 : f32 to vector<16x16xf32>
    %885 = arith.mulf %884, %877 : vector<16x16xf32>
    %886 = arith.addf %875, %885 : vector<16x16xf32>
    %c2_421 = arith.constant 2 : index
    %c6_422 = arith.constant 6 : index
    %c0_423 = arith.constant 0 : index
    %887 = vector.load %arg8[%c2_421, %c6_422, %c0_423] : memref<3x22x22xf32, #tpu.memory_space<vmem>>, vector<1x16x22xf32>
    %888 = vector.shape_cast %887 : vector<1x16x22xf32> to vector<16x22xf32>
    %c3_i32_424 = arith.constant 3 : i32
    %889 = tpu.dynamic_rotate %888 by %c3_i32_424 dim 1 : vector<16x22xf32>, i32 -> vector<16x22xf32>
    %890 = vector.extract_strided_slice %889 {offsets = [0, 0], sizes = [16, 16], strides = [1, 1]} : vector<16x22xf32> to vector<16x16xf32>
    %c54_i32_425 = arith.constant 54 : i32
    %891 = arith.addi %7, %c54_i32_425 : i32
    %c18_i32_426 = arith.constant 18 : i32
    %892 = arith.addi %891, %c18_i32_426 : i32
    %c6_i32_427 = arith.constant 6 : i32
    %893 = arith.addi %892, %c6_i32_427 : i32
    %c0_i32_428 = arith.constant 0 : i32
    %894 = arith.addi %893, %c0_i32_428 : i32
    %895 = arith.index_cast %894 : i32 to index
    %896 = memref.load %arg3[%895] : memref<162xf32, #tpu.memory_space<smem>>
    %897 = vector.broadcast %896 : f32 to vector<16x16xf32>
    %898 = arith.mulf %897, %890 : vector<16x16xf32>
    %899 = arith.addf %818, %898 : vector<16x16xf32>
    %900 = vector.extract_strided_slice %888 {offsets = [0, 0], sizes = [16, 16], strides = [1, 1]} : vector<16x22xf32> to vector<16x16xf32>
    %c54_i32_429 = arith.constant 54 : i32
    %901 = arith.addi %7, %c54_i32_429 : i32
    %c18_i32_430 = arith.constant 18 : i32
    %902 = arith.addi %901, %c18_i32_430 : i32
    %c6_i32_431 = arith.constant 6 : i32
    %903 = arith.addi %902, %c6_i32_431 : i32
    %c1_i32_432 = arith.constant 1 : i32
    %904 = arith.addi %903, %c1_i32_432 : i32
    %905 = arith.index_cast %904 : i32 to index
    %906 = memref.load %arg3[%905] : memref<162xf32, #tpu.memory_space<smem>>
    %907 = vector.broadcast %906 : f32 to vector<16x16xf32>
    %908 = arith.mulf %907, %900 : vector<16x16xf32>
    %909 = arith.addf %899, %908 : vector<16x16xf32>
    %c19_i32_433 = arith.constant 19 : i32
    %910 = tpu.dynamic_rotate %888 by %c19_i32_433 dim 1 : vector<16x22xf32>, i32 -> vector<16x22xf32>
    %911 = vector.extract_strided_slice %910 {offsets = [0, 0], sizes = [16, 16], strides = [1, 1]} : vector<16x22xf32> to vector<16x16xf32>
    %c54_i32_434 = arith.constant 54 : i32
    %912 = arith.addi %7, %c54_i32_434 : i32
    %c18_i32_435 = arith.constant 18 : i32
    %913 = arith.addi %912, %c18_i32_435 : i32
    %c6_i32_436 = arith.constant 6 : i32
    %914 = arith.addi %913, %c6_i32_436 : i32
    %c2_i32_437 = arith.constant 2 : i32
    %915 = arith.addi %914, %c2_i32_437 : i32
    %916 = arith.index_cast %915 : i32 to index
    %917 = memref.load %arg3[%916] : memref<162xf32, #tpu.memory_space<smem>>
    %918 = vector.broadcast %917 : f32 to vector<16x16xf32>
    %919 = arith.mulf %918, %911 : vector<16x16xf32>
    %920 = arith.addf %909, %919 : vector<16x16xf32>
    %cst_438 = arith.constant 0.000000e+00 : f32
    %921 = vector.broadcast %cst_438 : f32 to vector<16x16xf32>
    %922 = arith.cmpf oge, %852, %921 : vector<16x16xf32>
    %cst_439 = arith.constant 0.00999999977 : f32
    %923 = vector.broadcast %cst_439 : f32 to vector<16x16xf32>
    %924 = arith.mulf %923, %852 : vector<16x16xf32>
    %925 = arith.select %922, %852, %924 : vector<16x16xi1>, vector<16x16xf32>
    %cst_440 = arith.constant 0.000000e+00 : f32
    %926 = vector.broadcast %cst_440 : f32 to vector<16x16xf32>
    %927 = arith.cmpf oge, %886, %926 : vector<16x16xf32>
    %cst_441 = arith.constant 0.00999999977 : f32
    %928 = vector.broadcast %cst_441 : f32 to vector<16x16xf32>
    %929 = arith.mulf %928, %886 : vector<16x16xf32>
    %930 = arith.select %927, %886, %929 : vector<16x16xi1>, vector<16x16xf32>
    %cst_442 = arith.constant 0.000000e+00 : f32
    %931 = vector.broadcast %cst_442 : f32 to vector<16x16xf32>
    %932 = arith.cmpf oge, %920, %931 : vector<16x16xf32>
    %cst_443 = arith.constant 0.00999999977 : f32
    %933 = vector.broadcast %cst_443 : f32 to vector<16x16xf32>
    %934 = arith.mulf %933, %920 : vector<16x16xf32>
    %935 = arith.select %932, %920, %934 : vector<16x16xi1>, vector<16x16xf32>
    %cst_444 = arith.constant 5.000000e-01 : f32
    %936 = vector.broadcast %cst_444 : f32 to vector<16x16xf32>
    %937 = arith.mulf %936, %935 : vector<16x16xf32>
    %cst_445 = arith.constant 0.707106769 : f32
    %938 = vector.broadcast %cst_445 : f32 to vector<16x16xf32>
    %939 = arith.mulf %935, %938 : vector<16x16xf32>
    %cst_446 = arith.constant 0.000000e+00 : f32
    %940 = vector.broadcast %cst_446 : f32 to vector<16x16xf32>
    %941 = arith.cmpf oge, %939, %940 : vector<16x16xf32>
    %cst_447 = arith.constant 1.000000e+00 : f32
    %cst_448 = arith.constant -1.000000e+00 : f32
    %942 = vector.broadcast %cst_447 : f32 to vector<16x16xf32>
    %943 = vector.broadcast %cst_448 : f32 to vector<16x16xf32>
    %944 = arith.select %941, %942, %943 : vector<16x16xi1>, vector<16x16xf32>
    %945 = math.absf %939 : vector<16x16xf32>
    %cst_449 = arith.constant 0.327591091 : f32
    %946 = vector.broadcast %cst_449 : f32 to vector<16x16xf32>
    %947 = arith.mulf %946, %945 : vector<16x16xf32>
    %cst_450 = arith.constant 1.000000e+00 : f32
    %948 = vector.broadcast %cst_450 : f32 to vector<16x16xf32>
    %949 = arith.addf %948, %947 : vector<16x16xf32>
    %950 = tpu.reciprocal %949 {approx = true} : vector<16x16xf32> -> vector<16x16xf32>
    %951 = arith.mulf %949, %950 : vector<16x16xf32>
    %cst_451 = arith.constant 2.000000e+00 : f32
    %952 = vector.broadcast %cst_451 : f32 to vector<16x16xf32>
    %953 = arith.subf %952, %951 : vector<16x16xf32>
    %954 = arith.mulf %950, %953 : vector<16x16xf32>
    %cst_452 = arith.constant 1.06140542 : f32
    %955 = vector.broadcast %cst_452 : f32 to vector<16x16xf32>
    %956 = arith.mulf %955, %954 : vector<16x16xf32>
    %cst_453 = arith.constant -1.45315206 : f32
    %957 = vector.broadcast %cst_453 : f32 to vector<16x16xf32>
    %958 = arith.addf %956, %957 : vector<16x16xf32>
    %959 = arith.mulf %958, %954 : vector<16x16xf32>
    %cst_454 = arith.constant 1.42141378 : f32
    %960 = vector.broadcast %cst_454 : f32 to vector<16x16xf32>
    %961 = arith.addf %959, %960 : vector<16x16xf32>
    %962 = arith.mulf %961, %954 : vector<16x16xf32>
    %cst_455 = arith.constant -0.284496725 : f32
    %963 = vector.broadcast %cst_455 : f32 to vector<16x16xf32>
    %964 = arith.addf %962, %963 : vector<16x16xf32>
    %965 = arith.mulf %964, %954 : vector<16x16xf32>
    %cst_456 = arith.constant 0.254829586 : f32
    %966 = vector.broadcast %cst_456 : f32 to vector<16x16xf32>
    %967 = arith.addf %965, %966 : vector<16x16xf32>
    %968 = arith.mulf %967, %954 : vector<16x16xf32>
    %cst_457 = arith.constant 0.000000e+00 : f32
    %969 = vector.broadcast %cst_457 : f32 to vector<16x16xf32>
    %970 = arith.subf %969, %945 : vector<16x16xf32>
    %971 = arith.mulf %970, %945 : vector<16x16xf32>
    %972 = math.exp %971 : vector<16x16xf32>
    %973 = arith.mulf %968, %972 : vector<16x16xf32>
    %cst_458 = arith.constant 1.000000e+00 : f32
    %974 = vector.broadcast %cst_458 : f32 to vector<16x16xf32>
    %975 = arith.subf %974, %973 : vector<16x16xf32>
    %976 = arith.mulf %944, %975 : vector<16x16xf32>
    %cst_459 = arith.constant 1.000000e+00 : f32
    %977 = vector.broadcast %cst_459 : f32 to vector<16x16xf32>
    %978 = arith.addf %977, %976 : vector<16x16xf32>
    %979 = arith.mulf %937, %978 : vector<16x16xf32>
    %980 = arith.subf %930, %979 : vector<16x16xf32>
    %cst_460 = arith.constant 5.000000e-01 : f32
    %981 = vector.broadcast %cst_460 : f32 to vector<16x16xf32>
    %982 = arith.mulf %981, %980 : vector<16x16xf32>
    %cst_461 = arith.constant 0.707106769 : f32
    %983 = vector.broadcast %cst_461 : f32 to vector<16x16xf32>
    %984 = arith.mulf %980, %983 : vector<16x16xf32>
    %cst_462 = arith.constant 0.000000e+00 : f32
    %985 = vector.broadcast %cst_462 : f32 to vector<16x16xf32>
    %986 = arith.cmpf oge, %984, %985 : vector<16x16xf32>
    %cst_463 = arith.constant 1.000000e+00 : f32
    %cst_464 = arith.constant -1.000000e+00 : f32
    %987 = vector.broadcast %cst_463 : f32 to vector<16x16xf32>
    %988 = vector.broadcast %cst_464 : f32 to vector<16x16xf32>
    %989 = arith.select %986, %987, %988 : vector<16x16xi1>, vector<16x16xf32>
    %990 = math.absf %984 : vector<16x16xf32>
    %cst_465 = arith.constant 0.327591091 : f32
    %991 = vector.broadcast %cst_465 : f32 to vector<16x16xf32>
    %992 = arith.mulf %991, %990 : vector<16x16xf32>
    %cst_466 = arith.constant 1.000000e+00 : f32
    %993 = vector.broadcast %cst_466 : f32 to vector<16x16xf32>
    %994 = arith.addf %993, %992 : vector<16x16xf32>
    %995 = tpu.reciprocal %994 {approx = true} : vector<16x16xf32> -> vector<16x16xf32>
    %996 = arith.mulf %994, %995 : vector<16x16xf32>
    %cst_467 = arith.constant 2.000000e+00 : f32
    %997 = vector.broadcast %cst_467 : f32 to vector<16x16xf32>
    %998 = arith.subf %997, %996 : vector<16x16xf32>
    %999 = arith.mulf %995, %998 : vector<16x16xf32>
    %cst_468 = arith.constant 1.06140542 : f32
    %1000 = vector.broadcast %cst_468 : f32 to vector<16x16xf32>
    %1001 = arith.mulf %1000, %999 : vector<16x16xf32>
    %cst_469 = arith.constant -1.45315206 : f32
    %1002 = vector.broadcast %cst_469 : f32 to vector<16x16xf32>
    %1003 = arith.addf %1001, %1002 : vector<16x16xf32>
    %1004 = arith.mulf %1003, %999 : vector<16x16xf32>
    %cst_470 = arith.constant 1.42141378 : f32
    %1005 = vector.broadcast %cst_470 : f32 to vector<16x16xf32>
    %1006 = arith.addf %1004, %1005 : vector<16x16xf32>
    %1007 = arith.mulf %1006, %999 : vector<16x16xf32>
    %cst_471 = arith.constant -0.284496725 : f32
    %1008 = vector.broadcast %cst_471 : f32 to vector<16x16xf32>
    %1009 = arith.addf %1007, %1008 : vector<16x16xf32>
    %1010 = arith.mulf %1009, %999 : vector<16x16xf32>
    %cst_472 = arith.constant 0.254829586 : f32
    %1011 = vector.broadcast %cst_472 : f32 to vector<16x16xf32>
    %1012 = arith.addf %1010, %1011 : vector<16x16xf32>
    %1013 = arith.mulf %1012, %999 : vector<16x16xf32>
    %cst_473 = arith.constant 0.000000e+00 : f32
    %1014 = vector.broadcast %cst_473 : f32 to vector<16x16xf32>
    %1015 = arith.subf %1014, %990 : vector<16x16xf32>
    %1016 = arith.mulf %1015, %990 : vector<16x16xf32>
    %1017 = math.exp %1016 : vector<16x16xf32>
    %1018 = arith.mulf %1013, %1017 : vector<16x16xf32>
    %cst_474 = arith.constant 1.000000e+00 : f32
    %1019 = vector.broadcast %cst_474 : f32 to vector<16x16xf32>
    %1020 = arith.subf %1019, %1018 : vector<16x16xf32>
    %1021 = arith.mulf %989, %1020 : vector<16x16xf32>
    %cst_475 = arith.constant 1.000000e+00 : f32
    %1022 = vector.broadcast %cst_475 : f32 to vector<16x16xf32>
    %1023 = arith.addf %1022, %1021 : vector<16x16xf32>
    %1024 = arith.mulf %982, %1023 : vector<16x16xf32>
    %1025 = arith.subf %925, %930 : vector<16x16xf32>
    %cst_476 = arith.constant 5.000000e-01 : f32
    %1026 = vector.broadcast %cst_476 : f32 to vector<16x16xf32>
    %1027 = arith.mulf %1026, %1025 : vector<16x16xf32>
    %cst_477 = arith.constant 0.707106769 : f32
    %1028 = vector.broadcast %cst_477 : f32 to vector<16x16xf32>
    %1029 = arith.mulf %1025, %1028 : vector<16x16xf32>
    %cst_478 = arith.constant 0.000000e+00 : f32
    %1030 = vector.broadcast %cst_478 : f32 to vector<16x16xf32>
    %1031 = arith.cmpf oge, %1029, %1030 : vector<16x16xf32>
    %cst_479 = arith.constant 1.000000e+00 : f32
    %cst_480 = arith.constant -1.000000e+00 : f32
    %1032 = vector.broadcast %cst_479 : f32 to vector<16x16xf32>
    %1033 = vector.broadcast %cst_480 : f32 to vector<16x16xf32>
    %1034 = arith.select %1031, %1032, %1033 : vector<16x16xi1>, vector<16x16xf32>
    %1035 = math.absf %1029 : vector<16x16xf32>
    %cst_481 = arith.constant 0.327591091 : f32
    %1036 = vector.broadcast %cst_481 : f32 to vector<16x16xf32>
    %1037 = arith.mulf %1036, %1035 : vector<16x16xf32>
    %cst_482 = arith.constant 1.000000e+00 : f32
    %1038 = vector.broadcast %cst_482 : f32 to vector<16x16xf32>
    %1039 = arith.addf %1038, %1037 : vector<16x16xf32>
    %1040 = tpu.reciprocal %1039 {approx = true} : vector<16x16xf32> -> vector<16x16xf32>
    %1041 = arith.mulf %1039, %1040 : vector<16x16xf32>
    %cst_483 = arith.constant 2.000000e+00 : f32
    %1042 = vector.broadcast %cst_483 : f32 to vector<16x16xf32>
    %1043 = arith.subf %1042, %1041 : vector<16x16xf32>
    %1044 = arith.mulf %1040, %1043 : vector<16x16xf32>
    %cst_484 = arith.constant 1.06140542 : f32
    %1045 = vector.broadcast %cst_484 : f32 to vector<16x16xf32>
    %1046 = arith.mulf %1045, %1044 : vector<16x16xf32>
    %cst_485 = arith.constant -1.45315206 : f32
    %1047 = vector.broadcast %cst_485 : f32 to vector<16x16xf32>
    %1048 = arith.addf %1046, %1047 : vector<16x16xf32>
    %1049 = arith.mulf %1048, %1044 : vector<16x16xf32>
    %cst_486 = arith.constant 1.42141378 : f32
    %1050 = vector.broadcast %cst_486 : f32 to vector<16x16xf32>
    %1051 = arith.addf %1049, %1050 : vector<16x16xf32>
    %1052 = arith.mulf %1051, %1044 : vector<16x16xf32>
    %cst_487 = arith.constant -0.284496725 : f32
    %1053 = vector.broadcast %cst_487 : f32 to vector<16x16xf32>
    %1054 = arith.addf %1052, %1053 : vector<16x16xf32>
    %1055 = arith.mulf %1054, %1044 : vector<16x16xf32>
    %cst_488 = arith.constant 0.254829586 : f32
    %1056 = vector.broadcast %cst_488 : f32 to vector<16x16xf32>
    %1057 = arith.addf %1055, %1056 : vector<16x16xf32>
    %1058 = arith.mulf %1057, %1044 : vector<16x16xf32>
    %cst_489 = arith.constant 0.000000e+00 : f32
    %1059 = vector.broadcast %cst_489 : f32 to vector<16x16xf32>
    %1060 = arith.subf %1059, %1035 : vector<16x16xf32>
    %1061 = arith.mulf %1060, %1035 : vector<16x16xf32>
    %1062 = math.exp %1061 : vector<16x16xf32>
    %1063 = arith.mulf %1058, %1062 : vector<16x16xf32>
    %cst_490 = arith.constant 1.000000e+00 : f32
    %1064 = vector.broadcast %cst_490 : f32 to vector<16x16xf32>
    %1065 = arith.subf %1064, %1063 : vector<16x16xf32>
    %1066 = arith.mulf %1034, %1065 : vector<16x16xf32>
    %cst_491 = arith.constant 1.000000e+00 : f32
    %1067 = vector.broadcast %cst_491 : f32 to vector<16x16xf32>
    %1068 = arith.addf %1067, %1066 : vector<16x16xf32>
    %1069 = arith.mulf %1027, %1068 : vector<16x16xf32>
    %c0_492 = arith.constant 0 : index
    %c0_493 = arith.constant 0 : index
    %c0_494 = arith.constant 0 : index
    %c0_495 = arith.constant 0 : index
    %1070 = vector.load %arg5[%c0_492, %c0_493, %c0_494, %c0_495] : memref<1x1x16x16xf32, #tpu.memory_space<vmem>>, vector<1x1x16x16xf32>
    %1071 = vector.shape_cast %1070 : vector<1x1x16x16xf32> to vector<16x16xf32>
    %1072 = vector.shape_cast %979 : vector<16x16xf32> to vector<1x1x16x16xf32>
    tpu.vector_store %arg5[%c0_492, %c0_493, %c0_494, %c0_495], %1072 {strides = array<i32>} : memref<1x1x16x16xf32, #tpu.memory_space<vmem>>, vector<1x1x16x16xf32>,
    %c0_496 = arith.constant 0 : index
    %c0_497 = arith.constant 0 : index
    %c0_498 = arith.constant 0 : index
    %c0_499 = arith.constant 0 : index
    %1073 = vector.load %arg6[%c0_496, %c0_497, %c0_498, %c0_499] : memref<1x1x16x16xf32, #tpu.memory_space<vmem>>, vector<1x1x16x16xf32>
    %1074 = vector.shape_cast %1073 : vector<1x1x16x16xf32> to vector<16x16xf32>
    %1075 = vector.shape_cast %1024 : vector<16x16xf32> to vector<1x1x16x16xf32>
    tpu.vector_store %arg6[%c0_496, %c0_497, %c0_498, %c0_499], %1075 {strides = array<i32>} : memref<1x1x16x16xf32, #tpu.memory_space<vmem>>, vector<1x1x16x16xf32>,
    %c0_500 = arith.constant 0 : index
    %c0_501 = arith.constant 0 : index
    %c0_502 = arith.constant 0 : index
    %c0_503 = arith.constant 0 : index
    %1076 = vector.load %arg7[%c0_500, %c0_501, %c0_502, %c0_503] : memref<1x1x16x16xf32, #tpu.memory_space<vmem>>, vector<1x1x16x16xf32>
    %1077 = vector.shape_cast %1076 : vector<1x1x16x16xf32> to vector<16x16xf32>
    %1078 = vector.shape_cast %1069 : vector<16x16xf32> to vector<1x1x16x16xf32>
    tpu.vector_store %arg7[%c0_500, %c0_501, %c0_502, %c0_503], %1078 {strides = array<i32>} : memref<1x1x16x16xf32, #tpu.memory_space<vmem>>, vector<1x1x16x16xf32>,
    return
  }
  func.func @transform_0(%arg0: i32, %arg1: i32) -> (i32, i32, i32, i32) {
    %c0_i32 = arith.constant 0 : i32
    %c0_i32_0 = arith.constant 0 : i32
    %c0_i32_1 = arith.constant 0 : i32
    return %arg0, %arg1, %c0_i32, %c0_i32_0 : i32, i32, i32, i32
  }
  func.func @transform_1(%arg0: i32, %arg1: i32) -> i32 {
    %c0_i32 = arith.constant 0 : i32
    %c0_i32_0 = arith.constant 0 : i32
    return %c0_i32 : i32
  }
  func.func @transform_2(%arg0: i32, %arg1: i32) -> i32 {
    %c0_i32 = arith.constant 0 : i32
    %c0_i32_0 = arith.constant 0 : i32
    return %c0_i32 : i32
  }
  func.func @transform_3(%arg0: i32, %arg1: i32) -> (i32, i32, i32, i32) {
    %c0_i32 = arith.constant 0 : i32
    %c0_i32_0 = arith.constant 0 : i32
    %c0_i32_1 = arith.constant 0 : i32
    return %arg0, %arg1, %c0_i32, %c0_i32_0 : i32, i32, i32, i32
  }
  func.func @transform_4(%arg0: i32, %arg1: i32) -> (i32, i32, i32, i32) {
    %c0_i32 = arith.constant 0 : i32
    %c0_i32_0 = arith.constant 0 : i32
    %c0_i32_1 = arith.constant 0 : i32
    return %arg0, %arg1, %c0_i32, %c0_i32_0 : i32, i32, i32, i32
  }
  func.func @transform_5(%arg0: i32, %arg1: i32) -> (i32, i32, i32, i32) {
    %c0_i32 = arith.constant 0 : i32
    %c0_i32_0 = arith.constant 0 : i32
    %c0_i32_1 = arith.constant 0 : i32
    return %arg0, %arg1, %c0_i32, %c0_i32_0 : i32, i32, i32, i32
  }
}

</mosaic_0001>

<bundles_post_ra>
// kernel: tpu_custom_call.1
= control target key start
LH: loop header
LB: loop body
LE: loop exit
PB: predicated region body
PF: predicated region fallthrough
CT: control target
= control target key end

     0   :  { %s4168_s0 = inlined_call_operand.hbm [shape: f32[2,6,16,16], index: 0, kind: input, shape index: {}]   ;;  %s4169_s1 = inlined_call_operand.hbm [shape: f32[162], index: 1, kind: input, shape index: {}]   ;;  %s4170_s2 = inlined_call_operand.vmem [shape: f32[6], index: 2, kind: input, shape index: {}]   ;;  %s4171_s3 = inlined_call_operand.hbm [shape: f32[2,2,16,16], index: 3, kind: output, shape index: {0}]   ;;  %s4172_s4 = inlined_call_operand.hbm [shape: f32[2,2,16,16], index: 4, kind: output, shape index: {1}]   ;;  %s4173_s5 = inlined_call_operand.hbm [shape: f32[2,2,16,16], index: 5, kind: output, shape index: {2}]  }
   0x1   :  { %4201 = sst [smem:[#allocation29_spill]] %s4169_s1 }
   0x2   :  { %4202 = sst [smem:[#allocation30_spill]] %s4170_s2 }
   0x3   :  { %4203 = sst [smem:[#allocation31_spill]] %s4171_s3 }
   0x4   :  { %4204 = sst [smem:[#allocation32_spill]] %s4173_s5 }
   0x5   :  { %11 = vsyncpa [#allocation4], 0 }
   0x6   :  { %13 = vsyncpa [#allocation4 + $0x1], 0 }
   0x7   :  { %14 = vsyncpa [#allocation6], 0 }
   0x8   :  { %15 = vsyncpa [#allocation7], 0 }
   0x9   :  { %16 = vsyncpa [#allocation5], 0 }
   0xa   :  { %18 = vsyncpa [#allocation5 + $0x1], 0 }
   0xb   :  { %19 = vsyncpa [#allocation12], 0 }
   0xc   :  { %21 = vsyncpa [#allocation12 + $0x1], 0  ;;  %s2591_s18 = smov 0   ;;  %s2593_s19 = smov 0  }
   0xd   :  { %s2595_s20 = smov 0   ;;  %s2597_s21 = smov 0  }
   0xe   :  { %s2599_s22 = smov 0   ;;  %s2601_s23 = smov 0  }
   0xf   :  { %s2603_s24 = smov 0   ;;  %s2605_s25 = smov 0  }
  0x10 LB: > { %4205 = sst [smem:[#allocation19_spill]] %s2513_s18  ;;  %s2632_s26 = sadd.s32 4294967295, %s2541_s25   ;;  %s2541_s25 = sphi %s2605_s25, %s27_s25   ;;  %s2537_s24 = sphi %s2603_s24, %s4254_s24   ;;  %s2533_s23 = sphi %s2601_s23, %s4249_s23   ;;  %s2529_s22 = sphi %s2599_s22, %s4253_s22   ;;  %s2525_s21 = sphi %s2597_s21, %s4248_s21   ;;  %s2521_s20 = sphi %s2595_s20, %s4252_s20   ;;  %s2517_s19 = sphi %s2593_s19, %s4251_s19   ;;  %s2513_s18 = sphi %s2591_s18, %s4250_s18  }
  0x11   : > { %4206 = sst [smem:[#allocation20_spill]] %s2533_s23  ;;  %s4174_s27 = sadd.s32 4294967294, %s2541_s25  }
  0x12   : > { %4207 = sst [smem:[#allocation21_spill]] %s2541_s25  ;;  %p55_p0 = scmp.ne.s32.totalorder %s2521_s20, %s2517_s19 }
  0x13   : > { %p56_p1 = scmp.eq.s32.totalorder %s2541_s25, 0  ;;  %p61_p2 = scmp.ne.s32.totalorder %s2517_s19, %s2513_s18 }
  0x14   : > { %p62_p3 = scmp.eq.s32.totalorder %s2632_s26, 0  ;;  %p129_p4 = scmp.eq.s32.totalorder %s2632_s26, 3 }
  0x15   : > { %p2643_p5 = por %p56_p1, %p55_p0  ;;  %p135_p6 = scmp.eq.s32.totalorder %s4174_s27, 3 }
  0x16   : > { %p2651_p7 = por %p62_p3, %p61_p2  ;;  %p2655_p8 = por %p129_p4, %p55_p0 }
  0x17   : > { %p2659_p9 = por %p135_p6, %p61_p2  ;;  %p2134_p10 = scmp.ge.s32.totalorder %s2541_s25, 1 }
  0x18   : > { %p198_p11 = scmp.lt.s32.totalorder %s2541_s25, 5  ;;  %s4213_s1 = sld [smem:[#allocation29_spill]] }
  0x19   : > { %s4211_s7 = scalar_select %p2659_p9, 1, 0 }
  0x1a   : > { %p2668_p12 = pnand %p2134_p10, %p198_p11  ;;  %p2203_p13 = scmp.lt.s32.totalorder %s2541_s25, 4 }
  0x1b   : > { %4212 = sst [smem:[#allocation22_spill]] %s4211_s7  ;;  %s2543_s16 = smov [#allocation8]  }
  0x1c   : > { %p2180_p0 = pneg %p2668_p12  ;;  %s4215_s2 = sld [smem:[#allocation30_spill]] }
  0x1d   : > { %p2680_p1 = pnand %p2203_p13, %p2643_p5  ;;  %s2544_s17 = smov [#allocation9]  }
  0x1e   : > { %s210_s10 = sshll.u32 %s4213_s1, 4  ;;  %p2181_p2 = pnand %p2180_p0, %p62_p3  ;;  %s211_s10 = int_to_ptr.hbm [resolvable:$true] %s210_s10 }
  0x1f   : > { %s36_s8 = sadd.s32 1, %s2533_s23  ;;  %s39_s9 = sadd.s32 1, %s2537_s24 }
  0x20   : > { %2183 = dma.hbm_to_smem (!%p2181_p2), %s211_s10, 32, %s2543_s16, [#allocation6]  }
  0x21   : > { %p37_p4 = scmp.ge.s32.totalorder %s36_s8, 2  ;;  %s231_s12 = sand.u32 1, %s2521_s20  }
  0x22   : > { %s220_s14 = sshll.u32 %s4215_s2, 4  ;;  %s2161_s13 = smul.u32 48, %s231_s12  ;;  %s221_s14 = int_to_ptr.vmem [resolvable:$true] %s220_s14 }
  0x23   : > { %2186 = dma.vmem_to_smem (!%p2181_p2), %s221_s14, 16, %s2544_s17, [#allocation7]  }
  0x24   : > { %s4256_s8 = smov (%p37_p4, %s36_s8), 0  ;;  %s4258_s9 = smov (!%p37_p4, %s39_s9), %s2537_s24 }
  0x25   : > { %4217 = sst [smem:[#allocation23_spill]] %s4256_s8  ;;  %s44_s29 = ssub.s32 %s2533_s23, %s4256_s8 }
  0x26   : > { %p41_p5 = scmp.ge.s32.totalorder %s4258_s9, 2  ;;  %s2160_s27 = smul.u32 6, %s2533_s23 }
  0x27   : > { %s2162_s28 = smul.u32 12, %s2537_s24  ;;  %s235_s1 = scalar_lea.vmem [#allocation3], %s2161_s13 }
  0x28   : > { %s246_s10 = sshll.u32 %s235_s1, 4  ;;  %s4260_s9 = smov (%p41_p5, %s4258_s9), 0  ;;  %s247_s10 = int_to_ptr.vmem [resolvable:$true] %s246_s10 }
  0x29   : > { %s241_s14 = sadd.s32 %s2162_s28, %s2160_s27  ;;  %s43_s16 = ssub.s32 %s2537_s24, %s4260_s9 }
  0x2a   : > { %s2139_s17 = sshll.u32 %s241_s14, 3  ;;  %s45_s2 = sor.u32 %s44_s29, %s43_s16 }
  0x2b   : > { %s243_s8 = scalar_lea.hbm %s4168_s0, %s2139_s17  ;;  %p46_p6 = scmp.eq.s32.totalorder %s45_s2, 0 }
  0x2c   : > { %s244_s25 = sshll.u32 %s243_s8, 4  ;;  %s4218_s23 = sadd.s32 1, %s2521_s20  ;;  %s245_s25 = int_to_ptr.hbm [resolvable:$true] %s244_s25 }
  0x2d   : > { %s2706_s5 = scalar_select %p46_p6, %s2521_s20, %s4218_s23  }
  0x2e   : > { %s232_s13 = scalar_lea.sflag [#allocation4], %s231_s12  ;;  %s2545_s1 = smov 128  }
  0x2f   : > { %s2546_s3 = smov 8   ;;  %258 = sbr.rel (%p2668_p12) target bundleno = 1518 (0x5ee), region = 32 }
  0x30   : > { %2190 = dma.hbm_to_vmem [thread:$0]  (!%p2680_p1), %s245_s25, 768, %s247_s10, %s232_s13, %s2545_s1, %s2545_s1, %s2546_s3  }
  0x34   : > { %s2713_s27 = sand.u32 1, %s2517_s19  }
  0x35   : > { %s2163_s2 = smul.u32 48, %s2713_s27  ;;  %s261_s18 = scalar_lea.sflag [#allocation4], %s2713_s27 }
  0x37   : > { %s2717_s28 = scalar_lea.vmem [#allocation3], %s2163_s2 }
  0x38   : > { %2492 = dma.done.wait (%p2651_p7), %s261_s18, 768  }
  0x39   : > { %2494 = vsyncadd (%p2651_p7), %s261_s18, 4294966528 }
  0x3a   : > { %2496 = dma.done.wait (%p62_p3), [#allocation6], 32  }
  0x3b   : > { %2498 = vsyncadd (%p62_p3), [#allocation6], 4294967264 }
  0x3c   : > { %2500 = dma.done.wait (%p62_p3), [#allocation7], 16  }
  0x3d   : > { %2502 = vsyncadd (%p62_p3), [#allocation7], 4294967280 }
  0x3e   : > { %280 = sfence }
  0x3f   : > { %vm314_vm0 = vcmask 179200   ;;  %v325_v0 = vld [vmem:[%s2717_s28] sm:$0xff]  ;;  %vm331_vm1 = vcmask 130048   ;;  %v2547_v1 = vmov 0.0   ;;  %s2734_s3 = smul.u32 81, %s2525_s21  ;;  %vm317_vm2 = vcmask 177152  }
  0x40   : > { %315 = vst.msk [vmem:[#allocation2] sm:$0xff] %vm314_vm0, %v2547_v1  ;;  %v326_v2 = vld [vmem:[%s2717_s28 + $0x8] sm:$0xff]  ;;  %s4199_s11 = smov 22   ;;  %s4193_s15 = smov 19   ;;  %v327_v25 = vld [vmem:[%s2717_s28 + $0x10] sm:$0xff]  ;;  %v328_v30 = vld [vmem:[%s2717_s28 + $0x18] sm:$0xff] }
  0x41   : > { %316 = vst.msk [vmem:[#allocation2 + $0x8] sm:$0xff] %vm314_vm0, %v2547_v1  ;;  %s421_s23 = sadd.s32 28, %s2734_s3  ;;  %s370_s25 = sadd.s32 55, %s2734_s3  ;;  %vm350_vm3 = vcmask 1047728  }
  0x42   : > { %332 = vst.msk [vmem:[#allocation2 + $0x3] sm:$0xff] %vm331_vm1, %v325_v0  ;;  %s371_s30 = sld [smem:[#allocation8 + %s370_s25]]  ;;  %s2550_s8 = smov 20  }
  0x43   : > { %319 = vst.msk [vmem:[#allocation2 + $0x18] sm:$0xff] %vm314_vm0, %v2547_v1  ;;  %s2744_s7 = sld [smem:[#allocation8 + %s421_s23]]  ;;  %s536_s12 = sadd.s32 4, %s2734_s3 }
  0x44   : > { %320 = vst.msk [vmem:[#allocation2 + $0x20] sm:$0xff] %vm314_vm0, %v2547_v1  ;;  %s537_s29 = sld [smem:[#allocation8 + %s536_s12]]  ;;  %s471_s10 = sadd.s32 1, %s2734_s3 }
  0x45   : > { %322 = vst.msk [vmem:[#allocation2 + $0x30] sm:$0xff] %vm314_vm0, %v2547_v1  ;;  %s472_s14 = sld [smem:[#allocation8 + %s471_s10]]  ;;  %s551_s16 = sadd.s32 31, %s2734_s3 }
  0x46   : > { %323 = vst.msk [vmem:[#allocation2 + $0x38] sm:$0xff] %vm314_vm0, %v2547_v1  ;;  %s552_s17 = sld [smem:[#allocation8 + %s551_s16]]  ;;  %s4190_s13 = smov 21  }
  0x47   : > { %318 = vst.msk [vmem:[#allocation2 + $0x10] sm:$0x3f] %vm317_vm2, %v2547_v1  ;;  %s566_s1 = sadd.s32 58, %s2734_s3  ;;  %s698_s18 = sadd.s32 34, %s2734_s3 }
  0x48   : > { %333 = vst.msk [vmem:[#allocation2 + $0xb] sm:$0xff] %vm331_vm1, %v326_v2  ;;  %v372_v4 = vstv %s371_s30  ;;  %s567_s2 = sld [smem:[#allocation8 + %s566_s1]]  ;;  %s647_s25 = sadd.s32 7, %s2734_s3 }
  0x49   : > { %v2748_v3 = vld [vmem:[#allocation2] sm:$0xff]  ;;  %321 = vst.msk [vmem:[#allocation2 + $0x28] sm:$0x3f] %vm317_vm2, %v2547_v1  ;;  %v423_v6 = vstv %s2744_s7  ;;  %s699_s23 = sld [smem:[#allocation8 + %s698_s18]]  ;;  %s749_s7 = sadd.s32 61, %s2734_s3 }
  0x4a   : > { %351 = vrot.lane.b32.xlu0 %v2748_v3, %s4199_s11  ;;  %324 = vst.msk [vmem:[#allocation2 + $0x40] sm:$0x3f] %vm317_vm2, %v2547_v1  ;;  %v373_v5 = vmul.f32 %v372_v4, %v2748_v3  ;;  %v2765_v11 = vld [vmem:[#allocation2 + $0x2] sm:$0xff]  ;;  %v538_v17 = vstv %s537_s29  ;;  %s648_s30 = sld [smem:[#allocation8 + %s647_s25]]  ;;  %s801_s29 = sadd.s32 64, %s2734_s3 }
  0x4b   : > { %v2768_v12 = vld [vmem:[#allocation2 + $0x1] sm:$0xff]  ;;  %v473_v19 = vstv %s472_s14  ;;  %334 = vst.msk [vmem:[#allocation2 + $0x1b] sm:$0xff] %vm331_vm1, %v327_v25  ;;  %s750_s12 = sld [smem:[#allocation8 + %s749_s7]]  ;;  %s2947_s14 = smul.u32 3, %s2525_s21 }
  0x4c   : > { %377 = vrot.lane.b32.xlu2 %v373_v5, %s4193_s15  ;;  %v424_v13 = vmul.f32 %v423_v6, %v2768_v12  ;;  %v2786_v16 = vld [vmem:[#allocation2 + $0x3] sm:$0xff]  ;;  %v474_v20 = vmul.f32 %v473_v19, %v2765_v11  ;;  %v553_v22 = vstv %s552_s17  ;;  %335 = vst.msk [vmem:[#allocation2 + $0x23] sm:$0xff] %vm331_vm1, %v328_v30  ;;  %s2932_s10 = sld [smem:[#allocation8 + %s801_s29]]  ;;  %s414_s16 = sadd.s32 27, %s2734_s3 }
  0x4d   : > { %v539_v18 = vmul.f32 %v538_v17, %v2786_v16  ;;  %v554_v29 = vmul.f32 %v553_v22, %v2786_v16  ;;  %s342_s17 = sadd.s32 1, %s2947_s14  ;;  %s415_s1 = sld [smem:[#allocation8 + %s414_s16]] }
  0x4e   : > { %v568_v26 = vstv %s567_s2  ;;  %s343_s2 = sld [smem:[#allocation9 + %s342_s17]]  ;;  %s611_s25 = sadd.s32 59, %s2734_s3 }
  0x4f   : > { %v2755_v7 = vld [vmem:[#allocation2 + $0x9] sm:$0xff]  ;;  %v569_v28 = vmul.f32 %v568_v26, %v2786_v16  ;;  %v700_v35 = vstv %s699_s23  ;;  %s465_s18 = sld [smem:[#allocation8 + %s2734_s3]]  ;;  %s581_s7 = sadd.s32 5, %s2734_s3 }
  0x50   : > { %v2757_v8 = vld [vmem:[#allocation2 + $0x8] sm:$0xff]  ;;  %v425_v9 = vmul.f32 %v423_v6, %v2755_v7  ;;  %v649_v37 = vstv %s648_s30  ;;  %s340_s23 = sld [smem:[#allocation9 + %s2947_s14]]  ;;  %s852_s29 = sadd.s32 37, %s2734_s3 }
  0x51   : > { %v374_v10 = vmul.f32 %v372_v4, %v2757_v8  ;;  %v2778_v14 = vld [vmem:[#allocation2 + $0xb] sm:$0xff]  ;;  %v751_v41 = vstv %s750_s12  ;;  %s2981_s30 = sld [smem:[#allocation8 + %s611_s25]]  ;;  %s903_s16 = sadd.s32 10, %s2734_s3 }
  0x52   : > { %430 = vrot.lane.b32.xlu1 %v425_v9, %s2550_s8  ;;  %354 = vrot.lane.b32.xlu0 %v2757_v8, %s4199_s11  ;;  %v2783_v15 = vld [vmem:[#allocation2 + $0xa] sm:$0xff]  ;;  %v555_v23 = vmul.f32 %v553_v22, %v2778_v14  ;;  %v540_v24 = vmul.f32 %v538_v17, %v2778_v14  ;;  %v570_v32 = vmul.f32 %v568_v26, %v2778_v14  ;;  %v2844_v44 = vld [vmem:[#allocation2 + $0x18] sm:$0xff]  ;;  %s3011_s12 = sld [smem:[#allocation8 + %s581_s7]]  ;;  %s486_s25 = sadd.s32 2, %s2734_s3 }
  0x53   : > { %v475_v21 = vmul.f32 %v473_v19, %v2783_v15  ;;  %v2805_v27 = vld [vmem:[#allocation2 + $0x4] sm:$0xff]  ;;  %v2817_v31 = vld [vmem:[#allocation2 + $0xd] sm:$0xff]  ;;  %s3071_s17 = sld [smem:[#allocation8 + %s903_s16]] }
  0x54   : > { %379 = vrot.lane.b32.xlu2 %v374_v10, %s4193_s15  ;;  %v2823_v33 = vld [vmem:[#allocation2 + $0xc] sm:$0xff]  ;;  %v650_v39 = vmul.f32 %v649_v37, %v2805_v27  ;;  %v702_v43 = vmul.f32 %v700_v35, %v2817_v31  ;;  %v2854_v46 = vld [vmem:[#allocation2 + $0x20] sm:$0xff]  ;;  %s3101_s7 = sld [smem:[#allocation8 + %s486_s25]]  ;;  %s918_s25 = sadd.s32 11, %s2734_s3 }
  0x55   : > { %v2825_v34 = vld [vmem:[#allocation2 + $0x5] sm:$0xff]  ;;  %v651_v38 = vmul.f32 %v649_v37, %v2823_v33  ;;  %v2834_v40 = vld [vmem:[#allocation2 + $0xe] sm:$0xff] }
  0x56   : > { %v701_v36 = vmul.f32 %v700_v35, %v2825_v34  ;;  %v753_v42 = vmul.f32 %v751_v41, %v2834_v40  ;;  %v2848_v45 = vld [vmem:[#allocation2 + $0x6] sm:$0xff] }
  0x57   : > { %v752_v47 = vmul.f32 %v751_v41, %v2848_v45  ;;  %v2930_v37 = vld [vmem:[#allocation2 + $0x21] sm:$0xff] }
  0x5a   : > { %453 = vrot.lane.b32.xlu1 %v2765_v11, %s4199_s11  ;;  %405 = vrot.lane.b32.xlu0 %v2755_v7, %s4199_s11 }
  0x5c   : > { %402 = vrot.lane.b32.xlu2 %v2768_v12, %s4199_s11 }
  0x62   : > { %506 = vrot.lane.b32.xlu1 %v2778_v14, %s4199_s11  ;;  %428 = vrot.lane.b32.xlu0 %v424_v13, %s2550_s8 }
  0x64   : > { %456 = vrot.lane.b32.xlu2 %v2783_v15, %s4199_s11 }
  0x6a   : > { %543 = vrot.lane.b32.xlu1 %v539_v18, %s4190_s13  ;;  %480 = vrot.lane.b32.xlu0 %v475_v21, %s4190_s13 }
  0x6c   : > { %478 = vrot.lane.b32.xlu2 %v474_v20, %s4190_s13 }
  0x72   : > { %560 = vrot.lane.b32.xlu1 %v555_v23, %s2550_s8  ;;  %503 = vrot.lane.b32.xlu0 %v2786_v16, %s4199_s11 }
  0x74   : > { %545 = vrot.lane.b32.xlu2 %v540_v24, %s4190_s13 }
  0x7a   : > { %628 = vrot.lane.b32.xlu1 %v2805_v27, %s4199_s11  ;;  %558 = vrot.lane.b32.xlu0 %v554_v29, %s2550_s8 }
  0x7c   : > { %573 = vrot.lane.b32.xlu2 %v569_v28, %s4193_s15 }
  0x82   : > { %682 = vrot.lane.b32.xlu1 %v2817_v31, %s4199_s11  ;;  %575 = vrot.lane.b32.xlu0 %v570_v32, %s4193_s15 }
  0x84   : > { %631 = vrot.lane.b32.xlu2 %v2823_v33, %s4199_s11 }
  0x8a   : > { %705 = vrot.lane.b32.xlu1 %v701_v36, %s2550_s8  ;;  %656 = vrot.lane.b32.xlu0 %v651_v38, %s4190_s13 }
  0x8c   : > { %654 = vrot.lane.b32.xlu2 %v650_v39, %s4190_s13 }
  0x92   : > { %758 = vrot.lane.b32.xlu1 %v753_v42, %s4193_s15  ;;  %679 = vrot.lane.b32.xlu0 %v2825_v34, %s4199_s11  ;;  %v803_v42 = vstv %s2932_s10  ;;  %s853_s10 = sld [smem:[#allocation8 + %s852_s29]]  ;;  %s4195_s29 = smov 18  }
  0x94   : > { %707 = vrot.lane.b32.xlu2 %v702_v43, %s2550_s8  ;;  %v805_v43 = vmul.f32 %v803_v42, %v2854_v46 }
  0x9a   : > { %782 = vrot.lane.b32.xlu1 %v2844_v44, %s4199_s11  ;;  %733 = vrot.lane.b32.xlu0 %v2834_v40, %s4199_s11 }
  0x9c   : > { %730 = vrot.lane.b32.xlu2 %v2848_v45, %s4199_s11 }
  0xa2   : > { %756 = vrot.lane.b32.xlu0 %v752_v47, %s4193_s15 }
  0xa4   : > { %785 = vrot.lane.b32.xlu2 %v2854_v46, %s4199_s11 }
  0xa6   : > { %v2860_v48 = vpop.permute.xlu2 %377 }
  0xae   : > { %v2862_v49 = vpop.permute.xlu2 %379 }
  0xb6   : > { %v403_v50 = vpop.permute.xlu2 %402 }
  0xb7   : > { %v404_v62 = vsel %vm350_vm3, %v403_v50, %v2768_v12  ;;  %v2949_v50 = vld [vmem:[#allocation2 + $0x19] sm:$0xff] }
  0xbc   : > { %v352_v51 = vpop.permute.xlu0 %351 }
  0xbd   : > { %v353_v52 = vsel %vm350_vm3, %v352_v51, %v2748_v3 }
  0xbe   : > { %357 = vrot.lane.b32.xlu1 %v353_v52, %s4199_s11  ;;  %v457_v53 = vpop.permute.xlu2 %456  ;;  %v416_v52 = vstv %s415_s1  ;;  %s968_s1 = sadd.s32 13, %s2734_s3 }
  0xbf   : > { %v458_v2 = vsel %vm350_vm3, %v457_v53, %v2783_v15 }
  0xc4   : > { %v2867_v54 = vpop.permute.xlu1 %430  ;;  %v355_v55 = vpop.permute.xlu0 %354 }
  0xc5   : > { %v356_v56 = vsel %vm350_vm3, %v355_v55, %v2757_v8 }
  0xc6   : > { %359 = vrot.lane.b32.xlu1 %v356_v56, %s4199_s11  ;;  %v2872_v57 = vpop.permute.xlu2 %478 }
  0xcc   : > { %v454_v58 = vpop.permute.xlu1 %453  ;;  %v406_v59 = vpop.permute.xlu0 %405 }
  0xcd   : > { %v455_v60 = vsel %vm350_vm3, %v454_v58, %v2765_v11  ;;  %v407_v61 = vsel %vm350_vm3, %v406_v59, %v2755_v7  ;;  %v344_v58 = vstv %s343_s2  ;;  %s3077_s2 = sld [smem:[#allocation8 + %s968_s1]]  ;;  %s4197_s1 = smov 16  }
  0xce   : > { %459 = vrot.lane.b32.xlu0 %v455_v60, %s4199_s11  ;;  %410 = vrot.lane.b32.xlu2 %v407_v61, %s4199_s11  ;;  %v2883_v63 = vpop.permute.xlu2 %545 }
  0xcf   : > { %408 = vrot.lane.b32.xlu1 %v404_v62, %s4199_s11 }
  0xd4   : > { %v507_v0 = vpop.permute.xlu1 %506  ;;  %v2900_v13 = vpop.permute.xlu0 %428 }
  0xd5   : > { %v508_v1 = vsel %vm350_vm3, %v507_v0, %v2778_v14 }
  0xd6   : > { %511 = vrot.lane.b32.xlu0 %v508_v1, %s4199_s11  ;;  %v2891_v4 = vpop.permute.xlu2 %573 }
  0xd7   : > { %461 = vrot.lane.b32.xlu1 %v458_v2, %s4199_s11  ;;  %v466_v2 = vstv %s465_s18  ;;  %s436_s18 = sadd.s32 29, %s2734_s3 }
  0xdc   : > { %v2893_v5 = vpop.permute.xlu1 %543  ;;  %v2909_v21 = vpop.permute.xlu0 %480 }
  0xde   : > { %v632_v6 = vpop.permute.xlu2 %631 }
  0xdf   : > { %v633_v9 = vsel %vm350_vm3, %v632_v6, %v2823_v33 }
  0xe0   : > { %636 = vrot.lane.b32.xlu1 %v633_v9, %s4199_s11 }
  0xe4   : > { %v2898_v10 = vpop.permute.xlu1 %560  ;;  %v504_v26 = vpop.permute.xlu0 %503 }
  0xe5   : > { %v505_v29 = vsel %vm350_vm3, %v504_v26, %v2786_v16 }
  0xe6   : > { %v2902_v17 = vpop.permute.xlu2 %654  ;;  %509 = vrot.lane.b32.xlu2 %v505_v29, %s4199_s11 }
  0xec   : > { %v629_v18 = vpop.permute.xlu1 %628  ;;  %v2927_v36 = vpop.permute.xlu0 %558 }
  0xed   : > { %v630_v19 = vsel %vm350_vm3, %v629_v18, %v2805_v27 }
  0xee   : > { %634 = vrot.lane.b32.xlu0 %v630_v19, %s4199_s11  ;;  %v2907_v20 = vpop.permute.xlu2 %707  ;;  %v341_v19 = vstv %s340_s23  ;;  %s3092_s23 = sld [smem:[#allocation8 + %s436_s18]] }
  0xf4   : > { %v683_v22 = vpop.permute.xlu1 %682  ;;  %v2939_v41 = vpop.permute.xlu0 %575 }
  0xf5   : > { %v684_v23 = vsel %vm350_vm3, %v683_v22, %v2817_v31  ;;  %4221 = vst [vmem:[#allocation26_spill] sm:$0xff] %v2939_v41  ;;  %v4225_v41 = vstv %s2981_s30 }
  0xf6   : > { %687 = vrot.lane.b32.xlu0 %v684_v23, %s4199_s11  ;;  %v731_v24 = vpop.permute.xlu2 %730 }
  0xf7   : > { %v732_v25 = vsel %vm350_vm3, %v731_v24, %v2848_v45 }
  0xf8   : > { %736 = vrot.lane.b32.xlu1 %v732_v25, %s4199_s11 }
  0xfc   : > { %v2917_v28 = vpop.permute.xlu1 %705  ;;  %v2944_v47 = vpop.permute.xlu0 %656 }
  0xfd   : > { %4219 = vst [vmem:[#allocation24_spill] sm:$0xff] %v2917_v28 }
  0xfe   : > { %v786_v30 = vpop.permute.xlu2 %785 }
  0xff   : > { %v787_v32 = vsel %vm350_vm3, %v786_v30, %v2854_v46 }
 0x100   : > { %790 = vrot.lane.b32.xlu1 %v787_v32, %s4199_s11  ;;  %v4183_v32 = vstv %s2981_s30  ;;  %s816_s30 = sadd.s32 65, %s2734_s3 }
 0x101   : > { %s3143_s18 = sld [smem:[#allocation8 + %s816_s30]]  ;;  %s522_s30 = sadd.s32 30, %s2734_s3 }
 0x104   : > { %v2925_v35 = vpop.permute.xlu1 %758  ;;  %v680_v51 = vpop.permute.xlu0 %679 }
 0x105   : > { %4220 = vst [vmem:[#allocation25_spill] sm:$0xff] %v2925_v35  ;;  %v681_v56 = vsel %vm350_vm3, %v680_v51, %v2825_v34  ;;  %v4185_v35 = vstv %s3077_s2 }
 0x106   : > { %685 = vrot.lane.b32.xlu2 %v681_v56, %s4199_s11  ;;  %v804_v56 = vmul.f32 %v803_v42, %v2844_v44 }
 0x108   : > { %836 = vrot.lane.b32.xlu1 %v2930_v37, %s4199_s11 }
 0x10c   : > { %v783_v38 = vpop.permute.xlu1 %782  ;;  %v734_v60 = vpop.permute.xlu0 %733 }
 0x10d   : > { %v784_v39 = vsel %vm350_vm3, %v783_v38, %v2844_v44  ;;  %v735_v62 = vsel %vm350_vm3, %v734_v60, %v2834_v40 }
 0x10e   : > { %788 = vrot.lane.b32.xlu0 %v784_v39, %s4199_s11  ;;  %738 = vrot.lane.b32.xlu2 %v735_v62, %s4199_s11 }
 0x116   : > { %810 = vrot.lane.b32.xlu0 %v805_v43, %s4193_s15  ;;  %808 = vrot.lane.b32.xlu2 %v804_v56, %s4193_s15 }
 0x11e   : > { %833 = vrot.lane.b32.xlu0 %v2949_v50, %s4199_s11 }
 0x128   : > { %v411_v53 = vpop.permute.xlu2 %410 }
 0x129   : > { %v2957_v55 = vsel %vm350_vm3, %v411_v53, %v2755_v7  ;;  %v2970_v7 = vpop.permute.xlu0 %756 }
 0x12a   : > { %v418_v59 = vmul.f32 %v416_v52, %v2957_v55 }
 0x12c   : > { %v2963_v61 = vadd.f32 %v418_v59, %v344_v58 }
 0x130   : > { %v2967_v0 = vpop.permute.xlu1 %357 }
 0x138   : > { %v2973_v1 = vpop.permute.xlu1 %359 }
 0x140   : > { %v460_v6 = vpop.permute.xlu0 %459 }
 0x141   : > { %v2979_v9 = vsel %vm350_vm3, %v460_v6, %v2765_v11  ;;  %v409_v18 = vpop.permute.xlu1 %408 }
 0x142   : > { %v467_v22 = vmul.f32 %v466_v2, %v2979_v9  ;;  %v2986_v23 = vsel %vm350_vm3, %v409_v18, %v2768_v12  ;;  %v3040_v18 = vld [vmem:[#allocation2 + $0x22] sm:$0xff] }
 0x143   : > { %v417_v24 = vmul.f32 %v416_v52, %v2986_v23  ;;  %v4184_v52 = vstv %s3011_s12 }
 0x144   : > { %v2989_v25 = vadd.f32 %v467_v22, %v341_v19 }
 0x145   : > { %v2991_v26 = vadd.f32 %v417_v24, %v344_v58  ;;  %v854_v24 = vstv %s853_s10  ;;  %s662_s10 = sadd.s32 8, %s2734_s3 }
 0x146   : > { %s3117_s16 = sld [smem:[#allocation8 + %s662_s10]]  ;;  %s385_s10 = sadd.s32 56, %s2734_s3 }
 0x148   : > { %v512_v11 = vpop.permute.xlu0 %511 }
 0x149   : > { %v2995_v29 = vsel %vm350_vm3, %v512_v11, %v2778_v14  ;;  %v462_v30 = vpop.permute.xlu1 %461  ;;  %v510_v14 = vpop.permute.xlu2 %509  ;;  %v856_v11 = vmul.f32 %v854_v24, %v2930_v37 }
 0x14a   : > { %v3000_v38 = vsel %vm350_vm3, %v462_v30, %v2783_v15  ;;  %v3006_v39 = vmul.f32 %v4183_v32, %v2995_v29  ;;  %v3017_v15 = vsel %vm350_vm3, %v510_v14, %v2786_v16  ;;  %v3052_v30 = vld [vmem:[#allocation2 + $0x1a] sm:$0xff]  ;;  %v855_v14 = vmul.f32 %v854_v24, %v2949_v50 }
 0x14b   : > { %v468_v12 = vmul.f32 %v466_v2, %v3000_v38  ;;  %v3023_v53 = vmul.f32 %v4184_v52, %v3017_v15  ;;  %v3082_v52 = vld [vmem:[#allocation2 + $0x23] sm:$0xff] }
 0x14c   : > { %859 = vrot.lane.b32.xlu1 %v855_v14, %s2550_s8 }
 0x14d   : > { %v3008_v43 = vadd.f32 %v468_v12, %v341_v19 }
 0x152   : > { %v3013_v51 = vpop.permute.xlu1 %636 }
 0x160   : > { %v3029_v59 = vpop.permute.xlu0 %634  ;;  %v3056_v12 = vpop.permute.xlu2 %685 }
 0x168   : > { %v3033_v62 = vpop.permute.xlu0 %687  ;;  %v3060_v56 = vpop.permute.xlu2 %738 }
 0x16a   : > { %v3027_v58 = vpop.permute.xlu1 %736 }
 0x172   : > { %v3031_v60 = vpop.permute.xlu1 %790 }
 0x17a   : > { %v837_v16 = vpop.permute.xlu1 %836 }
 0x17b   : > { %v838_v2 = vsel %vm350_vm3, %v837_v16, %v2930_v37  ;;  %v3062_v16 = vpop.permute.xlu2 %808 }
 0x17c   : > { %841 = vrot.lane.b32.xlu0 %v838_v2, %s4199_s11 }
 0x180   : > { %v3038_v6 = vpop.permute.xlu0 %788 }
 0x184   : > { %887 = vrot.lane.b32.xlu0 %v3040_v18, %s4199_s11 }
 0x188   : > { %v3044_v42 = vpop.permute.xlu0 %810 }
 0x189   : > { %4222 = vst [vmem:[#allocation27_spill] sm:$0xff] %v3044_v42  ;;  %v905_v42 = vstv %s3071_s17  ;;  %s764_s17 = sadd.s32 62, %s2734_s3 }
 0x190   : > { %v834_v19 = vpop.permute.xlu0 %833 }
 0x191   : > { %v835_v22 = vsel %vm350_vm3, %v834_v19, %v2949_v50 }
 0x192   : > { %839 = vrot.lane.b32.xlu2 %v835_v22, %s4199_s11 }
 0x19a   : > { %861 = vrot.lane.b32.xlu2 %v856_v11, %s2550_s8 }
 0x1a2   : > { %884 = vrot.lane.b32.xlu2 %v3052_v30, %s4199_s11 }
 0x1ec   : > { %v3064_v2 = vpop.permute.xlu2 %839 }
 0x1ee   : > { %v3066_v19 = vpop.permute.xlu0 %841 }
 0x1f4   : > { %v3068_v22 = vpop.permute.xlu2 %861 }
 0x1f5   : > { %4223 = vst [vmem:[#allocation28_spill] sm:$0xff] %v3068_v22 }
 0x1f6   : > { %v888_v11 = vpop.permute.xlu0 %887 }
 0x1f7   : > { %v889_v24 = vsel %vm350_vm3, %v888_v11, %v3040_v18  ;;  %v907_v11 = vmul.f32 %v905_v42, %v3040_v18 }
 0x1f8   : > { %892 = vrot.lane.b32.xlu2 %v889_v24, %s4199_s11  ;;  %v3089_v24 = vld [vmem:[#allocation2 + $0x1b] sm:$0xff] }
 0x1fc   : > { %v885_v14 = vpop.permute.xlu2 %884 }
 0x1fd   : > { %v886_v32 = vsel %vm350_vm3, %v885_v14, %v3052_v30  ;;  %v4188_v14 = vstv %s3092_s23 }
 0x1fe   : > { %890 = vrot.lane.b32.xlu1 %v886_v32, %s4199_s11  ;;  %v971_v32 = vmul.f32 %v4185_v35, %v3089_v24  ;;  %v439_v28 = vmul.f32 %v4188_v14, %v2986_v23  ;;  %v488_v35 = vstv %s3101_s7  ;;  %v614_v23 = vmul.f32 %v4225_v41, %v3017_v15  ;;  %s3160_s7 = sld [smem:[#allocation8 + %s918_s25]] }
 0x1ff   : > { %s3188_s25 = sld [smem:[#allocation8 + %s522_s30]]  ;;  %s640_s30 = sadd.s32 6, %s2734_s3 }
 0x200   : > { %938 = vrot.lane.b32.xlu2 %v3082_v52, %s4199_s11 }
 0x206   : > { %912 = vrot.lane.b32.xlu1 %v907_v11, %s4190_s13  ;;  %v490_v11 = vmul.f32 %v488_v35, %v3000_v38  ;;  %v4189_v38 = vstv %s3117_s16 }
 0x208   : > { %975 = vrot.lane.b32.xlu2 %v971_v32, %s4190_s13  ;;  %v4224_v32 = vstv %s3011_s12  ;;  %s3129_s12 = sld [smem:[#allocation8 + %s764_s17]] }
 0x209   : > { %v585_v22 = vmul.f32 %v4224_v32, %v2995_v29  ;;  %v4187_v32 = vstv %s3143_s18  ;;  %s3172_s17 = sld [smem:[#allocation8 + %s385_s10]] }
 0x20e   : > { %935 = vrot.lane.b32.xlu1 %v3089_v24, %s4199_s11  ;;  %v4186_v41 = vstv %s3129_s12 }
 0x210   : > { %443 = vrot.lane.b32.xlu2 %v439_v28, %s4195_s29  ;;  %v3127_v28 = vsel %vm350_vm3, %v3013_v51, %v2823_v33  ;;  %v3152_v51 = vsel %vm350_vm3, %v3031_v60, %v2854_v46  ;;  %v906_v60 = vmul.f32 %v905_v42, %v3052_v30 }
 0x212   : > { %910 = vrot.lane.b32.xlu0 %v906_v60, %s4190_s13  ;;  %v3191_v60 = vpop.permute.xlu1 %859  ;;  %s3218_s13 = sld [smem:[#allocation8 + %s640_s30]]  ;;  %s896_s30 = sadd.s32 9, %s2734_s3 }
 0x213   : > { %s3247_s15 = sld [smem:[#allocation8 + %s896_s30]] }
 0x218   : > { %495 = vrot.lane.b32.xlu2 %v490_v11, %s2550_s8  ;;  %v3141_v11 = vsel %vm350_vm3, %v3027_v58, %v2848_v45  ;;  %v820_v45 = vmul.f32 %v4187_v32, %v3152_v51  ;;  %v920_v58 = vstv %s3160_s7  ;;  %s529_s7 = sadd.s32 3, %s2734_s3 }
 0x219   : > { %v767_v33 = vmul.f32 %v4186_v41, %v3141_v11  ;;  %s3194_s10 = sld [smem:[#allocation8 + %s529_s7]] }
 0x220   : > { %590 = vrot.lane.b32.xlu2 %v585_v22, %s2550_s8  ;;  %v666_v22 = vmul.f32 %v4189_v38, %v3127_v28 }
 0x228   : > { %618 = vrot.lane.b32.xlu2 %v614_v23, %s4197_s1 }
 0x230   : > { %671 = vrot.lane.b32.xlu2 %v666_v22, %s2550_s8 }
 0x238   : > { %771 = vrot.lane.b32.xlu2 %v767_v33, %s4197_s1 }
 0x240   : > { %825 = vrot.lane.b32.xlu2 %v820_v45, %s4197_s1 }
 0x252   : > { %v893_v23 = vpop.permute.xlu2 %892 }
 0x253   : > { %v3165_v22 = vsel %vm350_vm3, %v893_v23, %v3040_v18  ;;  %v387_v18 = vstv %s3172_s17  ;;  %v3183_v23 = vsel %vm350_vm3, %v2973_v1, %v2757_v8  ;;  %v434_v8 = vadd.f32 %v2900_v13, %v2991_v26  ;;  %s596_s17 = sadd.s32 32, %s2734_s3 }
 0x254   : > { %v3168_v46 = vmul.f32 %v920_v58, %v3165_v22  ;;  %v389_v42 = vmul.f32 %v387_v18, %v3183_v23  ;;  %v489_v1 = vmul.f32 %v488_v35, %v2979_v9  ;;  %s3208_s7 = sld [smem:[#allocation8 + %s596_s17]]  ;;  %v531_v35 = vstv %s3194_s10  ;;  %s713_s17 = sadd.s32 35, %s2734_s3 }
 0x255   : > { %v485_v26 = vadd.f32 %v2909_v21, %v3008_v43  ;;  %v3228_v43 = vld [vmem:[#allocation2 + $0x26] sm:$0xff]  ;;  %s794_s10 = sadd.s32 63, %s2734_s3 }
 0x25a   : > { %v939_v33 = vpop.permute.xlu2 %938 }
 0x25b   : > { %v940_v45 = vsel %vm350_vm3, %v939_v33, %v3082_v52  ;;  %v4192_v33 = vstv %s3188_s25 }
 0x25c   : > { %943 = vrot.lane.b32.xlu1 %v940_v45, %s4199_s11  ;;  %v525_v32 = vmul.f32 %v4192_v33, %v3017_v15 }
 0x262   : > { %v3186_v41 = vpop.permute.xlu2 %975 }
 0x264   : > { %394 = vrot.lane.b32.xlu1 %v389_v42, %s4197_s1 }
 0x26a   : > { %v444_v45 = vpop.permute.xlu2 %443 }
 0x26b   : > { %v449_v14 = vadd.f32 %v444_v45, %v434_v8  ;;  %v598_v8 = vstv %s3208_s7  ;;  %s3245_s7 = sld [smem:[#allocation8 + %s713_s17]] }
 0x26c   : > { %493 = vrot.lane.b32.xlu1 %v489_v1, %s2550_s8  ;;  %v642_v1 = vstv %s3218_s13 }
 0x26d   : > { %v3205_v42 = vadd.f32 %v525_v32, %v449_v14  ;;  %v533_v32 = vmul.f32 %v531_v35, %v2995_v29  ;;  %v644_v33 = vmul.f32 %v642_v1, %v3127_v28 }
 0x270   : > { %v891_v38 = vpop.permute.xlu1 %890 }
 0x271   : > { %v3212_v13 = vsel %vm350_vm3, %v891_v38, %v3052_v30 }
 0x272   : > { %v921_v9 = vmul.f32 %v920_v58, %v3212_v13  ;;  %v496_v14 = vpop.permute.xlu2 %495 }
 0x273   : > { %v500_v30 = vadd.f32 %v496_v14, %v485_v26 }
 0x274   : > { %925 = vrot.lane.b32.xlu2 %v921_v9, %s2550_s8  ;;  %588 = vrot.lane.b32.xlu1 %v3023_v53, %s2550_s8  ;;  %v600_v9 = vmul.f32 %v598_v8, %v2995_v29  ;;  %v3243_v53 = vsel %vm350_vm3, %v3029_v59, %v2805_v27 }
 0x275   : > { %v535_v38 = vadd.f32 %v533_v32, %v500_v30  ;;  %v329_v32 = vld [vmem:[%s2717_s28 + $0x20] sm:$0xff]  ;;  %v3263_v30 = vsel %vm350_vm3, %v2967_v0, %v2748_v3 }
 0x276   : > { %336 = vst.msk [vmem:[#allocation2 + $0x33] sm:$0xff] %vm331_vm1, %v329_v32  ;;  %v3296_v32 = vsel %vm350_vm3, %v3038_v6, %v2844_v44  ;;  %v3318_v6 = vsel %vm350_vm3, %v3066_v19, %v2930_v37  ;;  %v3333_v37 = vsel %vm350_vm3, %v3056_v12, %v2825_v34  ;;  %v4230_v34 = vstv %s3129_s12  ;;  %s363_s12 = sadd.s32 54, %s2734_s3 }
 0x277   : > { %v550_v21 = vadd.f32 %v2883_v63, %v535_v38  ;;  %v388_v38 = vmul.f32 %v387_v18, %v3263_v30 }
 0x278   : > { %v913_v58 = vpop.permute.xlu1 %912 }
 0x27a   : > { %v591_v45 = vpop.permute.xlu2 %590 }
 0x27b   : > { %v595_v26 = vadd.f32 %v591_v45, %v550_v21  ;;  %v715_v21 = vstv %s3245_s7  ;;  %v3270_v45 = vsel %vm350_vm3, %v3033_v62, %v2817_v31 }
 0x27c   : > { %1165 = vrot.lane.b32.xlu2 %v3228_v43, %s4199_s11  ;;  %605 = vrot.lane.b32.xlu1 %v600_v9, %s4195_s29  ;;  %v898_v9 = vstv %s3247_s15  ;;  %v717_v31 = vmul.f32 %v715_v21, %v3270_v45  ;;  %v716_v19 = vmul.f32 %v715_v21, %v3333_v37  ;;  %s3455_s15 = sld [smem:[#allocation8 + %s794_s10]] }
 0x27d   : > { %v646_v63 = vadd.f32 %v644_v33, %v595_v26  ;;  %v4226_v33 = vstv %s3117_s16  ;;  %s998_s16 = sadd.s32 67, %s2734_s3  ;;  %v3274_v26 = vld [vmem:[#allocation2 + $0x33] sm:$0xff]  ;;  %v900_v62 = vmul.f32 %v898_v9, %v3165_v22  ;;  %v4228_v22 = vstv %s3143_s18  ;;  %s983_s18 = sadd.s32 40, %s2734_s3 }
 0x27e   : > { %v665_v27 = vmul.f32 %v4226_v33, %v3243_v53  ;;  %s3283_s17 = sld [smem:[#allocation8 + %s998_s16]]  ;;  %s1013_s16 = sadd.s32 14, %s2734_s3 }
 0x27f   : > { %v661_v3 = vadd.f32 %v2944_v47, %v646_v63  ;;  %v4227_v63 = vstv %s3092_s23  ;;  %s4229_s23 = smov 19   ;;  %s3349_s7 = sld [smem:[#allocation8 + %s983_s18]] }
 0x280   : > { %v936_v14 = vpop.permute.xlu1 %935  ;;  %s3379_s18 = sld [smem:[#allocation8 + %s1013_s16]]  ;;  %s947_s16 = sadd.s32 66, %s2734_s3 }
 0x281   : > { %v937_v28 = vsel %vm350_vm3, %v936_v14, %v3089_v24  ;;  %v330_v14 = vld [vmem:[%s2717_s28 + $0x28] sm:$0xff]  ;;  %s867_s28 = sadd.s32 38, %s2734_s3 }
 0x282   : > { %941 = vrot.lane.b32.xlu0 %v937_v28, %s4199_s11  ;;  %v3257_v59 = vpop.permute.xlu2 %618  ;;  %337 = vst.msk [vmem:[#allocation2 + $0x3b] sm:$0xff] %vm331_vm1, %v330_v14  ;;  %v440_v28 = vmul.f32 %v4227_v63, %v2957_v55  ;;  %s3302_s30 = sld [smem:[#allocation8 + %s867_s28]]  ;;  %v819_v55 = vmul.f32 %v4228_v22, %v3296_v32  ;;  %v3390_v63 = vld [vmem:[#allocation2 + $0x30] sm:$0xff] }
 0x283   : > { %s3373_s28 = sld [smem:[#allocation8 + %s363_s12]] }
 0x284   : > { %669 = vrot.lane.b32.xlu1 %v665_v27, %s2550_s8  ;;  %1367 = vrot.lane.b32.xlu2 %v3274_v26, %s4199_s11 }
 0x288   : > { %v869_v14 = vstv %s3302_s30  ;;  %s345_s30 = sadd.s32 2, %s2947_s14  ;;  %s4233_s14 = smov 22  }
 0x289   : > { %v3300_v27 = vld [vmem:[#allocation2 + $0x3e] sm:$0xff]  ;;  %v3355_v21 = vld [vmem:[#allocation2 + $0x36] sm:$0xff] }
 0x28a   : > { %392 = vrot.lane.b32.xlu0 %v388_v38, %s4197_s1  ;;  %v672_v0 = vpop.permute.xlu2 %671  ;;  %v1000_v38 = vstv %s3283_s17  ;;  %s691_s17 = sadd.s32 33, %s2734_s3 }
 0x28b   : > { %v676_v18 = vadd.f32 %v672_v0, %v661_v3  ;;  %v1001_v44 = vmul.f32 %v1000_v38, %v3089_v24  ;;  %v871_v3 = vmul.f32 %v869_v14, %v3318_v6  ;;  %s3460_s12 = sld [smem:[#allocation8 + %s691_s17]]  ;;  %s1196_s17 = sadd.s32 71, %s2734_s3 }
 0x28c   : > { %722 = vrot.lane.b32.xlu1 %v717_v31, %s4195_s29  ;;  %1597 = vrot.lane.b32.xlu2 %v3300_v27, %s4199_s11  ;;  %v3328_v31 = vld [vmem:[#allocation2 + $0x1e] sm:$0xff] }
 0x28d   : > { %v902_v47 = vadd.f32 %v900_v62, %v676_v18  ;;  %v365_v18 = vstv %s3373_s28  ;;  %s845_s28 = sadd.s32 36, %s2734_s3 }
 0x28f   : > { %v3298_v33 = vadd.f32 %v913_v58, %v902_v47  ;;  %v599_v58 = vmul.f32 %v598_v8, %v3017_v15  ;;  %v3339_v8 = vld [vmem:[#allocation2 + $0x38] sm:$0xff]  ;;  %v1015_v47 = vstv %s3379_s18  ;;  %s3483_s18 = sld [smem:[#allocation8 + %s845_s28]]  ;;  %s1248_s28 = sadd.s32 74, %s2734_s3 }
 0x292   : > { %445 = vrot.lane.b32.xlu0 %v440_v28, %s4195_s29 }
 0x294   : > { %823 = vrot.lane.b32.xlu1 %v819_v55, %s4197_s1  ;;  %1005 = vrot.lane.b32.xlu2 %v1001_v44, %s4229_s23 }
 0x29a   : > { %603 = vrot.lane.b32.xlu0 %v599_v58, %s4195_s29 }
 0x29c   : > { %876 = vrot.lane.b32.xlu1 %v871_v3, %s4195_s29  ;;  %v3403_v3 = vld [vmem:[#allocation2 + $0x3b] sm:$0xff] }
 0x2a2   : > { %620 = vrot.lane.b32.xlu0 %v3006_v39, %s4197_s1  ;;  %v3345_v39 = vsel %vm350_vm3, %v3060_v56, %v2834_v40  ;;  %v3360_v40 = vsel %vm350_vm3, %v3064_v2, %v2949_v50  ;;  %v985_v56 = vstv %s3349_s7  ;;  %v4231_v50 = vstv %s3077_s2  ;;  %s3381_s7 = sld [smem:[#allocation9 + %s345_s30]]  ;;  %s742_s2 = sadd.s32 60, %s2734_s3 }
 0x2a3   : > { %v768_v12 = vmul.f32 %v4230_v34, %v3345_v39  ;;  %v870_v0 = vmul.f32 %v869_v14, %v3360_v40  ;;  %v987_v62 = vmul.f32 %v985_v56, %v3082_v52  ;;  %v972_v2 = vmul.f32 %v4231_v50, %v3082_v52  ;;  %v3405_v34 = vpop.permute.xlu2 %771  ;;  %s3479_s30 = sld [smem:[#allocation8 + %s947_s16]] }
 0x2a4   : > { %1162 = vrot.lane.b32.xlu1 %v3328_v31, %s4199_s11  ;;  %v986_v50 = vmul.f32 %v985_v56, %v3089_v24 }
 0x2a8   : > { %v347_v55 = vstv %s3381_s7 }
 0x2aa   : > { %720 = vrot.lane.b32.xlu0 %v716_v19, %s4195_s29 }
 0x2ac   : > { %1217 = vrot.lane.b32.xlu1 %v3339_v8, %s4199_s11 }
 0x2b2   : > { %773 = vrot.lane.b32.xlu0 %v768_v12, %s4197_s1  ;;  %s515_s1 = sadd.s32 57, %s2734_s3 }
 0x2b4   : > { %1594 = vrot.lane.b32.xlu1 %v3355_v21, %s4199_s11  ;;  %s3386_s11 = sld [smem:[#allocation8 + %s515_s1]] }
 0x2b5   : > { %s3440_s1 = sld [smem:[#allocation8 + %s742_s2]] }
 0x2ba   : > { %874 = vrot.lane.b32.xlu0 %v870_v0, %s4195_s29  ;;  %s4232_s29 = smov 21   ;;  %v517_v14 = vstv %s3386_s11  ;;  %s961_s11 = sadd.s32 12, %s2734_s3 }
 0x2bb   : > { %v519_v12 = vmul.f32 %v517_v14, %v2995_v29  ;;  %s3436_s13 = sld [smem:[#allocation8 + %s961_s11]]  ;;  %s1043_s11 = sadd.s32 68, %s2734_s3 }
 0x2bc   : > { %992 = vrot.lane.b32.xlu1 %v987_v62, %s2550_s8  ;;  %s3539_s2 = sld [smem:[#allocation8 + %s1043_s11]] }
 0x2c2   : > { %927 = vrot.lane.b32.xlu0 %v3168_v46, %s2550_s8  ;;  %v367_v46 = vmul.f32 %v365_v18, %v3183_v23 }
 0x2c4   : > { %v369_v58 = vadd.f32 %v367_v46, %v347_v55  ;;  %v532_v46 = vmul.f32 %v531_v35, %v3017_v15  ;;  %v911_v35 = vpop.permute.xlu0 %910 }
 0x2c6   : > { %v384_v23 = vadd.f32 %v2862_v49, %v369_v58  ;;  %v484_v49 = vadd.f32 %v2872_v57, %v2989_v25  ;;  %v643_v57 = vmul.f32 %v642_v1, %v3243_v53 }
 0x2ca   : > { %977 = vrot.lane.b32.xlu0 %v972_v2, %s4232_s29 }
 0x2ce   : > { %v944_v28 = vpop.permute.xlu1 %943 }
 0x2cf   : > { %v3394_v22 = vsel %vm350_vm3, %v944_v28, %v3082_v52 }
 0x2d0   : > { %v1017_v44 = vmul.f32 %v1015_v47, %v3394_v22 }
 0x2d2   : > { %1214 = vrot.lane.b32.xlu0 %v3390_v63, %s4233_s14  ;;  %1022 = vrot.lane.b32.xlu2 %v1017_v44, %s2550_s8  ;;  %v3418_v44 = vpop.permute.xlu2 %825 }
 0x2d6   : > { %v395_v19 = vpop.permute.xlu1 %394 }
 0x2d7   : > { %v399_v0 = vadd.f32 %v395_v19, %v384_v23  ;;  %v1002_v23 = vmul.f32 %v1000_v38, %v3082_v52 }
 0x2d9   : > { %v3410_v62 = vadd.f32 %v519_v12, %v399_v0 }
 0x2da   : > { %1370 = vrot.lane.b32.xlu0 %v3403_v3, %s4233_s14  ;;  %v926_v12 = vpop.permute.xlu2 %925 }
 0x2de   : > { %v494_v2 = vpop.permute.xlu1 %493 }
 0x2df   : > { %v499_v28 = vadd.f32 %v494_v2, %v484_v49  ;;  %v366_v2 = vmul.f32 %v365_v18, %v3263_v30  ;;  %v899_v30 = vmul.f32 %v898_v9, %v3212_v13  ;;  %v963_v9 = vstv %s3436_s13  ;;  %s1181_s13 = sadd.s32 70, %s2734_s3 }
 0x2e0   : > { %s1182_s10 = sld [smem:[#allocation8 + %s1181_s13]] }
 0x2e1   : > { %v534_v58 = vadd.f32 %v532_v46, %v499_v28  ;;  %v368_v38 = vadd.f32 %v366_v2, %v347_v55  ;;  %v518_v55 = vmul.f32 %v517_v14, %v3017_v15  ;;  %v744_v15 = vstv %s3440_s1  ;;  %s4240_s1 = smov 16  }
 0x2e2   : > { %990 = vrot.lane.b32.xlu0 %v986_v50, %s2550_s8  ;;  %v1166_v50 = vpop.permute.xlu2 %1165 }
 0x2e3   : > { %v549_v56 = vadd.f32 %v2893_v5, %v534_v58  ;;  %v383_v28 = vadd.f32 %v2860_v48, %v368_v38  ;;  %v1167_v13 = vsel %vm350_vm3, %v1166_v50, %v3228_v43  ;;  %v796_v38 = vstv %s3455_s15  ;;  %s1197_s15 = sld [smem:[#allocation8 + %s1196_s17]] }
 0x2e6   : > { %v589_v19 = vpop.permute.xlu1 %588 }
 0x2e7   : > { %v594_v25 = vadd.f32 %v589_v19, %v549_v56 }
 0x2e9   : > { %v645_v0 = vadd.f32 %v643_v57, %v594_v25 }
 0x2ea   : > { %1007 = vrot.lane.b32.xlu0 %v1002_v23, %s4229_s23 }
 0x2eb   : > { %v660_v53 = vadd.f32 %v2902_v17, %v645_v0  ;;  %v3448_v17 = vpop.permute.xlu2 %1367 }
 0x2ee   : > { %v606_v49 = vpop.permute.xlu1 %605 }
 0x2f4   : > { %v942_v52 = vpop.permute.xlu0 %941 }
 0x2f5   : > { %v3434_v5 = vsel %vm350_vm3, %v942_v52, %v3089_v24  ;;  %v4234_v52 = vstv %s3188_s25  ;;  %s954_s25 = sadd.s32 39, %s2734_s3 }
 0x2f6   : > { %v1016_v1 = vmul.f32 %v1015_v47, %v3434_v5  ;;  %v670_v46 = vpop.permute.xlu1 %669  ;;  %v964_v56 = vmul.f32 %v963_v9, %v3434_v5  ;;  %s3492_s7 = sld [smem:[#allocation8 + %s954_s25]] }
 0x2f7   : > { %v675_v24 = vadd.f32 %v670_v46, %v660_v53  ;;  %v3477_v46 = vpop.permute.xlu2 %1597 }
 0x2f8   : > { %1020 = vrot.lane.b32.xlu1 %v1016_v1, %s2550_s8  ;;  %v526_v1 = vmul.f32 %v4234_v52, %v2995_v29  ;;  %v4236_v52 = vld [vmem:[#allocation28_spill] sm:$0xff] }
 0x2f9   : > { %v901_v18 = vadd.f32 %v899_v30, %v675_v24  ;;  %v693_v30 = vstv %s3460_s12  ;;  %s1233_s12 = sadd.s32 73, %s2734_s3 }
 0x2fa   : > { %v695_v24 = vmul.f32 %v693_v30, %v3270_v45  ;;  %s1234_s16 = sld [smem:[#allocation8 + %s1233_s12]] }
 0x2fb   : > { %v916_v58 = vadd.f32 %v911_v35, %v901_v18  ;;  %v745_v35 = vmul.f32 %v744_v15, %v3141_v11 }
 0x2fc   : > { %v393_v47 = vpop.permute.xlu0 %392 }
 0x2fd   : > { %v398_v23 = vadd.f32 %v393_v47, %v383_v28  ;;  %v931_v48 = vadd.f32 %v926_v12, %v916_v58  ;;  %v435_v12 = vadd.f32 %v2867_v54, %v2963_v61  ;;  %v797_v54 = vmul.f32 %v796_v38, %v3296_v32 }
 0x2fe   : > { %v723_v57 = vpop.permute.xlu1 %722  ;;  %v564_v28 = vadd.f32 %v2927_v36, %v3205_v42  ;;  %v694_v58 = vmul.f32 %v693_v30, %v3333_v37  ;;  %v847_v36 = vstv %s3483_s18  ;;  %s1430_s18 = sadd.s32 76, %s2734_s3 }
 0x2ff   : > { %v520_v19 = vadd.f32 %v518_v55, %v398_v23  ;;  %v3464_v14 = vadd.f32 %v964_v56, %v931_v48  ;;  %v1006_v42 = vpop.permute.xlu2 %1005  ;;  %v849_v48 = vmul.f32 %v847_v36, %v3318_v6  ;;  %s3619_s25 = sld [smem:[#allocation8 + %s1430_s18]] }
 0x300   : > { %1170 = vrot.lane.b32.xlu1 %v1167_v13, %s4233_s14 }
 0x301   : > { %v579_v25 = vadd.f32 %v2891_v4, %v520_v19 }
 0x303   : > { %v624_v0 = vadd.f32 %v3257_v59, %v579_v25 }
 0x304   : > { %v446_v50 = vpop.permute.xlu0 %445 }
 0x305   : > { %v747_v2 = vadd.f32 %v745_v35, %v624_v0  ;;  %v450_v53 = vadd.f32 %v446_v50, %v435_v12  ;;  %v956_v50 = vstv %s3492_s7  ;;  %s1475_s7 = sadd.s32 77, %s2734_s3 }
 0x306   : > { %v824_v11 = vpop.permute.xlu1 %823  ;;  %s3636_s11 = sld [smem:[#allocation8 + %s1475_s7]]  ;;  %s1379_s7 = sadd.s32 75, %s2734_s3 }
 0x307   : > { %v528_v4 = vadd.f32 %v526_v1, %v450_v53  ;;  %v762_v59 = vadd.f32 %v2970_v7, %v747_v2  ;;  %v3508_v53 = vld [vmem:[#allocation2 + $0x1d] sm:$0xff] }
 0x308   : > { %1111 = vrot.lane.b32.xlu1 %v3508_v53, %s4233_s14 }
 0x309   : > { %v565_v61 = vadd.f32 %v2898_v10, %v528_v4  ;;  %v777_v29 = vadd.f32 %v3405_v34, %v762_v59  ;;  %v949_v34 = vstv %s3479_s30  ;;  %s1249_s30 = sld [smem:[#allocation8 + %s1248_s28]] }
 0x30b   : > { %v610_v18 = vadd.f32 %v606_v49, %v565_v61  ;;  %v799_v47 = vadd.f32 %v797_v54, %v777_v29  ;;  %v950_v49 = vmul.f32 %v949_v34, %v3434_v5  ;;  %v848_v54 = vmul.f32 %v847_v36, %v3360_v40 }
 0x30c   : > { %v604_v7 = vpop.permute.xlu0 %603  ;;  %v957_v36 = vmul.f32 %v956_v50, %v3434_v5 }
 0x30d   : > { %v697_v55 = vadd.f32 %v695_v24, %v610_v18  ;;  %v609_v32 = vadd.f32 %v604_v7, %v564_v28  ;;  %v814_v10 = vadd.f32 %v3062_v16, %v799_v47  ;;  %v4235_v16 = vld [vmem:[#allocation26_spill] sm:$0xff]  ;;  %v4238_v28 = vld [vmem:[#allocation25_spill] sm:$0xff] }
 0x30e   : > { %v877_v56 = vpop.permute.xlu1 %876  ;;  %v580_v0 = vadd.f32 %v4235_v16, %v3410_v62 }
 0x30f   : > { %v712_v23 = vadd.f32 %v2907_v20, %v697_v55  ;;  %v696_v45 = vadd.f32 %v694_v58, %v609_v32  ;;  %v829_v13 = vadd.f32 %v824_v11, %v814_v10  ;;  %v746_v20 = vmul.f32 %v744_v15, %v3345_v39  ;;  %v4237_v39 = vld [vmem:[#allocation24_spill] sm:$0xff] }
 0x310   : > { %v958_v11 = vmul.f32 %v956_v50, %v3394_v22  ;;  %v798_v58 = vmul.f32 %v796_v38, %v3152_v51  ;;  %v1369_v32 = vsel %vm350_vm3, %v3448_v17, %v3274_v26  ;;  %v3532_v17 = vld [vmem:[#allocation2 + $0x39] sm:$0xff] }
 0x311   : > { %v727_v19 = vadd.f32 %v723_v57, %v712_v23  ;;  %v952_v25 = vadd.f32 %v950_v49, %v829_v13  ;;  %v711_v15 = vadd.f32 %v4237_v39, %v696_v45  ;;  %v4239_v23 = vld [vmem:[#allocation27_spill] sm:$0xff] }
 0x313   : > { %v851_v37 = vadd.f32 %v849_v48, %v727_v19  ;;  %v3501_v35 = vadd.f32 %v1006_v42, %v952_v25 }
 0x314   : > { %v621_v12 = vpop.permute.xlu0 %620 }
 0x315   : > { %v625_v2 = vadd.f32 %v621_v12, %v580_v0  ;;  %v866_v1 = vadd.f32 %v4236_v52, %v851_v37  ;;  %v3545_v37 = vld [vmem:[#allocation2 + $0x35] sm:$0xff]  ;;  %v1045_v12 = vstv %s3539_s2  ;;  %s1174_s2 = sadd.s32 69, %s2734_s3 }
 0x316   : > { %v1163_v4 = vpop.permute.xlu1 %1162  ;;  %s1175_s13 = sld [smem:[#allocation8 + %s1174_s2]]  ;;  %s1145_s2 = sadd.s32 44, %s2734_s3 }
 0x317   : > { %v748_v6 = vadd.f32 %v746_v20, %v625_v2  ;;  %v881_v57 = vadd.f32 %v877_v56, %v866_v1  ;;  %v1164_v62 = vsel %vm350_vm3, %v1163_v4, %v3328_v31  ;;  %v951_v56 = vmul.f32 %v949_v34, %v3394_v22 }
 0x318   : > { %1168 = vrot.lane.b32.xlu0 %v1164_v62, %s4233_s14  ;;  %v965_v34 = vmul.f32 %v963_v9, %v3394_v22  ;;  %v1047_v20 = vmul.f32 %v1045_v12, %v3394_v22  ;;  %v3557_v9 = vld [vmem:[#allocation2 + $0x25] sm:$0xff]  ;;  %v3574_v62 = vld [vmem:[#allocation2 + $0x3d] sm:$0xff] }
 0x319   : > { %v960_v59 = vadd.f32 %v958_v11, %v881_v57  ;;  %v763_v47 = vadd.f32 %v4238_v28, %v748_v6  ;;  %v3564_v6 = vld [vmem:[#allocation2 + $0x31] sm:$0xff]  ;;  %v1198_v28 = vstv %s1197_s15  ;;  %s1628_s15 = sadd.s32 80, %s2734_s3 }
 0x31a   : > { %s1629_s12 = sld [smem:[#allocation8 + %s1628_s15]]  ;;  %s1606_s15 = sadd.s32 78, %s2734_s3 }
 0x31c   : > { %v721_v30 = vpop.permute.xlu0 %720 }
 0x31d   : > { %v726_v61 = vadd.f32 %v721_v30, %v711_v15  ;;  %v1183_v30 = vstv %s1182_s10  ;;  %s1613_s10 = sadd.s32 79, %s2734_s3 }
 0x31e   : > { %v1218_v24 = vpop.permute.xlu1 %1217  ;;  %s3661_s17 = sld [smem:[#allocation8 + %s1613_s10]]  ;;  %s1284_s10 = sadd.s32 46, %s2734_s3 }
 0x31f   : > { %v850_v29 = vadd.f32 %v848_v54, %v726_v61  ;;  %v1219_v18 = vsel %vm350_vm3, %v1218_v24, %v3339_v8  ;;  %v1184_v54 = vmul.f32 %v1183_v30, %v3328_v31  ;;  %v1046_v61 = vmul.f32 %v1045_v12, %v3434_v5 }
 0x320   : > { %1222 = vrot.lane.b32.xlu0 %v1219_v18, %s4233_s14  ;;  %v1185_v24 = vmul.f32 %v1183_v30, %v3228_v43  ;;  %v1477_v12 = vstv %s3636_s11  ;;  %s1380_s11 = sld [smem:[#allocation8 + %s1379_s7]] }
 0x321   : > { %v865_v13 = vadd.f32 %v3191_v60, %v850_v29 }
 0x324   : > { %v774_v7 = vpop.permute.xlu0 %773 }
 0x325   : > { %v778_v55 = vadd.f32 %v774_v7, %v763_v47 }
 0x326   : > { %v1595_v40 = vpop.permute.xlu1 %1594 }
 0x327   : > { %v800_v10 = vadd.f32 %v798_v58, %v778_v55  ;;  %v1596_v57 = vsel %vm350_vm3, %v1595_v40, %v3355_v21  ;;  %v1235_v55 = vstv %s1234_s16  ;;  %s1028_s16 = sadd.s32 41, %s2734_s3 }
 0x328   : > { %1373 = vrot.lane.b32.xlu0 %v1369_v32, %s4233_s14  ;;  %s1029_s28 = sld [smem:[#allocation8 + %s1028_s16]]  ;;  %s1299_s16 = sadd.s32 47, %s2734_s3 }
 0x329   : > { %v815_v45 = vadd.f32 %v4239_v23, %v800_v10  ;;  %v1237_v23 = vmul.f32 %v1235_v55, %v3339_v8 }
 0x32b   : > { %v830_v49 = vadd.f32 %v3418_v44, %v815_v45 }
 0x32c   : > { %v875_v51 = vpop.permute.xlu0 %874 }
 0x32d   : > { %v880_v38 = vadd.f32 %v875_v51, %v865_v13  ;;  %v953_v42 = vadd.f32 %v951_v56, %v830_v49  ;;  %v3621_v51 = vld [vmem:[#allocation2 + $0x1c] sm:$0xff] }
 0x32e   : > { %v993_v48 = vpop.permute.xlu1 %992 }
 0x32f   : > { %v959_v19 = vadd.f32 %v957_v36, %v880_v38  ;;  %v3534_v25 = vadd.f32 %v993_v48, %v960_v59  ;;  %v1599_v59 = vsel %vm350_vm3, %v3477_v46, %v3300_v27  ;;  %v981_v46 = vadd.f32 %v3186_v41, %v3464_v14 }
 0x330   : > { %1268 = vrot.lane.b32.xlu0 %v3532_v17, %s4233_s14  ;;  %v1236_v41 = vmul.f32 %v1235_v55, %v3390_v63  ;;  %v1432_v36 = vstv %s3619_s25  ;;  %v1630_v55 = vstv %s1629_s12  ;;  %s1226_s25 = sadd.s32 72, %s2734_s3  ;;  %s3749_s12 = sld [smem:[#allocation8 + %s1606_s15]] }
 0x331   : > { %s1079_s15 = sadd.s32 16, %s2734_s3 }
 0x334   : > { %v928_v60 = vpop.permute.xlu0 %927 }
 0x335   : > { %v932_v44 = vadd.f32 %v928_v60, %v3298_v33  ;;  %v1434_v60 = vmul.f32 %v1432_v36, %v3403_v3 }
 0x337   : > { %v967_v16 = vadd.f32 %v965_v34, %v932_v44  ;;  %v3641_v34 = vld [vmem:[#allocation2 + $0x24] sm:$0xff] }
 0x338   : > { %1543 = vrot.lane.b32.xlu0 %v3545_v37, %s4233_s14 }
 0x33c   : > { %v978_v0 = vpop.permute.xlu0 %977 }
 0x33d   : > { %v3550_v50 = vadd.f32 %v978_v0, %v967_v16 }
 0x340   : > { %1052 = vrot.lane.b32.xlu0 %v1047_v20, %s4240_s1  ;;  %v3653_v20 = vld [vmem:[#allocation2 + $0x32] sm:$0xff] }
 0x344   : > { %v1215_v2 = vpop.permute.xlu0 %1214 }
 0x345   : > { %v1216_v33 = vsel %vm350_vm3, %v1215_v2, %v3390_v63 }
 0x346   : > { %1220 = vrot.lane.b32.xlu2 %v1216_v33, %s4233_s14 }
 0x34c   : > { %v1371_v52 = vpop.permute.xlu0 %1370 }
 0x34d   : > { %v1372_v1 = vsel %vm350_vm3, %v1371_v52, %v3403_v3  ;;  %v1433_v52 = vmul.f32 %v1432_v36, %v3274_v26 }
 0x34e   : > { %1114 = vrot.lane.b32.xlu2 %v3557_v9, %s4233_s14  ;;  %1375 = vrot.lane.b32.xlu1 %v1372_v1, %s4233_s14  ;;  %v1176_v1 = vstv %s1175_s13  ;;  %s3737_s13 = sld [smem:[#allocation8 + %s1145_s2]]  ;;  %s1562_s2 = sadd.s32 52, %s2734_s3 }
 0x354   : > { %v991_v4 = vpop.permute.xlu0 %990 }
 0x355   : > { %v3569_v11 = vadd.f32 %v991_v4, %v959_v19 }
 0x356   : > { %1265 = vrot.lane.b32.xlu2 %v3564_v6, %s4233_s14  ;;  %1600 = vrot.lane.b32.xlu1 %v1596_v57, %s4233_s14 }
 0x35c   : > { %v1008_v39 = vpop.permute.xlu0 %1007 }
 0x35d   : > { %v3579_v15 = vadd.f32 %v1008_v39, %v953_v42 }
 0x35e   : > { %1546 = vrot.lane.b32.xlu1 %v3574_v62, %s4233_s14  ;;  %1602 = vrot.lane.b32.xlu2 %v1599_v59, %s4233_s14 }
 0x366   : > { %1188 = vrot.lane.b32.xlu1 %v1184_v54, %s4229_s23  ;;  %1050 = vrot.lane.b32.xlu2 %v1046_v61, %s4240_s1  ;;  %v3667_v54 = vld [vmem:[#allocation2 + $0x3a] sm:$0xff] }
 0x36a   : > { %v1021_v29 = vpop.permute.xlu1 %1020 }
 0x36b   : > { %v3593_v18 = vadd.f32 %v1021_v29, %v981_v46  ;;  %v1615_v46 = vstv %s3661_s17  ;;  %s1285_s17 = sld [smem:[#allocation8 + %s1284_s10]]  ;;  %s1577_s10 = sadd.s32 53, %s2734_s3 }
 0x36c   : > { %v1616_v29 = vmul.f32 %v1615_v46, %v3355_v21 }
 0x36e   : > { %1190 = vrot.lane.b32.xlu2 %v1185_v24, %s4229_s23 }
 0x372   : > { %v1171_v47 = vpop.permute.xlu1 %1170 }
 0x373   : > { %v1173_v7 = vsel %vm350_vm3, %v1171_v47, %v3228_v43  ;;  %v1250_v43 = vstv %s1249_s30  ;;  %s1130_s30 = sadd.s32 43, %s2734_s3 }
 0x374   : > { %v1200_v58 = vmul.f32 %v1198_v28, %v1173_v7  ;;  %v1178_v4 = vmul.f32 %v1176_v1, %v1173_v7  ;;  %s3707_s18 = sld [smem:[#allocation8 + %s1130_s30]]  ;;  %s1415_s30 = sadd.s32 49, %s2734_s3 }
 0x376   : > { %1205 = vrot.lane.b32.xlu1 %v1200_v58, %s4240_s1  ;;  %1240 = vrot.lane.b32.xlu2 %v1236_v41, %s4229_s23 }
 0x37a   : > { %v1112_v49 = vpop.permute.xlu1 %1111 }
 0x38a   : > { %v1169_v14 = vpop.permute.xlu0 %1168 }
 0x38b   : > { %v3604_v32 = vsel %vm350_vm3, %v1169_v14, %v3328_v31  ;;  %v3617_v31 = vpop.permute.xlu2 %1022 }
 0x38c   : > { %v1199_v10 = vmul.f32 %v1198_v28, %v3604_v32 }
 0x38e   : > { %1203 = vrot.lane.b32.xlu0 %v1199_v10, %s4240_s1 }
 0x392   : > { %v1223_v40 = vpop.permute.xlu0 %1222 }
 0x393   : > { %v3611_v45 = vsel %vm350_vm3, %v1223_v40, %v3339_v8  ;;  %v1113_v8 = vsel %vm350_vm3, %v1112_v49, %v3508_v53 }
 0x394   : > { %v1252_v13 = vmul.f32 %v1250_v43, %v3611_v45 }
 0x396   : > { %1242 = vrot.lane.b32.xlu0 %v1237_v23, %s4229_s23  ;;  %1257 = vrot.lane.b32.xlu2 %v1252_v13, %s4240_s1 }
 0x39a   : > { %v1374_v56 = vpop.permute.xlu0 %1373 }
 0x39b   : > { %v3648_v16 = vsel %vm350_vm3, %v1374_v56, %v3274_v26 }
 0x39c   : > { %v1478_v2 = vmul.f32 %v1477_v12, %v3648_v16 }
 0x39e   : > { %1060 = vrot.lane.b32.xlu0 %v3621_v51, %s4233_s14  ;;  %1117 = vrot.lane.b32.xlu2 %v1113_v8, %s4233_s14  ;;  %v3704_v8 = vld [vmem:[#allocation2 + $0x3c] sm:$0xff] }
 0x3a0   : > { %v1221_v38 = vpop.permute.xlu2 %1220 }
 0x3a1   : > { %v3632_v42 = vsel %vm350_vm3, %v1221_v38, %v3390_v63  ;;  %v1030_v38 = vstv %s1029_s28  ;;  %s3759_s28 = sld [smem:[#allocation8 + %s1299_s16]]  ;;  %s1335_s16 = sadd.s32 19, %s2734_s3 }
 0x3a2   : > { %v1251_v48 = vmul.f32 %v1250_v43, %v3632_v42  ;;  %v1269_v19 = vpop.permute.xlu0 %1268 }
 0x3a3   : > { %v1270_v39 = vsel %vm350_vm3, %v1269_v19, %v3532_v17 }
 0x3a4   : > { %1255 = vrot.lane.b32.xlu1 %v1251_v48, %s4240_s1  ;;  %v1032_v48 = vmul.f32 %v1030_v38, %v3394_v22 }
 0x3a6   : > { %1439 = vrot.lane.b32.xlu2 %v1434_v60, %s4229_s23  ;;  %v1031_v60 = vmul.f32 %v1030_v38, %v3434_v5 }
 0x3a8   : > { %v1115_v44 = vpop.permute.xlu2 %1114 }
 0x3a9   : > { %v1116_v63 = vsel %vm350_vm3, %v1115_v44, %v3557_v9  ;;  %v1132_v44 = vstv %s3707_s18  ;;  %s3766_s18 = sld [smem:[#allocation8 + %s1415_s30]] }
 0x3aa   : > { %1119 = vrot.lane.b32.xlu0 %v1116_v63, %s4233_s14  ;;  %v1544_v0 = vpop.permute.xlu0 %1543  ;;  %v1133_v63 = vmul.f32 %v1132_v44, %v3508_v53 }
 0x3ab   : > { %v1545_v49 = vsel %vm350_vm3, %v1544_v0, %v3545_v37 }
 0x3ac   : > { %1063 = vrot.lane.b32.xlu1 %v3641_v34, %s4233_s14 }
 0x3ae   : > { %1316 = vrot.lane.b32.xlu2 %v3653_v20, %s4233_s14 }
 0x3b0   : > { %v1266_v33 = vpop.permute.xlu2 %1265 }
 0x3b1   : > { %v1267_v23 = vsel %vm350_vm3, %v1266_v33, %v3564_v6 }
 0x3b2   : > { %1482 = vrot.lane.b32.xlu0 %v1478_v2, %s4240_s1  ;;  %v1053_v57 = vpop.permute.xlu0 %1052 }
 0x3b3   : > { %v1057_v59 = vadd.f32 %v1053_v57, %v3579_v15  ;;  %v1177_v15 = vmul.f32 %v1176_v1, %v3604_v32 }
 0x3b4   : > { %1437 = vrot.lane.b32.xlu1 %v1433_v52, %s4229_s23 }
 0x3b5   : > { %v1180_v30 = vadd.f32 %v1178_v4, %v1057_v59 }
 0x3b6   : > { %1273 = vrot.lane.b32.xlu2 %v1270_v39, %s4233_s14 }
 0x3b8   : > { %v1603_v61 = vpop.permute.xlu2 %1602 }
 0x3b9   : > { %v3685_v41 = vsel %vm350_vm3, %v1603_v61, %v3300_v27 }
 0x3ba   : > { %1319 = vrot.lane.b32.xlu0 %v3667_v54, %s4233_s14  ;;  %v1632_v32 = vmul.f32 %v1630_v55, %v3685_v41 }
 0x3c0   : > { %v1376_v24 = vpop.permute.xlu1 %1375  ;;  %v1051_v28 = vpop.permute.xlu2 %1050 }
 0x3c1   : > { %v3678_v47 = vsel %vm350_vm3, %v1376_v24, %v3403_v3  ;;  %v1056_v7 = vadd.f32 %v1051_v28, %v3501_v35  ;;  %v1381_v24 = vstv %s1380_s11 }
 0x3c2   : > { %v1479_v58 = vmul.f32 %v1477_v12, %v3678_v47  ;;  %1620 = vrot.lane.b32.xlu0 %v1616_v29, %s4229_s23 }
 0x3c3   : > { %v1179_v14 = vadd.f32 %v1177_v15, %v1056_v7  ;;  %v1383_v15 = vmul.f32 %v1381_v24, %v3678_v47 }
 0x3c4   : > { %1484 = vrot.lane.b32.xlu1 %v1479_v58, %s4240_s1 }
 0x3c8   : > { %v1601_v10 = vpop.permute.xlu1 %1600  ;;  %v1191_v43 = vpop.permute.xlu2 %1190 }
 0x3c9   : > { %v3691_v35 = vsel %vm350_vm3, %v1601_v10, %v3355_v21  ;;  %v1195_v40 = vadd.f32 %v1191_v43, %v1180_v30  ;;  %v1617_v21 = vmul.f32 %v1615_v46, %v3300_v27  ;;  %v3713_v27 = vld [vmem:[#allocation2 + $0x34] sm:$0xff]  ;;  %v1134_v43 = vmul.f32 %v1132_v44, %v3557_v9 }
 0x3ca   : > { %v1631_v13 = vmul.f32 %v1630_v55, %v3691_v35  ;;  %1637 = vrot.lane.b32.xlu0 %v1632_v32, %s4240_s1 }
 0x3cc   : > { %1635 = vrot.lane.b32.xlu2 %v1631_v13, %s4240_s1  ;;  %1271 = vrot.lane.b32.xlu1 %v1267_v23, %s4233_s14  ;;  %s4241_s1 = smov 18  }
 0x3d0   : > { %v1547_v56 = vpop.permute.xlu1 %1546  ;;  %v1241_v33 = vpop.permute.xlu2 %1240 }
 0x3d1   : > { %v1548_v22 = vsel %vm350_vm3, %v1547_v56, %v3574_v62  ;;  %v1147_v56 = vstv %s3737_s13  ;;  %s3792_s13 = sld [smem:[#allocation8 + %s1562_s2]]  ;;  %s1400_s2 = sadd.s32 22, %s2734_s3 }
 0x3d2   : > { %1549 = vrot.lane.b32.xlu0 %v1545_v49, %s4233_s14 }
 0x3d4   : > { %1495 = vrot.lane.b32.xlu2 %v3704_v8, %s4233_s14  ;;  %1622 = vrot.lane.b32.xlu1 %v1617_v21, %s4229_s23  ;;  %s1227_s23 = sld [smem:[#allocation8 + %s1226_s25]]  ;;  %s1460_s25 = sadd.s32 50, %s2734_s3 }
 0x3d5   : > { %s1461_s7 = sld [smem:[#allocation8 + %s1460_s25]]  ;;  %s1277_s25 = sadd.s32 45, %s2734_s3 }
 0x3d8   : > { %v1189_v36 = vpop.permute.xlu1 %1188 }
 0x3d9   : > { %v1194_v19 = vadd.f32 %v1189_v36, %v1179_v14 }
 0x3da   : > { %1037 = vrot.lane.b32.xlu0 %v1032_v48, %s4241_s1  ;;  %v1228_v5 = vstv %s1227_s23  ;;  %s1123_s23 = sadd.s32 42, %s2734_s3 }
 0x3db   : > { %v1230_v12 = vmul.f32 %v1228_v5, %v3611_v45  ;;  %v1229_v59 = vmul.f32 %v1228_v5, %v3632_v42  ;;  %s3783_s11 = sld [smem:[#allocation8 + %s1123_s23]] }
 0x3dc   : > { %1035 = vrot.lane.b32.xlu2 %v1031_v60, %s4241_s1  ;;  %1492 = vrot.lane.b32.xlu1 %v3713_v27, %s4233_s14  ;;  %s3887_s23 = sld [smem:[#allocation8 + %s1277_s25]]  ;;  %s2555_s25 = smov 1  }
 0x3e2   : > { %1137 = vrot.lane.b32.xlu0 %v1133_v63, %s2550_s8 }
 0x3e4   : > { %1551 = vrot.lane.b32.xlu1 %v1548_v22, %s4233_s14  ;;  %v1608_v22 = vstv %s3749_s12  ;;  %s3818_s12 = sld [smem:[#allocation8 + %s1079_s15]]  ;;  %s1511_s15 = sadd.s32 25, %s2734_s3 }
 0x3e8   : > { %v1206_v0 = vpop.permute.xlu1 %1205 }
 0x3e9   : > { %v1210_v2 = vadd.f32 %v1206_v0, %v1195_v40  ;;  %v1382_v40 = vmul.f32 %v1381_v24, %v3648_v16  ;;  %v1462_v24 = vstv %s1461_s7  ;;  %s1350_s7 = sadd.s32 20, %s2734_s3 }
 0x3eb   : > { %v1232_v52 = vadd.f32 %v1230_v12, %v1210_v2 }
 0x3f0   : > { %v1258_v1 = vpop.permute.xlu2 %1257 }
 0x3f8   : > { %v1118_v57 = vpop.permute.xlu2 %1117 }
 0x3f9   : > { %v1121_v60 = vsel %vm350_vm3, %v1118_v57, %v3508_v53  ;;  %v1609_v53 = vmul.f32 %v1608_v22, %v3691_v35 }
 0x3fa   : > { %v1148_v5 = vmul.f32 %v1147_v56, %v1121_v60 }
 0x400   : > { %v1204_v4 = vpop.permute.xlu0 %1203  ;;  %v1440_v46 = vpop.permute.xlu2 %1439 }
 0x401   : > { %v1209_v39 = vadd.f32 %v1204_v4, %v1194_v19 }
 0x403   : > { %v1231_v30 = vadd.f32 %v1229_v59, %v1209_v39 }
 0x405   : > { %v1246_v61 = vadd.f32 %v1241_v33, %v1231_v30  ;;  %v1417_v30 = vstv %s3766_s18 }
 0x408   : > { %v1243_v29 = vpop.permute.xlu0 %1242  ;;  %v1317_v14 = vpop.permute.xlu2 %1316 }
 0x409   : > { %v1247_v28 = vadd.f32 %v1243_v29, %v1232_v52  ;;  %v1318_v19 = vsel %vm350_vm3, %v1317_v14, %v3653_v20  ;;  %v1301_v52 = vstv %s3759_s28  ;;  %v1125_v29 = vstv %s3783_s11  ;;  %s1094_s28 = sadd.s32 17, %s2734_s3  ;;  %s3906_s11 = sld [smem:[#allocation8 + %s1350_s7]] }
 0x40a   : > { %v1464_v14 = vmul.f32 %v1462_v24, %v3678_v47  ;;  %s3884_s18 = sld [smem:[#allocation8 + %s1094_s28]]  ;;  %s1526_s28 = sadd.s32 26, %s2734_s3 }
 0x40b   : > { %v1262_v45 = vadd.f32 %v1258_v1, %v1247_v28  ;;  %s1393_s7 = sadd.s32 21, %s2734_s3 }
 0x40d   : > { %v1385_v7 = vadd.f32 %v1383_v15, %v1262_v45  ;;  %v1463_v15 = vmul.f32 %v1462_v24, %v3648_v16 }
 0x40f   : > { %v3731_v58 = vadd.f32 %v1440_v46, %v1385_v7 }
 0x410   : > { %v1061_v55 = vpop.permute.xlu0 %1060  ;;  %v1274_v49 = vpop.permute.xlu2 %1273 }
 0x411   : > { %v1062_v42 = vsel %vm350_vm3, %v1061_v55, %v3621_v51  ;;  %v3776_v1 = vsel %vm350_vm3, %v1274_v49, %v3532_v17 }
 0x412   : > { %1066 = vrot.lane.b32.xlu1 %v1062_v42, %s4233_s14  ;;  %v1303_v59 = vmul.f32 %v1301_v52, %v3776_v1  ;;  %v1126_v42 = vmul.f32 %v1125_v29, %v1121_v60  ;;  %v1419_v60 = vmul.f32 %v1417_v30, %v3403_v3 }
 0x416   : > { %v1256_v32 = vpop.permute.xlu1 %1255 }
 0x417   : > { %v1261_v10 = vadd.f32 %v1256_v32, %v1246_v61  ;;  %v1418_v61 = vmul.f32 %v1417_v30, %v3274_v26  ;;  %v1610_v26 = vmul.f32 %v1608_v22, %v3685_v41 }
 0x419   : > { %v1384_v23 = vadd.f32 %v1382_v40, %v1261_v10  ;;  %v1564_v40 = vstv %s3792_s13  ;;  %s1445_s13 = sadd.s32 23, %s2734_s3 }
 0x41a   : > { %1139 = vrot.lane.b32.xlu1 %v1134_v43, %s2550_s8 }
 0x41c   : > { %v1120_v13 = vpop.permute.xlu0 %1119 }
 0x41d   : > { %v3747_v21 = vsel %vm350_vm3, %v1120_v13, %v3557_v9  ;;  %v1286_v9 = vstv %s1285_s17  ;;  %s3805_s17 = sld [smem:[#allocation8 + %s1577_s10]]  ;;  %v1565_v13 = vmul.f32 %v1564_v40, %v3545_v37 }
 0x41e   : > { %v1064_v38 = vpop.permute.xlu1 %1063  ;;  %v1149_v36 = vmul.f32 %v1147_v56, %v3747_v21  ;;  %v1287_v63 = vmul.f32 %v1286_v9, %v3564_v6  ;;  %v1288_v33 = vmul.f32 %v1286_v9, %v3532_v17  ;;  %s3921_s10 = sld [smem:[#allocation8 + %s1400_s2]]  ;;  %s1504_s2 = sadd.s32 24, %s2734_s3 }
 0x41f   : > { %v1065_v48 = vsel %vm350_vm3, %v1064_v38, %v3641_v34 }
 0x420   : > { %1068 = vrot.lane.b32.xlu2 %v1065_v48, %s4233_s14  ;;  %1154 = vrot.lane.b32.xlu0 %v1149_v36, %s4241_s1 }
 0x422   : > { %1322 = vrot.lane.b32.xlu1 %v1318_v19, %s4233_s14 }
 0x423   : > { %v1579_v38 = vstv %s3805_s17  ;;  %s3928_s17 = sld [smem:[#allocation8 + %s1445_s13]] }
 0x424   : > { %v1483_v44 = vpop.permute.xlu0 %1482  ;;  %s1505_s13 = sld [smem:[#allocation8 + %s1504_s2]] }
 0x426   : > { %v1438_v0 = vpop.permute.xlu1 %1437  ;;  %v1636_v12 = vpop.permute.xlu2 %1635 }
 0x427   : > { %v1443_v2 = vadd.f32 %v1438_v0, %v1384_v23 }
 0x428   : > { %1152 = vrot.lane.b32.xlu2 %v1148_v5, %s4241_s1  ;;  %1291 = vrot.lane.b32.xlu0 %v1287_v63, %s2550_s8  ;;  %v1081_v5 = vstv %s3818_s12  ;;  %s3937_s12 = sld [smem:[#allocation8 + %s1511_s15]]  ;;  %s2558_s15 = smov 107  }
 0x429   : > { %v1488_v57 = vadd.f32 %v1483_v44, %v1443_v2  ;;  %v1127_v2 = vmul.f32 %v1125_v29, %v3747_v21 }
 0x42a   : > { %1293 = vrot.lane.b32.xlu1 %v1288_v33, %s2550_s8 }
 0x42b   : > { %v1611_v4 = vadd.f32 %v1609_v53, %v1488_v57 }
 0x42c   : > { %v1320_v39 = vpop.permute.xlu0 %1319 }
 0x42d   : > { %v1321_v35 = vsel %vm350_vm3, %v1320_v39, %v3667_v54  ;;  %v1566_v39 = vmul.f32 %v1564_v40, %v3574_v62 }
 0x42e   : > { %v1496_v17 = vpop.permute.xlu2 %1495 }
 0x430   : > { %1324 = vrot.lane.b32.xlu2 %v1321_v35, %s4233_s14  ;;  %1308 = vrot.lane.b32.xlu0 %v1303_v59, %s4241_s1 }
 0x432   : > { %1422 = vrot.lane.b32.xlu1 %v1418_v61, %s2550_s8 }
 0x434   : > { %v1621_v46 = vpop.permute.xlu0 %1620 }
 0x435   : > { %v1626_v41 = vadd.f32 %v1621_v46, %v1611_v4 }
 0x436   : > { %v1485_v28 = vpop.permute.xlu1 %1484  ;;  %v1036_v45 = vpop.permute.xlu2 %1035 }
 0x437   : > { %v1489_v7 = vadd.f32 %v1485_v28, %v3731_v58  ;;  %v1041_v55 = vadd.f32 %v1036_v45, %v3569_v11  ;;  %v1497_v11 = vsel %vm350_vm3, %v1496_v17, %v3704_v8  ;;  %v1641_v49 = vadd.f32 %v1636_v12, %v1626_v41 }
 0x438   : > { %1467 = vrot.lane.b32.xlu0 %v1463_v15, %s4241_s1 }
 0x439   : > { %v1612_v32 = vadd.f32 %v1610_v26, %v1489_v7  ;;  %v3802_v10 = vadd.f32 %v1126_v42, %v1041_v55  ;;  %v1657_v36 = vmul.f32 0.01, %v1641_v49  ;;  %vm1655_vm4 = vcmp.ge.f32.partialorder %v1641_v49, 0.0 }
 0x43a   : > { %1469 = vrot.lane.b32.xlu1 %v1464_v14, %s4241_s1 }
 0x43b   : > { %v3829_v63 = vsel %vm1655_vm4, %v1641_v49, %v1657_v36 }
 0x43c   : > { %v1638_v43 = vpop.permute.xlu0 %1637  ;;  %v3835_v0 = vmul.f32 0.70710677, %v3829_v63 }
 0x43e   : > { %v1272_v58 = vpop.permute.xlu1 %1271  ;;  %v3841_v53 = vand.u32 2147483647, %v3835_v0  ;;  %vm1665_vm6 = vcmp.ge.f32.partialorder %v3835_v0, 0.0 }
 0x43f   : > { %v3813_v23 = vsel %vm350_vm3, %v1272_v58, %v3564_v6 }
 0x440   : > { %v1302_v56 = vmul.f32 %v1301_v52, %v3813_v23  ;;  %1500 = vrot.lane.b32.xlu0 %v1497_v11, %s4233_s14  ;;  %v1671_v4 = vmul.f32 0.3275911, %v3841_v53  ;;  %v1096_v11 = vstv %s3884_s18  ;;  %s3975_s18 = sld [smem:[#allocation8 + %s1526_s28]] }
 0x442   : > { %1306 = vrot.lane.b32.xlu2 %v1302_v56, %s4241_s1  ;;  %1569 = vrot.lane.b32.xlu1 %v1565_v13, %s2550_s8  ;;  %v1027_v56 = vadd.f32 %v3617_v31, %v3550_v50 }
 0x444   : > { %v1550_v48 = vpop.permute.xlu0 %1549 }
 0x445   : > { %v3825_v6 = vsel %vm350_vm3, %v1550_v48, %v3545_v37  ;;  %v1083_v37 = vmul.f32 %v1081_v5, %v3641_v34 }
 0x446   : > { %v1623_v19 = vpop.permute.xlu1 %1622  ;;  %v1580_v9 = vmul.f32 %v1579_v38, %v3825_v6 }
 0x447   : > { %v1627_v44 = vadd.f32 %v1623_v19, %v1612_v32 }
 0x448   : > { %1584 = vrot.lane.b32.xlu0 %v1580_v9, %s4241_s1 }
 0x449   : > { %v1642_v22 = vadd.f32 %v1638_v43, %v1627_v44  ;;  %v1279_v44 = vstv %s3887_s23  ;;  %s2556_s23 = smov 109  }
 0x44a   : > { %1424 = vrot.lane.b32.xlu2 %v1419_v60, %s2550_s8 }
 0x44b   : > { %v1658_v59 = vmul.f32 0.01, %v1642_v22  ;;  %vm1656_vm5 = vcmp.ge.f32.partialorder %v1642_v22, 0.0 }
 0x44c   : > { %v1038_v12 = vpop.permute.xlu0 %1037 }
 0x44d   : > { %v1042_v3 = vadd.f32 %v1038_v12, %v3534_v25  ;;  %v1673_v25 = vadd.f32 1.0, %v1671_v4  ;;  %v3857_v17 = vsel %vm1656_vm5, %v1642_v22, %v1658_v59  ;;  %v1280_v12 = vmul.f32 %v1279_v44, %v3813_v23 }
 0x44e   : > { %v1493_v33 = vpop.permute.xlu1 %1492  ;;  %v3864_v61 = vmul.f32 0.70710677, %v3857_v17  ;;  %v1352_v23 = vstv %s3906_s11  ;;  %s1394_s11 = sld [smem:[#allocation8 + %s1393_s7]] }
 0x44f   : > { %v3843_v52 = vadd.f32 %v1127_v2, %v1042_v3  ;;  %v1494_v57 = vsel %vm350_vm3, %v1493_v33, %v3713_v27  ;;  %2289 = vrcp.f32 %v1673_v25  ;;  %s4242_s7 = sld [smem:[#allocation31_spill]] }
 0x450   : > { %1088 = vrot.lane.b32.xlu0 %v1083_v37, %s4232_s29  ;;  %v3868_v29 = vand.u32 2147483647, %v3864_v61  ;;  %vm1666_vm7 = vcmp.ge.f32.partialorder %v3864_v61, 0.0 }
 0x452   : > { %1498 = vrot.lane.b32.xlu2 %v1494_v57, %s4233_s14  ;;  %s3861_s14 = sld [smem:[#allocation8 + %s1335_s16]]  ;;  %v1672_v15 = vmul.f32 0.3275911, %v3868_v29  ;;  %s1386_s16 = sadd.s32 48, %s2734_s3 }
 0x454   : > { %v1674_v7 = vadd.f32 1.0, %v1672_v15  ;;  %v1138_v9 = vpop.permute.xlu0 %1137 }
 0x455   : > { %v2290_v46 = vpop.eup %2289  ;;  %v1143_v50 = vadd.f32 %v1138_v9, %v3802_v10 }
 0x456   : > { %v1552_v21 = vpop.permute.xlu1 %1551  ;;  %v1677_v28 = vmul.f32 %v2290_v46, %v1673_v25  ;;  %2291 = vrcp.f32 %v1674_v7 }
 0x457   : > { %v3853_v30 = vsel %vm350_vm3, %v1552_v21, %v3574_v62  ;;  %v1082_v62 = vmul.f32 %v1081_v5, %v3621_v51 }
 0x458   : > { %v1581_v35 = vmul.f32 %v1579_v38, %v3853_v30  ;;  %v1337_v24 = vstv %s3861_s14  ;;  %v1679_v26 = vsub.f32 2.0, %v1677_v28  ;;  %s3948_s14 = sld [smem:[#allocation8 + %s1386_s16]]  ;;  %s2150_s16 = sshll.u32 %s2529_s22, 2 }
 0x459   : > { %v1338_v45 = vmul.f32 %v1337_v24, %v3653_v20 }
 0x45a   : > { %1571 = vrot.lane.b32.xlu2 %v1566_v39, %s2550_s8  ;;  %1586 = vrot.lane.b32.xlu1 %v1581_v35, %s4241_s1  ;;  %v3877_v55 = vmul.f32 %v2290_v46, %v1679_v26  ;;  %s1072_s1 = sadd.s32 15, %s2734_s3 }
 0x45b   : > { %1342 = vrot.lane.b32.xlu0 %v1338_v45, %s4232_s29  ;;  %s3881_s30 = sld [smem:[#allocation8 + %s1072_s1]]  ;;  %v1339_v45 = vmul.f32 %v1337_v24, %v3667_v54  ;;  %s1555_s1 = sadd.s32 51, %s2734_s3 }
 0x45c   : > { %v1683_v42 = vmul.f32 1.0614054, %v3877_v55  ;;  %v2292_v14 = vpop.eup %2291 }
 0x45d   : > { %v1678_v41 = vmul.f32 %v2292_v14, %v1674_v7 }
 0x45e   : > { %v1685_v32 = vadd.f32 -1.4531521, %v1683_v42 }
 0x45f   : > { %v1680_v58 = vsub.f32 2.0, %v1678_v41 }
 0x460   : > { %v1687_v43 = vmul.f32 %v1685_v32, %v3877_v55 }
 0x461   : > { %v1074_v40 = vstv %s3881_s30  ;;  %v3896_v19 = vmul.f32 %v2292_v14, %v1680_v58  ;;  %v1402_v14 = vstv %s3921_s10  ;;  %v2313_v58 = vld [vmem:[#allocation2 + $0x33] sm:$0xff]  ;;  %s1556_s30 = sld [smem:[#allocation8 + %s1555_s1]]  ;;  %s2557_s10 = smov 108  }
 0x462   : > { %1086 = vrot.lane.b32.xlu2 %v1082_v62, %s4232_s29  ;;  %v1689_v48 = vadd.f32 1.4214138, %v1687_v43  ;;  %v1281_v43 = vmul.f32 %v1279_v44, %v3776_v1 }
 0x463   : > { %v1684_v5 = vmul.f32 1.0614054, %v3896_v19 }
 0x464   : > { %v1691_v22 = vmul.f32 %v1689_v48, %v3877_v55  ;;  %v1513_v48 = vstv %s3937_s12  ;;  %s2149_s12 = sshll.u32 %s2525_s21, 1 }
 0x465   : > { %v1686_v59 = vadd.f32 -1.4531521, %v1684_v5 }
 0x466   : > { %v1693_v2 = vadd.f32 -0.28449672, %v1691_v22  ;;  %v1515_v22 = vmul.f32 %v1513_v48, %v3704_v8 }
 0x468   : > { %v1695_v39 = vmul.f32 %v1693_v2, %v3877_v55 }
 0x46a   : > { %v1697_v28 = vadd.f32 0.2548296, %v1695_v39 }
 0x46c   : > { %v1699_v7 = vmul.f32 %v1697_v28, %v3877_v55 }
 0x47a   : > { %v1069_v13 = vpop.permute.xlu2 %1068 }
 0x47b   : > { %v1071_v49 = vsel %vm350_vm3, %v1069_v13, %v3641_v34  ;;  %v1701_v34 = vsub.f32 0.0, %v3841_v53  ;;  %v1403_v13 = vmul.f32 %v2313_v58, %v1402_v14 }
 0x47c   : > { %v1076_v38 = vmul.f32 %v1074_v40, %v1071_v49  ;;  %v1098_v36 = vmul.f32 %v1096_v11, %v1071_v49 }
 0x47d   : > { %v1703_v3 = vmul.f32 %v1701_v34, %v3841_v53 }
 0x47e   : > { %1103 = vrot.lane.b32.xlu2 %v1098_v36, %s2550_s8  ;;  %v3900_v60 = vadd.f32 %v1076_v38, %v1027_v56 }
 0x47f   : > { %v1705_v25 = vmul.f32 1.442695, %v1703_v3 }
 0x481   : > { %2293 = vpow2.f32 %v1705_v25  ;;  %v1661_v25 = vmul.f32 0.5, %v3829_v63 }
 0x482   : > { %v1153_v31 = vpop.permute.xlu2 %1152 }
 0x483   : > { %v1158_v37 = vadd.f32 %v1153_v31, %v1143_v50  ;;  %v2554_v31 = vmov -1.0  }
 0x484   : > { %v1067_v33 = vpop.permute.xlu1 %1066 }
 0x485   : > { %v1282_v57 = vadd.f32 %v1280_v12, %v1158_v37  ;;  %v1070_v4 = vsel %vm350_vm3, %v1067_v33, %v3621_v51  ;;  %v1688_v51 = vmul.f32 %v1686_v59, %v3896_v19  ;;  %v1388_v12 = vstv %s3948_s14  ;;  %v2314_v33 = vld [vmem:[#allocation2 + $0x3b] sm:$0xff]  ;;  %s1905_s14 = sadd.s32 %s2150_s16, %s2149_s12  ;;  %s2395_s12 = scalar_lea.hbm %s4172_s4, 64 }
 0x486   : > { %v1075_v10 = vmul.f32 %v1074_v40, %v1070_v4  ;;  %v1097_v21 = vmul.f32 %v1096_v11, %v1070_v4  ;;  %v1447_v40 = vstv %s3928_s17  ;;  %v1389_v3 = vmul.f32 %v1388_v12, %v3648_v16  ;;  %s4070_s1 = sshll.u32 %s1905_s14, 3 }
 0x487   : > { %v1690_v15 = vadd.f32 1.4214138, %v1688_v51  ;;  %v2294_v41 = vpop.eup %2293  ;;  %v1404_v4 = vmul.f32 %v2314_v33, %v1402_v14 }
 0x488   : > { %1101 = vrot.lane.b32.xlu1 %v1097_v21, %s2550_s8  ;;  %v3919_v53 = vadd.f32 %v1075_v10, %v3593_v18  ;;  %v1709_v55 = vmul.f32 %v2294_v41, %v1699_v7  ;;  %v1514_v7 = vmul.f32 %v1513_v48, %v3713_v27 }
 0x489   : > { %v1692_v32 = vmul.f32 %v1690_v15, %v3896_v19 }
 0x48a   : > { %v1325_v35 = vpop.permute.xlu2 %1324  ;;  %v1711_v9 = vsub.f32 1.0, %v1709_v55 }
 0x48b   : > { %v3926_v62 = vsel %vm350_vm3, %v1325_v35, %v3667_v54  ;;  %v1702_v54 = vsub.f32 0.0, %v3868_v29  ;;  %v1694_v1 = vadd.f32 -0.28449672, %v1692_v32 }
 0x48c   : > { %v1354_v46 = vmul.f32 %v1352_v23, %v3926_v62  ;;  %v1140_v18 = vpop.permute.xlu1 %1139 }
 0x48d   : > { %v1144_v26 = vadd.f32 %v1140_v18, %v3843_v52  ;;  %v1448_v52 = vmul.f32 %v1447_v40, %v3648_v16  ;;  %v1704_v38 = vmul.f32 %v1702_v54, %v3868_v29  ;;  %v1667_v29 = vsel %vm1665_vm6, 1.0, %v2554_v31 }
 0x48e   : > { %1359 = vrot.lane.b32.xlu0 %v1354_v46, %s2550_s8  ;;  %v1713_v0 = vmul.f32 %v1711_v9, %v1667_v29  ;;  %v1390_v46 = vmul.f32 %v1388_v12, %v3678_v47  ;;  %v1528_v54 = vstv %s3975_s18  ;;  %s1926_s18 = scalar_lea.hbm %s4172_s4, %s4070_s1 }
 0x48f   : > { %v1707_v34 = vmul.f32 1.442695, %v1704_v38 }
 0x490   : > { %1344 = vrot.lane.b32.xlu1 %v1339_v45, %s4232_s29  ;;  %v1715_v39 = vadd.f32 1.0, %v1713_v0 }
 0x491   : > { %2295 = vpow2.f32 %v1707_v34 }
 0x492   : > { %v1155_v42 = vpop.permute.xlu0 %1154  ;;  %v1717_v18 = vmul.f32 %v1715_v39, %v1661_v25 }
 0x493   : > { %v1159_v24 = vadd.f32 %v1155_v42, %v1144_v26 }
 0x494   : > { %v1323_v11 = vpop.permute.xlu1 %1322 }
 0x495   : > { %v1283_v49 = vadd.f32 %v1281_v43, %v1159_v24  ;;  %v3953_v56 = vsel %vm350_vm3, %v1323_v11, %v3653_v20  ;;  %v1696_v20 = vmul.f32 %v1694_v1, %v3896_v19  ;;  %v1668_v11 = vsel %vm1666_vm7, 1.0, %v2554_v31 }
 0x496   : > { %1452 = vrot.lane.b32.xlu0 %v1448_v52, %s2550_s8  ;;  %v1353_v36 = vmul.f32 %v1352_v23, %v3953_v56 }
 0x497   : > { %v1698_v59 = vadd.f32 0.2548296, %v1696_v20  ;;  %v2296_v45 = vpop.eup %2295 }
 0x498   : > { %1407 = vrot.lane.b32.xlu1 %v1403_v13, %s4232_s29  ;;  %1357 = vrot.lane.b32.xlu2 %v1353_v36, %s2550_s8 }
 0x499   : > { %v1700_v35 = vmul.f32 %v1698_v59, %v3896_v19  ;;  %v1557_v19 = vstv %s1556_s30 }
 0x49a   : > { %v1292_v44 = vpop.permute.xlu0 %1291  ;;  %v1558_v41 = vmul.f32 %v1557_v19, %v3825_v6  ;;  %v1559_v13 = vmul.f32 %v1557_v19, %v3853_v30 }
 0x49b   : > { %v1297_v50 = vadd.f32 %v1292_v44, %v1282_v57  ;;  %v1449_v57 = vmul.f32 %v1447_v40, %v3678_v47  ;;  %v1710_v63 = vmul.f32 %v2296_v45, %v1700_v35 }
 0x49c   : > { %v1307_v5 = vpop.permute.xlu2 %1306  ;;  %v1294_v2 = vpop.permute.xlu1 %1293 }
 0x49d   : > { %v1312_v37 = vadd.f32 %v1307_v5, %v1297_v50  ;;  %v1298_v10 = vadd.f32 %v1294_v2, %v1283_v49  ;;  %v1712_v32 = vsub.f32 1.0, %v1710_v63 }
 0x49e   : > { %1520 = vrot.lane.b32.xlu0 %v1515_v22, %s4232_s29 }
 0x49f   : > { %v1391_v21 = vadd.f32 %v1389_v3, %v1312_v37  ;;  %v1714_v1 = vmul.f32 %v1712_v32, %v1668_v11  ;;  %v1506_v32 = vstv %s1505_s13 }
 0x4a0   : > { %1454 = vrot.lane.b32.xlu1 %v1449_v57, %s2550_s8  ;;  %1409 = vrot.lane.b32.xlu2 %v1404_v4, %s4232_s29 }
 0x4a1   : > { %v1716_v36 = vadd.f32 1.0, %v1714_v1 }
 0x4a2   : > { %v1309_v23 = vpop.permute.xlu0 %1308 }
 0x4a3   : > { %v1313_v51 = vadd.f32 %v1309_v23, %v1298_v10 }
 0x4a4   : > { %v1425_v28 = vpop.permute.xlu2 %1424  ;;  %v1423_v26 = vpop.permute.xlu1 %1422 }
 0x4a5   : > { %v1392_v15 = vadd.f32 %v1390_v46, %v1313_v51  ;;  %v1428_v42 = vadd.f32 %v1423_v26, %v1391_v21 }
 0x4a6   : > { %1721 = vrot.lane.b32.xlu0 %v1717_v18, %s2555_s25 }
 0x4a7   : > { %v1429_v24 = vadd.f32 %v1425_v28, %v1392_v15 }
 0x4a8   : > { %1518 = vrot.lane.b32.xlu2 %v1514_v7, %s4232_s29  ;;  %s1328_s29 = sadd.s32 18, %s2734_s3  ;;  %s4046_s3 = sshll.u32 %s2713_s27, 4 }
 0x4a9   : > { %s4052_s17 = scalar_lea.vmem [#allocation10], %s4046_s3 }
 0x4aa   : > { %v1468_v14 = vpop.permute.xlu0 %1467 }
 0x4ab   : > { %v1473_v43 = vadd.f32 %v1468_v14, %v1428_v42 }
 0x4ac   : > { %v1499_v40 = vpop.permute.xlu2 %1498  ;;  %v1470_v55 = vpop.permute.xlu1 %1469 }
 0x4ad   : > { %v3985_v52 = vsel %vm350_vm3, %v1499_v40, %v3713_v27  ;;  %v1560_v58 = vadd.f32 %v1558_v41, %v1473_v43  ;;  %v1474_v49 = vadd.f32 %v1470_v55, %v1429_v24  ;;  %v1662_v27 = vmul.f32 0.5, %v3857_v17 }
 0x4ae   : > { %v1529_v61 = vmul.f32 %v1528_v54, %v3985_v52 }
 0x4af   : > { %v1561_v6 = vadd.f32 %v1559_v13, %v1474_v49  ;;  %v3997_v30 = vmul.f32 %v1716_v36, %v1662_v27 }
 0x4b0   : > { %1533 = vrot.lane.b32.xlu1 %v1529_v61, %s2550_s8 }
 0x4b2   : > { %v1501_v38 = vpop.permute.xlu0 %1500 }
 0x4b3   : > { %v3993_v48 = vsel %vm350_vm3, %v1501_v38, %v3704_v8 }
 0x4b4   : > { %v1530_v9 = vmul.f32 %v1528_v54, %v3993_v48  ;;  %v1570_v44 = vpop.permute.xlu1 %1569  ;;  %v1572_v17 = vpop.permute.xlu2 %1571  ;;  %v1507_v54 = vmul.f32 %v1506_v32, %v3985_v52  ;;  %v1508_v13 = vmul.f32 %v1506_v32, %v3993_v48 }
 0x4b5   : > { %v1575_v22 = vadd.f32 %v1570_v44, %v1560_v58  ;;  %v1576_v29 = vadd.f32 %v1572_v17, %v1561_v6 }
 0x4b6   : > { %1535 = vrot.lane.b32.xlu2 %v1530_v9, %s2550_s8  ;;  %s1329_s8 = sld [smem:[#allocation8 + %s1328_s29]] }
 0x4b8   : > { %1723 = vrot.lane.b32.xlu1 %v3997_v30, %s2555_s25 }
 0x4ba   : > { %v1585_v20 = vpop.permute.xlu0 %1584 }
 0x4bb   : > { %v1590_v34 = vadd.f32 %v1585_v20, %v1575_v22 }
 0x4bc   : > { %v1087_v37 = vpop.permute.xlu2 %1086  ;;  %v1330_v4 = vstv %s1329_s8  ;;  %s1888_s8 = sand.u32 1, %s2632_s26  }
 0x4bd   : > { %vm1649_vm8 = vcmp.ge.f32.partialorder %v1590_v34, 0.0  ;;  %v1651_v50 = vmul.f32 0.01, %v1590_v34  ;;  %v1332_v10 = vmul.f32 %v1330_v4, %v3926_v62  ;;  %v1092_v25 = vadd.f32 %v1087_v37, %v3919_v53  ;;  %s4084_s2 = scalar_lea.sflag [#allocation12], %s1888_s8 }
 0x4be   : > { %v1331_v35 = vmul.f32 %v1330_v4, %v3953_v56  ;;  %v1395_v62 = vstv %s1394_s11  ;;  %s1907_s11 = scalar_lea.hbm %s4242_s7, %s4070_s1 }
 0x4bf   : > { %v1653_v8 = vsel %vm1649_vm8, %v1590_v34, %v1651_v50  ;;  %v1396_v15 = vmul.f32 %v1395_v62, %v3648_v16  ;;  %v1397_v53 = vmul.f32 %v1395_v62, %v3678_v47 }
 0x4c0   : > { %1789 = vrot.lane.b32.xlu2 %v1653_v8, %s2555_s25 }
 0x4c2   : > { %v1089_v3 = vpop.permute.xlu0 %1088 }
 0x4c3   : > { %v1093_v33 = vadd.f32 %v1089_v3, %v3900_v60 }
 0x4cc   : > { %v1587_v5 = vpop.permute.xlu1 %1586 }
 0x4cd   : > { %v1591_v12 = vadd.f32 %v1587_v5, %v1576_v29  ;;  %v1343_v39 = vpop.permute.xlu0 %1342 }
 0x4cf   : > { %vm1650_vm9 = vcmp.ge.f32.partialorder %v1591_v12, 0.0  ;;  %v1652_v0 = vmul.f32 0.01, %v1591_v12 }
 0x4d1   : > { %v4004_v2 = vsel %vm1650_vm9, %v1591_v12, %v1652_v0 }
 0x4d2   : > { %1791 = vrot.lane.b32.xlu0 %v4004_v2, %s2555_s25  ;;  %s305_s25 = scalar_lea.vmem [#allocation11], %s4046_s3 }
 0x4d3   : > { %s1927_s29 = sshll.u32 %s305_s25, 4  ;;  %s1928_s29 = int_to_ptr.vmem [resolvable:$true] %s1927_s29 }
 0x4d8   : > { %v1104_v59 = vpop.permute.xlu2 %1103 }
 0x4d9   : > { %v1108_v57 = vadd.f32 %v1104_v59, %v1093_v33 }
 0x4da   : > { %1855 = vrot.lane.b32.xlu0 %v1717_v18, %s2556_s23 }
 0x4db   : > { %v1334_v21 = vadd.f32 %v1332_v10, %v1108_v57 }
 0x4f2   : > { %v1358_v46 = vpop.permute.xlu2 %1357 }
 0x4fa   : > { %v1102_v23 = vpop.permute.xlu1 %1101  ;;  %v1410_v56 = vpop.permute.xlu2 %1409 }
 0x4fb   : > { %v1107_v51 = vadd.f32 %v1102_v23, %v1092_v25 }
 0x4fd   : > { %v1333_v60 = vadd.f32 %v1331_v35, %v1107_v51 }
 0x4ff   : > { %v1348_v28 = vadd.f32 %v1343_v39, %v1333_v60 }
 0x500   : > { %v1360_v45 = vpop.permute.xlu0 %1359 }
 0x501   : > { %v1363_v26 = vadd.f32 %v1358_v46, %v1348_v28 }
 0x502   : > { %v1345_v18 = vpop.permute.xlu1 %1344  ;;  %v1519_v11 = vpop.permute.xlu2 %1518 }
 0x503   : > { %v1349_v7 = vadd.f32 %v1345_v18, %v1334_v21  ;;  %v1398_v63 = vadd.f32 %v1396_v15, %v1363_v26 }
 0x505   : > { %v1364_v42 = vadd.f32 %v1360_v45, %v1349_v7 }
 0x507   : > { %v1399_v14 = vadd.f32 %v1397_v53, %v1364_v42 }
 0x508   : > { %v1453_v19 = vpop.permute.xlu0 %1452 }
 0x509   : > { %v1414_v16 = vadd.f32 %v1410_v56, %v1399_v14 }
 0x50a   : > { %v1408_v41 = vpop.permute.xlu1 %1407 }
 0x50b   : > { %v1413_v43 = vadd.f32 %v1408_v41, %v1398_v63 }
 0x50d   : > { %v1458_v24 = vadd.f32 %v1453_v19, %v1413_v43 }
 0x50f   : > { %v1509_v55 = vadd.f32 %v1507_v54, %v1458_v24 }
 0x510   : > { %v1521_v40 = vpop.permute.xlu0 %1520  ;;  %v1536_v38 = vpop.permute.xlu2 %1535 }
 0x511   : > { %v1524_v9 = vadd.f32 %v1519_v11, %v1509_v55 }
 0x512   : > { %v1455_v58 = vpop.permute.xlu1 %1454 }
 0x513   : > { %v1459_v61 = vadd.f32 %v1455_v58, %v1414_v16 }
 0x515   : > { %v1510_v49 = vadd.f32 %v1508_v13, %v1459_v61 }
 0x517   : > { %v1525_v28 = vadd.f32 %v1521_v40, %v1510_v49 }
 0x518   : > { %v1722_v1 = vpop.permute.xlu0 %1721 }
 0x519   : > { %v4019_v47 = vsub.f32 %v1653_v8, %v1722_v1  ;;  %v1540_v42 = vadd.f32 %v1536_v38, %v1525_v28 }
 0x51a   : > { %v1790_v48 = vpop.permute.xlu2 %1789 }
 0x51b   : > { %v4022_v6 = vmul.f32 0.70710677, %v4019_v47  ;;  %v1646_v54 = vmul.f32 0.01, %v1540_v42  ;;  %vm1644_vm11 = vcmp.ge.f32.partialorder %v1540_v42, 0.0 }
 0x51d   : > { %v1737_v36 = vand.u32 2147483647, %v4022_v6  ;;  %vm1733_vm12 = vcmp.ge.f32.partialorder %v4022_v6, 0.0  ;;  %v1648_v38 = vsel %vm1644_vm11, %v1540_v42, %v1646_v54 }
 0x51f   : > { %v1739_v52 = vmul.f32 0.3275911, %v1737_v36  ;;  %v1769_v59 = vsub.f32 0.0, %v1737_v36 }
 0x521   : > { %v1741_v27 = vadd.f32 1.0, %v1739_v52  ;;  %v1771_v23 = vmul.f32 %v1769_v59, %v1737_v36  ;;  %v1735_v36 = vsel %vm1733_vm12, 1.0, %v2554_v31 }
 0x522   : > { %v1534_v44 = vpop.permute.xlu1 %1533 }
 0x523   : > { %2297 = vrcp.f32 %v1741_v27  ;;  %v1539_v22 = vadd.f32 %v1534_v44, %v1524_v9  ;;  %v1773_v60 = vmul.f32 1.442695, %v1771_v23 }
 0x525   : > { %vm1643_vm10 = vcmp.ge.f32.partialorder %v1539_v22, 0.0  ;;  %v1645_v20 = vmul.f32 0.01, %v1539_v22 }
 0x527   : > { %v1647_v34 = vsel %vm1643_vm10, %v1539_v22, %v1645_v20 }
 0x528   : > { %v4025_v50 = vsub.f32 %v1647_v34, %v1790_v48  ;;  %v1729_v48 = vmul.f32 0.5, %v4019_v47 }
 0x529   : > { %v2298_v8 = vpop.eup %2297 }
 0x52a   : > { %v1745_v17 = vmul.f32 %v2298_v8, %v1741_v27  ;;  %v4028_v29 = vmul.f32 0.70710677, %v4025_v50  ;;  %v1724_v5 = vpop.permute.xlu1 %1723 }
 0x52b   : > { %v4031_v12 = vsub.f32 %v4004_v2, %v1724_v5 }
 0x52c   : > { %v1747_v0 = vsub.f32 2.0, %v1745_v17  ;;  %v1805_v37 = vand.u32 2147483647, %v4028_v29  ;;  %vm1801_vm14 = vcmp.ge.f32.partialorder %v4028_v29, 0.0  ;;  %v1797_v29 = vmul.f32 0.5, %v4025_v50 }
 0x52d   : > { %v4035_v3 = vmul.f32 0.70710677, %v4031_v12  ;;  %v1730_v42 = vmul.f32 0.5, %v4031_v12 }
 0x52e   : > { %v1749_v33 = vmul.f32 %v2298_v8, %v1747_v0  ;;  %v1807_v4 = vmul.f32 0.3275911, %v1805_v37  ;;  %v1837_v41 = vsub.f32 0.0, %v1805_v37 }
 0x52f   : > { %v1738_v10 = vand.u32 2147483647, %v4035_v3  ;;  %vm1734_vm13 = vcmp.ge.f32.partialorder %v4035_v3, 0.0 }
 0x530   : > { %v1751_v57 = vmul.f32 1.0614054, %v1749_v33  ;;  %v1809_v21 = vadd.f32 1.0, %v1807_v4  ;;  %v1839_v61 = vmul.f32 %v1837_v41, %v1805_v37 }
 0x531   : > { %v1740_v39 = vmul.f32 0.3275911, %v1738_v10  ;;  %v1770_v55 = vsub.f32 0.0, %v1738_v10 }
 0x532   : > { %v1753_v25 = vadd.f32 -1.4531521, %v1751_v57  ;;  %2299 = vrcp.f32 %v1809_v21  ;;  %v1841_v8 = vmul.f32 1.442695, %v1839_v61 }
 0x533   : > { %v1742_v35 = vadd.f32 1.0, %v1740_v39  ;;  %v1772_v52 = vmul.f32 %v1770_v55, %v1738_v10 }
 0x534   : > { %v1755_v2 = vmul.f32 %v1753_v25, %v1749_v33 }
 0x535   : > { %2301 = vrcp.f32 %v1742_v35  ;;  %v1775_v5 = vmul.f32 1.442695, %v1772_v52 }
 0x536   : > { %v1757_v51 = vadd.f32 1.4214138, %v1755_v2  ;;  %2303 = vpow2.f32 %v1773_v60 }
 0x537   : > { %2305 = vpow2.f32 %v1841_v8 }
 0x538   : > { %v2300_v46 = vpop.eup %2299  ;;  %v1759_v45 = vmul.f32 %v1757_v51, %v1749_v33  ;;  %2307 = vpow2.f32 %v1775_v5 }
 0x539   : > { %v1813_v62 = vmul.f32 %v2300_v46, %v1809_v21 }
 0x53a   : > { %v1761_v15 = vadd.f32 -0.28449672, %v1759_v45 }
 0x53b   : > { %v2302_v26 = vpop.eup %2301  ;;  %v1815_v18 = vsub.f32 2.0, %v1813_v62 }
 0x53c   : > { %v1763_v7 = vmul.f32 %v1761_v15, %v1749_v33  ;;  %v1746_v63 = vmul.f32 %v2302_v26, %v1742_v35  ;;  %v2304_v24 = vpop.eup %2303 }
 0x53d   : > { %v1817_v53 = vmul.f32 %v2300_v46, %v1815_v18  ;;  %v2306_v2 = vpop.eup %2305 }
 0x53e   : > { %v1765_v19 = vadd.f32 0.2548296, %v1763_v7  ;;  %v1748_v14 = vsub.f32 2.0, %v1746_v63  ;;  %v2308_v60 = vpop.eup %2307 }
 0x53f   : > { %v1819_v56 = vmul.f32 1.0614054, %v1817_v53 }
 0x540   : > { %v1767_v32 = vmul.f32 %v1765_v19, %v1749_v33  ;;  %v1750_v43 = vmul.f32 %v2302_v26, %v1748_v14  ;;  %v1736_v26 = vsel %vm1734_vm13, 1.0, %v2554_v31  ;;  %v1803_v14 = vsel %vm1801_vm14, 1.0, %v2554_v31 }
 0x541   : > { %v1821_v40 = vadd.f32 -1.4531521, %v1819_v56 }
 0x542   : > { %v1777_v16 = vmul.f32 %v2304_v24, %v1767_v32  ;;  %v1752_v11 = vmul.f32 1.0614054, %v1750_v43 }
 0x543   : > { %v1823_v58 = vmul.f32 %v1821_v40, %v1817_v53 }
 0x544   : > { %v1779_v13 = vsub.f32 1.0, %v1777_v16  ;;  %v1754_v49 = vadd.f32 -1.4531521, %v1752_v11  ;;  %v1792_v1 = vpop.permute.xlu0 %1791 }
 0x545   : > { %v4040_v27 = vsub.f32 %v1648_v38, %v1792_v1  ;;  %v1825_v9 = vadd.f32 1.4214138, %v1823_v58 }
 0x546   : > { %v1781_v44 = vmul.f32 %v1779_v13, %v1735_v36  ;;  %v1756_v22 = vmul.f32 %v1754_v49, %v1750_v43 }
 0x547   : > { %v4043_v20 = vmul.f32 0.70710677, %v4040_v27  ;;  %v1827_v6 = vmul.f32 %v1825_v9, %v1817_v53  ;;  %v1798_v52 = vmul.f32 0.5, %v4040_v27 }
 0x548   : > { %v1783_v34 = vadd.f32 1.0, %v1781_v44  ;;  %v1758_v17 = vadd.f32 1.4214138, %v1756_v22 }
 0x549   : > { %v1806_v0 = vand.u32 2147483647, %v4043_v20  ;;  %v1829_v37 = vadd.f32 -0.28449672, %v1827_v6  ;;  %vm1802_vm15 = vcmp.ge.f32.partialorder %v4043_v20, 0.0 }
 0x54a   : > { %v1785_v33 = vmul.f32 %v1783_v34, %v1729_v48  ;;  %v1760_v4 = vmul.f32 %v1758_v17, %v1750_v43  ;;  %v1804_v50 = vsel %vm1802_vm15, 1.0, %v2554_v31 }
 0x54b   : > { %v1808_v59 = vmul.f32 0.3275911, %v1806_v0  ;;  %v1831_v10 = vmul.f32 %v1829_v37, %v1817_v53  ;;  %v1838_v3 = vsub.f32 0.0, %v1806_v0 }
 0x54c   : > { %v1762_v57 = vadd.f32 -0.28449672, %v1760_v4  ;;  %1865 = vrot.lane.b32.xlu1 %v1785_v33, %s2557_s10  ;;  %v1856_v21 = vpop.permute.xlu0 %1855 }
 0x54d   : > { %v1810_v47 = vadd.f32 1.0, %v1808_v59  ;;  %1861 = vst.msk [vmem:[%s4052_s17] sm:$0xff] %vm331_vm1, %v1856_v21  ;;  %v1833_v39 = vadd.f32 0.2548296, %v1831_v10 }
 0x54e   : > { %v1764_v25 = vmul.f32 %v1762_v57, %v1750_v43 }
 0x54f   : > { %2309 = vrcp.f32 %v1810_v47  ;;  %v1835_v35 = vmul.f32 %v1833_v39, %v1817_v53 }
 0x550   : > { %v1766_v23 = vadd.f32 0.2548296, %v1764_v25 }
 0x551   : > { %v1845_v28 = vmul.f32 %v2306_v2, %v1835_v35 }
 0x552   : > { %v1768_v51 = vmul.f32 %v1766_v23, %v1750_v43  ;;  %v1840_v43 = vmul.f32 %v1838_v3, %v1806_v0 }
 0x553   : > { %v1847_v63 = vsub.f32 1.0, %v1845_v28 }
 0x554   : > { %v1778_v46 = vmul.f32 %v2308_v60, %v1768_v51  ;;  %1857 = vrot.lane.b32.xlu1 %v3997_v30, %s2556_s23  ;;  %v1843_v40 = vmul.f32 1.442695, %v1840_v43  ;;  %s1929_s23 = sshll.u32 %s1926_s18, 4  ;;  %s1930_s23 = int_to_ptr.hbm [resolvable:$true] %s1929_s23 }
 0x555   : > { %v2310_v45 = vpop.eup %2309  ;;  %v1849_v32 = vmul.f32 %v1847_v63, %v1803_v14  ;;  %s2389_s13 = sshra.s32 %s1930_s23, 4  ;;  %s2390_s13 = int_to_ptr.hbm [resolvable:$true] %s2389_s13 }
 0x556   : > { %v1780_v62 = vsub.f32 1.0, %v1778_v46  ;;  %v1814_v15 = vmul.f32 %v2310_v45, %v1810_v47  ;;  %2311 = vpow2.f32 %v1843_v40  ;;  %p2396_p11 = scmp.lt.s32.totalorder %s2390_s13, %s4172_s4 }
 0x557   : > { %v1851_v24 = vadd.f32 1.0, %v1849_v32 }
 0x558   : > { %v1782_v18 = vmul.f32 %v1780_v62, %v1736_v26  ;;  %v1816_v7 = vsub.f32 2.0, %v1814_v15 }
 0x559   : > { %v1853_v12 = vmul.f32 %v1851_v24, %v1797_v29 }
 0x55a   : > { %v1784_v53 = vadd.f32 1.0, %v1782_v18  ;;  %v1818_v19 = vmul.f32 %v2310_v45, %v1816_v7 }
 0x55c   : > { %v1786_v56 = vmul.f32 %v1784_v53, %v1730_v42  ;;  %v1820_v30 = vmul.f32 1.0614054, %v1818_v19  ;;  %v2312_v49 = vpop.eup %2311 }
 0x55e   : > { %v1822_v41 = vadd.f32 -1.4531521, %v1820_v30  ;;  %1867 = vrot.lane.b32.xlu2 %v1786_v56, %s2557_s10  ;;  %s2391_s10 = scalar_lea.hbm %s2390_s13, 16 }
 0x55f   : > { %p2392_p3 = scmp.ne.s32.totalorder %s2390_s13, %s2391_s10  ;;  %p2397_p12 = scmp.lt.s32.totalorder %s2395_s12, %s2391_s10 }
 0x560   : > { %v1824_v54 = vmul.f32 %v1822_v41, %v1818_v19 }
 0x561   : > { %p2393_p7 = pnand %p2392_p3, %p2655_p8  ;;  %p2398_p13 = por %p2397_p12, %p2396_p11 }
 0x562   : > { %v1826_v55 = vadd.f32 1.4214138, %v1824_v54 }
 0x563   : > { %p2394_p10 = pneg %p2393_p7 }
 0x564   : > { %v1828_v16 = vmul.f32 %v1826_v55, %v1818_v19 }
 0x565   : > { %p2399_p0 = pnand %p2398_p13, %p2394_p10 }
 0x566   : > { %v1830_v11 = vadd.f32 -0.28449672, %v1828_v16  ;;  %1875 = vrot.lane.b32.xlu2 %v1853_v12, %s2558_s15 }
 0x568   : > { %v1832_v58 = vmul.f32 %v1830_v11, %v1818_v19 }
 0x56a   : > { %v1834_v13 = vadd.f32 0.2548296, %v1832_v58 }
 0x56c   : > { %v1836_v61 = vmul.f32 %v1834_v13, %v1818_v19 }
 0x56e   : > { %v1846_v1 = vmul.f32 %v2312_v49, %v1836_v61 }
 0x570   : > { %v1848_v38 = vsub.f32 1.0, %v1846_v1 }
 0x572   : > { %v1850_v36 = vmul.f32 %v1848_v38, %v1804_v50 }
 0x574   : > { %v1852_v9 = vadd.f32 1.0, %v1850_v36 }
 0x576   : > { %v1854_v44 = vmul.f32 %v1852_v9, %v1798_v52 }
 0x578   : > { %1877 = vrot.lane.b32.xlu0 %v1854_v44, %s2558_s15 }
 0x5b8   : > { %v1868_v22 = vpop.permute.xlu2 %1867 }
 0x5b9   : > { %1872 = vst.msk [vmem:[%s305_s25 + $0x8] sm:$0xff] %vm331_vm1, %v1868_v22 }
 0x5be   : > { %v1866_v31 = vpop.permute.xlu1 %1865 }
 0x5bf   : > { %1871 = vst.msk [vmem:[%s305_s25] sm:$0xff] %vm331_vm1, %v1866_v31 }
 0x5c0   : > { %v1876_v27 = vpop.permute.xlu2 %1875 }
 0x5c1   : > { %2402 = shalt.err (!%p2399_p0)
}
 0x5c2   : > { %s2559_s28 = smov 128   ;;  %s2560_s30 = smov 8  }
 0x5c3   : > { %2175 = dma.vmem_to_hbm [thread:$0]  (%p2655_p8), %s1928_s29, 256, %s1930_s23, %s4084_s2, %s2559_s28, %s2559_s28, %s2560_s30  }
 0x5c4   : > { %s1908_s18 = sshll.u32 %s4052_s17, 4  ;;  %s312_s25 = scalar_lea.vmem [#allocation13], %s4046_s3  ;;  %s1909_s18 = int_to_ptr.vmem [resolvable:$true] %s1908_s18 }
 0x5c5   : > { %1881 = vst.msk [vmem:[%s312_s25] sm:$0xff] %vm331_vm1, %v1876_v27  ;;  %s1910_s8 = sshll.u32 %s1907_s11, 4  ;;  %s1884_s21 = scalar_lea.sflag [#allocation5], %s2713_s27  ;;  %s1911_s8 = int_to_ptr.hbm [resolvable:$true] %s1910_s8 }
 0x5c6   : > { %v1858_v20 = vpop.permute.xlu1 %1857  ;;  %s2417_s22 = sshra.s32 %s1911_s8, 4  ;;  %s2423_s3 = scalar_lea.hbm %s4242_s7, 64  ;;  %s2418_s22 = int_to_ptr.hbm [resolvable:$true] %s2417_s22 }
 0x5c7   : > { %1862 = vst.msk [vmem:[%s4052_s17 + $0x8] sm:$0xff] %vm331_vm1, %v1858_v20  ;;  %s2419_s13 = scalar_lea.hbm %s2418_s22, 16  ;;  %p2424_p5 = scmp.lt.s32.totalorder %s2418_s22, %s4242_s7 }
 0x5c8   : > { %p2420_p1 = scmp.ne.s32.totalorder %s2418_s22, %s2419_s13  ;;  %p2425_p6 = scmp.lt.s32.totalorder %s2423_s3, %s2419_s13 }
 0x5ca   : > { %p2421_p2 = pnand %p2420_p1, %p2655_p8  ;;  %p2426_p3 = por %p2425_p6, %p2424_p5 }
 0x5cc   : > { %p2422_p4 = pneg %p2421_p2 }
 0x5ce   : > { %p2427_p7 = pnand %p2426_p3, %p2422_p4 }
 0x5d0   : > { %2430 = shalt.err (!%p2427_p7)
}
 0x5d1   : > { %2174 = dma.vmem_to_hbm [thread:$0]  (%p2655_p8), %s1909_s18, 256, %s1911_s8, %s1884_s21, %s2559_s28, %s2559_s28, %s2560_s30  }
 0x5d2   : > { %s4243_s11 = sld [smem:[#allocation32_spill]]  ;;  %s1946_s12 = sshll.u32 %s312_s25, 4  ;;  %s1947_s12 = int_to_ptr.vmem [resolvable:$true] %s1946_s12 }
 0x5d8   : > { %s1945_s15 = scalar_lea.hbm %s4243_s11, %s4070_s1  ;;  %s2451_s8 = scalar_lea.hbm %s4243_s11, 64 }
 0x5d9   : > { %s1948_s16 = sshll.u32 %s1945_s15, 4  ;;  %s1949_s16 = int_to_ptr.hbm [resolvable:$true] %s1948_s16 }
 0x5da   : > { %s2445_s14 = sshra.s32 %s1949_s16, 4  ;;  %s2446_s14 = int_to_ptr.hbm [resolvable:$true] %s2445_s14 }
 0x5db   : > { %s2447_s22 = scalar_lea.hbm %s2446_s14, 16  ;;  %p2452_p13 = scmp.lt.s32.totalorder %s2446_s14, %s4243_s11 }
 0x5dc   : > { %p2448_p10 = scmp.ne.s32.totalorder %s2446_s14, %s2447_s22  ;;  %p2453_p0 = scmp.lt.s32.totalorder %s2451_s8, %s2447_s22 }
 0x5de   : > { %p2449_p11 = pnand %p2448_p10, %p2655_p8  ;;  %p2454_p1 = por %p2453_p0, %p2452_p13 }
 0x5e0   : > { %p2450_p12 = pneg %p2449_p11 }
 0x5e2   : > { %p2455_p2 = pnand %p2454_p1, %p2450_p12 }
 0x5ea   : > { %v1878_v6 = vpop.permute.xlu0 %1877 }
 0x5eb   : > { %1882 = vst.msk [vmem:[%s312_s25 + $0x8] sm:$0xff] %vm331_vm1, %v1878_v6 }
 0x5ec   : > { %2458 = shalt.err (!%p2455_p2)
}
 0x5ed   : > { %2176 = dma.vmem_to_hbm [thread:$0]  (%p2655_p8), %s1947_s12, 256, %s1949_s16, %s4084_s2, %s2559_s28, %s2559_s28, %s2560_s30  }
 0x5ee PF: > { %s4244_s25 = sld [smem:[#allocation21_spill]] }
 0x5ef   : > { %s4245_s10 = sld [smem:[#allocation19_spill]] }
 0x5f4   : > { %p2206_p4 = scmp.ge.s32.totalorder %s4244_s25, 2 }
 0x5f5   : > { %s1963_s3 = sand.u32 1, %s4245_s10  }
 0x5f6   : > { %p2192_p5 = pnand %p2206_p4, %p2659_p9  ;;  %s1964_s23 = scalar_lea.sflag [#allocation5], %s1963_s3 }
 0x5f8   : > { %p2193_p6 = pneg %p2192_p5 }
 0x5fa   : > { %2504 = dma.done.wait (%p2193_p6), %s1964_s23, 256  }
 0x5fb   : > { %2506 = vsyncadd (%p2193_p6), %s1964_s23, 4294967040  ;;  %s4247_s26 = sadd.s32 4294967294, %s4244_s25  }
 0x5fc   : > { %s1973_s6 = sand.u32 1, %s4247_s26  }
 0x5fd   : > { %s1974_s27 = scalar_lea.sflag [#allocation12], %s1973_s6 }
 0x5fe   : > { %2508 = dma.done.wait (%p2193_p6), %s1974_s27, 512  }
 0x5ff   : > { %2510 = vsyncadd (%p2193_p6), %s1974_s27, 4294966784  ;;  %s27_s25 = sadd.s32 1, %s4244_s25   ;;  %s4248_s21 = sld [smem:[#allocation20_spill]] }
 0x600   : > { %p24_p8 = scmp.ge.s32.totalorder %s27_s25, 6   ;;  %s4249_s23 = sld [smem:[#allocation23_spill]] }
 0x601   : > { %s4250_s18 = smov %s2517_s19  ;;  %s4251_s19 = smov %s2521_s20 }
 0x602   : > { %s4252_s20 = smov %s2706_s5  ;;  %s4253_s22 = smov %s2537_s24 }
 0x603   : > { %s4254_s24 = smov %s4260_s9  ;;  %26 = sbr.rel (!%p24_p8) target bundleno = 16 (0x10), region = 121 }
 0x608   :  { %1990 = vsyncpa [#allocation4], 1 }
 0x609   :  { %1992 = vsyncpa [#allocation4 + $0x1], 1 }
 0x60a   :  { %1993 = vsyncpa [#allocation5], 1 }
 0x60b   :  { %1995 = vsyncpa [#allocation5 + $0x1], 1 }
 0x60c   :  { %1996 = vsyncpa [#allocation12], 1 }
 0x60d   :  { %1998 = vsyncpa [#allocation12 + $0x1], 1 }
 0x60e   :  { %1999 = vsyncpa [#allocation6], 1 }
 0x60f   :  { %2001 = vsyncpa [#allocation6 + $0x1], 1 }
 0x610   :  { %2002 = vsyncpa [#allocation7], 1 }
 0x611   :  { %2004 = vsyncpa [#allocation7 + $0x1], 1 }

</bundles_post_ra>
